<compile_context>
chip_gen: v7x
topology: tpu7x:2x2x1
jax: 0.10.0
libtpu: 0.0.40
codegen_flags: <defaults>
</compile_context>

<pallas_src>
import jax
import jax.numpy as jnp
from jax import lax
from jax.experimental import pallas as pl
from jax.experimental.pallas import tpu as pltpu


# ----------------------------------------------------------------------------
# Geometry (the Linear(8192) head pins conv3's output to 64 x 8 x 16, which
# implies a 4 x 178 x 306 NCHW input, exactly like the PyTorch module).
# ----------------------------------------------------------------------------
C0, H0, W0 = 4, 178, 306
O1, K1, S1 = 32, 10, 8
O2, K2, S2 = 64, 4, 2
O3, K3, S3 = 64, 3, 1
H1, W1 = (H0 - K1) // S1 + 1, (W0 - K1) // S1 + 1      # 22, 38
H2, W2 = (H1 - K2) // S2 + 1, (W1 - K2) // S2 + 1      # 10, 18
H3, W3 = (H2 - K3) // S3 + 1, (W2 - K3) // S3 + 1      # 8, 16
HH1, WW1 = H1 // 2, W1 // 2                            # 11, 19 parity-split conv1 grid
FAT = 20                                               # fat row pitch of all in-kernel layouts
KP1 = C0 * K1 * K1                                     # 400 conv1 im2col features, (c, i, j) order
N1 = pl.cdiv(2 * 2 * HH1 * FAT, 128) * 128             # 896 conv1 output columns (lane aligned)
N3 = H3 * FAT                                          # 160 conv3 output columns
N2 = H2 * FAT + 8                                      # 208 conv2 output columns (+slack for shifted reads)
HEAD = 8                                               # 1 (v) + n_actions (adv) rows, padded to 8

assert O3 * H3 * W3 == 8192
assert ((2 * 2 - 1) * HH1 + 1) * FAT + 1 + N2 <= N1    # conv2 shifted reads stay inside a1
assert (K3 - 1) * FAT + (K3 - 1) + N3 <= N2            # conv3 shifted reads stay inside a2


# ----------------------------------------------------------------------------
# Fused kernel: one grid step == one batch element, everything stays in VMEM.
# ----------------------------------------------------------------------------
def _dqn_fused_kernel(p1_ref, w1_ref, b1_ref, w2_ref, b2_ref, w3_ref, b3_ref,
                      wh_ref, bh_ref, out_ref):
    # conv1: one lane-dense MXU matmul over the host-built (c,i,j) x (ph,pw,h2,w2) patches.
    a1 = jnp.dot(w1_ref[...], p1_ref[0],
                 preferred_element_type=jnp.float32)                 # (32, 896) f32
    # TODO(synk): layer_norm hook would go here (and after the other convs).
    a1 = jnp.maximum(a1 + b1_ref[...], 0.0).astype(jnp.bfloat16)

    # conv2 (k=4, s=2): 16 shifted contiguous-slice matmuls, f32 accumulation.
    acc2 = jnp.zeros((O2, N2), jnp.float32)
    for i in range(K2):
        pi, qi = i // 2, i % 2
        for j in range(K2):
            pj, qj = j // 2, j % 2
            st = ((qi * 2 + qj) * HH1 + pi) * FAT + pj
            acc2 = acc2 + jnp.dot(w2_ref[i, j], a1[:, st:st + N2],
                                  preferred_element_type=jnp.float32)
    a2 = jnp.maximum(acc2 + b2_ref[...], 0.0).astype(jnp.bfloat16)   # (64, 208)

    # conv3 (k=3, s=1): 9 shifted contiguous-slice matmuls.
    acc3 = jnp.zeros((O3, N3), jnp.float32)
    for i in range(K3):
        for j in range(K3):
            st = i * FAT + j
            acc3 = acc3 + jnp.dot(w3_ref[i, j], a2[:, st:st + N3],
                                  preferred_element_type=jnp.float32)
    a3 = jnp.maximum(acc3 + b3_ref[...], 0.0)                        # (64, 160) f32

    # Dueling head: fc1 || fc2 fused into one weighted reduction over (c, hw).
    # Garbage "fat" columns of a3 carry zero weight (host-prepared), so they drop out.
    t = jnp.sum(wh_ref[...] * a3[None, :, :], axis=-1)               # (8, 64)
    head = jnp.sum(t, axis=-1, keepdims=True) + bh_ref[...]          # (8, 1): [v, adv_0..adv_5, 0]
    out_ref[...] = jnp.broadcast_to(head, (1, HEAD, 128))


# ----------------------------------------------------------------------------
# Host-side prep (pure layout ops, fused by XLA into the same jitted program).
# ----------------------------------------------------------------------------
def _build_conv1_patches(x):
    """im2col for conv1 only, columns in the parity-split fat layout the kernel expects."""
    B = x.shape[0]
    xp = jnp.pad(x, ((0, 0), (0, 0), (0, 8 * (H1 + 1) - H0), (0, 8 * (W1 + 1) - W0)))
    z = xp.reshape(B, C0, H1 + 1, 8, W1 + 1, 8)
    zh = jnp.concatenate([z[:, :, :H1], z[:, :, 1:, :2]], axis=3)            # (B,4,22,10,39,8)
    zw = jnp.concatenate([zh[:, :, :, :, :W1], zh[:, :, :, :, 1:, :2]], axis=5)  # (B,4,22,10,38,10)
    # zw[b,c,h1,i,w1,j] = x[b,c,8*h1+i,8*w1+j]  ->  (b, (c,i,j), (ph,pw,h2,w2)) fat layout
    t = zw.reshape(B, C0, HH1, 2, K1, WW1, 2, K1)
    t = jnp.transpose(t, (0, 1, 4, 7, 3, 6, 2, 5))                           # (B,4,10,10,2,2,11,19)
    t = jnp.pad(t, ((0, 0),) * 7 + ((0, FAT - WW1),))                        # w2: 19 -> 20 (zeros)
    t = t.reshape(B, KP1, 2 * 2 * HH1 * FAT)                                 # (B, 400, 880)
    t = jnp.pad(t, ((0, 0), (0, 0), (0, N1 - 2 * 2 * HH1 * FAT)))            # -> (B, 400, 896)
    return t.astype(jnp.bfloat16)


def _prepare_params(params):
    n_act = params["fc2_w"].shape[1]
    assert 1 + n_act <= HEAD
    w1m = params["w1"].reshape(O1, KP1).astype(jnp.bfloat16)                 # rows o, cols (c,i,j)
    w2m = jnp.transpose(params["w2"], (2, 3, 0, 1)).astype(jnp.bfloat16)     # (4,4,64,32) = [i,j,o,c]
    w3m = jnp.transpose(params["w3"], (2, 3, 0, 1)).astype(jnp.bfloat16)     # (3,3,64,64)
    b1 = params["b1"].reshape(O1, 1).astype(jnp.float32)
    b2 = params["b2"].reshape(O2, 1).astype(jnp.float32)
    b3 = params["b3"].reshape(O3, 1).astype(jnp.float32)
    # Fused head: rows [v, adv_0..adv_{A-1}, zero pad]; columns follow the kernel's
    # fat (c, h3, pitch-20) conv3 layout -> zero weight on garbage columns.
    wl = jnp.concatenate([params["fc1_w"], params["fc2_w"]], axis=1).T       # (1+A, 8192)
    wl = wl.reshape(1 + n_act, O3, H3, W3)
    wl = jnp.pad(wl, ((0, HEAD - 1 - n_act), (0, 0), (0, 0), (0, FAT - W3)))
    whm = wl.reshape(HEAD, O3, N3).astype(jnp.float32)                       # (8, 64, 160)
    bh = jnp.pad(jnp.concatenate([params["fc1_b"], params["fc2_b"]]),
                 (0, HEAD - 1 - n_act)).reshape(HEAD, 1).astype(jnp.float32)
    return w1m, b1, w2m, b2, w3m, b3, whm, bh


@jax.jit
def deep_q_network_forward(params, x):
    B = x.shape[0]
    n_act = params["fc2_w"].shape[1]
    p1 = _build_conv1_patches(x)
    w1m, b1, w2m, b2, w3m, b3, whm, bh = _prepare_params(params)

    out = pl.pallas_call(
        _dqn_fused_kernel,
        out_shape=jax.ShapeDtypeStruct((B, HEAD, 128), jnp.float32),
        grid=(B,),
        in_specs=[
            pl.BlockSpec((1, KP1, N1), lambda b: (b, 0, 0)),
            pl.BlockSpec((O1, KP1), lambda b: (0, 0)),
            pl.BlockSpec((O1, 1), lambda b: (0, 0)),
            pl.BlockSpec((K2, K2, O2, O1), lambda b: (0, 0, 0, 0)),
            pl.BlockSpec((O2, 1), lambda b: (0, 0)),
            pl.BlockSpec((K3, K3, O3, O2), lambda b: (0, 0, 0, 0)),
            pl.BlockSpec((O3, 1), lambda b: (0, 0)),
            pl.BlockSpec((HEAD, O3, N3), lambda b: (0, 0, 0)),
            pl.BlockSpec((HEAD, 1), lambda b: (0, 0)),
        ],
        out_specs=pl.BlockSpec((1, HEAD, 128), lambda b: (b, 0, 0)),
        compiler_params=pltpu.CompilerParams(dimension_semantics=("parallel",)),
    )(p1, w1m, b1, w2m, b2, w3m, b3, whm, bh)

    heads = out[:, :1 + n_act, 0]                     # (B, 1+A) = [v | adv]
    v, adv = heads[:, :1], heads[:, 1:]
    # torch semantics: global mean over batch AND actions (torch.mean(advantage)).
    return v + adv - jnp.mean(adv)


# ----------------------------------------------------------------------------
# Pure-JAX reference (same math, XLA convs) for a correctness sanity check.
# ----------------------------------------------------------------------------
def _reference_forward(params, x):
    dn = ("NCHW", "OIHW", "NCHW")
    h = jax.nn.relu(lax.conv_general_dilated(x, params["w1"], (S1, S1), "VALID",
                                             dimension_numbers=dn)
                    + params["b1"][None, :, None, None])
    h = jax.nn.relu(lax.conv_general_dilated(h, params["w2"], (S2, S2), "VALID",
                                             dimension_numbers=dn)
                    + params["b2"][None, :, None, None])
    h = jax.nn.relu(lax.conv_general_dilated(h, params["w3"], (S3, S3), "VALID",
                                             dimension_numbers=dn)
                    + params["b3"][None, :, None, None])
    feat = h.reshape(h.shape[0], -1)
    v = feat @ params["fc1_w"] + params["fc1_b"]
    adv = feat @ params["fc2_w"] + params["fc2_b"]
    return v + adv - jnp.mean(adv)


if __name__ == "__main__":
    key = jax.random.PRNGKey(0)
    B, A = 2, 6
    ks = jax.random.split(key, 11)
    s = 0.05
    params = {
        "w1": jax.random.normal(ks[0], (O1, C0, K1, K1), jnp.float32) * s,
        "b1": jax.random.normal(ks[1], (O1,), jnp.float32) * s,
        "w2": jax.random.normal(ks[2], (O2, O1, K2, K2), jnp.float32) * s,
        "b2": jax.random.normal(ks[3], (O2,), jnp.float32) * s,
        "w3": jax.random.normal(ks[4], (O3, O2, K3, K3), jnp.float32) * s,
        "b3": jax.random.normal(ks[5], (O3,), jnp.float32) * s,
        # stored as (in, out) == PyTorch Linear weight transposed
        "fc1_w": jax.random.normal(ks[6], (8192, 1), jnp.float32) * s,
        "fc1_b": jax.random.normal(ks[7], (1,), jnp.float32) * s,
        "fc2_w": jax.random.normal(ks[8], (8192, A), jnp.float32) * s,
        "fc2_b": jax.random.normal(ks[9], (A,), jnp.float32) * s,
    }
    x = jax.random.normal(ks[10], (B, C0, H0, W0), jnp.float32)

    q = deep_q_network_forward(params, x)
    q = jax.block_until_ready(q)
    assert q.shape == (B, A), q.shape

    q_ref = _reference_forward(params, x)
    # bf16 MXU inputs (f32 accumulation) vs f32 XLA reference -> loose, bug-catching tolerance.
    assert jnp.allclose(q, q_ref, rtol=5e-2, atol=1e-1), (q, q_ref)

    print("KERNEL_OK")
</pallas_src>

<mosaic_0001>
module attributes {stable_mosaic.version = 11 : i64} {
  func.func @_dqn_fused_kernel(%arg0: i32, %arg1: memref<1x400x896xbf16, #tpu.memory_space<vmem>>, %arg2: memref<32x400xbf16, #tpu.memory_space<vmem>>, %arg3: memref<32x1xf32, #tpu.memory_space<vmem>>, %arg4: memref<4x4x64x32xbf16, #tpu.memory_space<vmem>>, %arg5: memref<64x1xf32, #tpu.memory_space<vmem>>, %arg6: memref<3x3x64x64xbf16, #tpu.memory_space<vmem>>, %arg7: memref<64x1xf32, #tpu.memory_space<vmem>>, %arg8: memref<8x64x160xf32, #tpu.memory_space<vmem>>, %arg9: memref<8x1xf32, #tpu.memory_space<vmem>>, %arg10: memref<1x8x128xf32, #tpu.memory_space<vmem>>) attributes {dimension_semantics = [#tpu.dimension_semantics<parallel>], iteration_bounds = array<i64: 2>, scalar_prefetch = 0 : i64, scratch_operands = 0 : i64, tpu.core_type = #tpu.core_type<tc>, window_params = [{transform_indices = @transform_0, window_bounds = array<i64: 1, 400, 896>}, {pipeline_mode = #tpu.pipeline_mode<synchronous>, transform_indices = @transform_1, window_bounds = array<i64: 32, 400>}, {pipeline_mode = #tpu.pipeline_mode<synchronous>, transform_indices = @transform_2, window_bounds = array<i64: 32, 1>}, {pipeline_mode = #tpu.pipeline_mode<synchronous>, transform_indices = @transform_3, window_bounds = array<i64: 4, 4, 64, 32>}, {pipeline_mode = #tpu.pipeline_mode<synchronous>, transform_indices = @transform_4, window_bounds = array<i64: 64, 1>}, {pipeline_mode = #tpu.pipeline_mode<synchronous>, transform_indices = @transform_5, window_bounds = array<i64: 3, 3, 64, 64>}, {pipeline_mode = #tpu.pipeline_mode<synchronous>, transform_indices = @transform_6, window_bounds = array<i64: 64, 1>}, {pipeline_mode = #tpu.pipeline_mode<synchronous>, transform_indices = @transform_7, window_bounds = array<i64: 8, 64, 160>}, {pipeline_mode = #tpu.pipeline_mode<synchronous>, transform_indices = @transform_8, window_bounds = array<i64: 8, 1>}, {transform_indices = @transform_9, window_bounds = array<i64: 1, 8, 128>}]} {
    %c0 = arith.constant 0 : index
    %c0_0 = arith.constant 0 : index
    %0 = vector.load %arg2[%c0, %c0_0] : memref<32x400xbf16, #tpu.memory_space<vmem>>, vector<32x400xbf16>
    %c0_1 = arith.constant 0 : index
    %c0_2 = arith.constant 0 : index
    %c0_3 = arith.constant 0 : index
    %1 = vector.load %arg1[%c0_1, %c0_2, %c0_3] : memref<1x400x896xbf16, #tpu.memory_space<vmem>>, vector<1x400x896xbf16>
    %2 = vector.shape_cast %1 : vector<1x400x896xbf16> to vector<400x896xbf16>
    %cst = arith.constant dense<0.000000e+00> : vector<32x896xf32>
    %3 = tpu.matmul %0, %2, %cst {dimension_numbers = #tpu.dot_dimension_numbers<[1], [0], [0], [1], [0, 0, 1, 1], [], []>} : vector<32x400xbf16>, vector<400x896xbf16>, vector<32x896xf32> -> vector<32x896xf32>
    %c0_4 = arith.constant 0 : index
    %c0_5 = arith.constant 0 : index
    %4 = vector.load %arg3[%c0_4, %c0_5] : memref<32x1xf32, #tpu.memory_space<vmem>>, vector<32x1xf32>
    %5 = vector.broadcast %4 : vector<32x1xf32> to vector<32x896xf32>
    %6 = arith.addf %3, %5 : vector<32x896xf32>
    %cst_6 = arith.constant 0.000000e+00 : f32
    %7 = vector.broadcast %cst_6 : f32 to vector<32x896xf32>
    %8 = arith.maximumf %6, %7 : vector<32x896xf32>
    %9 = arith.truncf %8 : vector<32x896xf32> to vector<32x896xbf16>
    %cst_7 = arith.constant 0.000000e+00 : f32
    %10 = vector.broadcast %cst_7 : f32 to vector<64x208xf32>
    %c0_8 = arith.constant 0 : index
    %c0_9 = arith.constant 0 : index
    %c0_10 = arith.constant 0 : index
    %c0_11 = arith.constant 0 : index
    %11 = vector.load %arg4[%c0_8, %c0_9, %c0_10, %c0_11] : memref<4x4x64x32xbf16, #tpu.memory_space<vmem>>, vector<1x1x64x32xbf16>
    %12 = vector.shape_cast %11 : vector<1x1x64x32xbf16> to vector<64x32xbf16>
    %13 = vector.extract_strided_slice %9 {offsets = [0, 0], sizes = [32, 208], strides = [1, 1]} : vector<32x896xbf16> to vector<32x208xbf16>
    %cst_12 = arith.constant dense<0.000000e+00> : vector<64x208xf32>
    %14 = tpu.matmul %12, %13, %cst_12 {dimension_numbers = #tpu.dot_dimension_numbers<[1], [0], [0], [1], [0, 0, 1, 1], [], []>} : vector<64x32xbf16>, vector<32x208xbf16>, vector<64x208xf32> -> vector<64x208xf32>
    %15 = arith.addf %10, %14 : vector<64x208xf32>
    %c0_13 = arith.constant 0 : index
    %c1 = arith.constant 1 : index
    %c0_14 = arith.constant 0 : index
    %c0_15 = arith.constant 0 : index
    %16 = vector.load %arg4[%c0_13, %c1, %c0_14, %c0_15] : memref<4x4x64x32xbf16, #tpu.memory_space<vmem>>, vector<1x1x64x32xbf16>
    %17 = vector.shape_cast %16 : vector<1x1x64x32xbf16> to vector<64x32xbf16>
    %18 = vector.extract_strided_slice %9 {offsets = [0, 220], sizes = [32, 208], strides = [1, 1]} : vector<32x896xbf16> to vector<32x208xbf16>
    %cst_16 = arith.constant dense<0.000000e+00> : vector<64x208xf32>
    %19 = tpu.matmul %17, %18, %cst_16 {dimension_numbers = #tpu.dot_dimension_numbers<[1], [0], [0], [1], [0, 0, 1, 1], [], []>} : vector<64x32xbf16>, vector<32x208xbf16>, vector<64x208xf32> -> vector<64x208xf32>
    %20 = arith.addf %15, %19 : vector<64x208xf32>
    %c0_17 = arith.constant 0 : index
    %c2 = arith.constant 2 : index
    %c0_18 = arith.constant 0 : index
    %c0_19 = arith.constant 0 : index
    %21 = vector.load %arg4[%c0_17, %c2, %c0_18, %c0_19] : memref<4x4x64x32xbf16, #tpu.memory_space<vmem>>, vector<1x1x64x32xbf16>
    %22 = vector.shape_cast %21 : vector<1x1x64x32xbf16> to vector<64x32xbf16>
    %23 = vector.extract_strided_slice %9 {offsets = [0, 1], sizes = [32, 208], strides = [1, 1]} : vector<32x896xbf16> to vector<32x208xbf16>
    %cst_20 = arith.constant dense<0.000000e+00> : vector<64x208xf32>
    %24 = tpu.matmul %22, %23, %cst_20 {dimension_numbers = #tpu.dot_dimension_numbers<[1], [0], [0], [1], [0, 0, 1, 1], [], []>} : vector<64x32xbf16>, vector<32x208xbf16>, vector<64x208xf32> -> vector<64x208xf32>
    %25 = arith.addf %20, %24 : vector<64x208xf32>
    %c0_21 = arith.constant 0 : index
    %c3 = arith.constant 3 : index
    %c0_22 = arith.constant 0 : index
    %c0_23 = arith.constant 0 : index
    %26 = vector.load %arg4[%c0_21, %c3, %c0_22, %c0_23] : memref<4x4x64x32xbf16, #tpu.memory_space<vmem>>, vector<1x1x64x32xbf16>
    %27 = vector.shape_cast %26 : vector<1x1x64x32xbf16> to vector<64x32xbf16>
    %28 = vector.extract_strided_slice %9 {offsets = [0, 221], sizes = [32, 208], strides = [1, 1]} : vector<32x896xbf16> to vector<32x208xbf16>
    %cst_24 = arith.constant dense<0.000000e+00> : vector<64x208xf32>
    %29 = tpu.matmul %27, %28, %cst_24 {dimension_numbers = #tpu.dot_dimension_numbers<[1], [0], [0], [1], [0, 0, 1, 1], [], []>} : vector<64x32xbf16>, vector<32x208xbf16>, vector<64x208xf32> -> vector<64x208xf32>
    %30 = arith.addf %25, %29 : vector<64x208xf32>
    %c1_25 = arith.constant 1 : index
    %c0_26 = arith.constant 0 : index
    %c0_27 = arith.constant 0 : index
    %c0_28 = arith.constant 0 : index
    %31 = vector.load %arg4[%c1_25, %c0_26, %c0_27, %c0_28] : memref<4x4x64x32xbf16, #tpu.memory_space<vmem>>, vector<1x1x64x32xbf16>
    %32 = vector.shape_cast %31 : vector<1x1x64x32xbf16> to vector<64x32xbf16>
    %33 = vector.extract_strided_slice %9 {offsets = [0, 440], sizes = [32, 208], strides = [1, 1]} : vector<32x896xbf16> to vector<32x208xbf16>
    %cst_29 = arith.constant dense<0.000000e+00> : vector<64x208xf32>
    %34 = tpu.matmul %32, %33, %cst_29 {dimension_numbers = #tpu.dot_dimension_numbers<[1], [0], [0], [1], [0, 0, 1, 1], [], []>} : vector<64x32xbf16>, vector<32x208xbf16>, vector<64x208xf32> -> vector<64x208xf32>
    %35 = arith.addf %30, %34 : vector<64x208xf32>
    %c1_30 = arith.constant 1 : index
    %c1_31 = arith.constant 1 : index
    %c0_32 = arith.constant 0 : index
    %c0_33 = arith.constant 0 : index
    %36 = vector.load %arg4[%c1_30, %c1_31, %c0_32, %c0_33] : memref<4x4x64x32xbf16, #tpu.memory_space<vmem>>, vector<1x1x64x32xbf16>
    %37 = vector.shape_cast %36 : vector<1x1x64x32xbf16> to vector<64x32xbf16>
    %38 = vector.extract_strided_slice %9 {offsets = [0, 660], sizes = [32, 208], strides = [1, 1]} : vector<32x896xbf16> to vector<32x208xbf16>
    %cst_34 = arith.constant dense<0.000000e+00> : vector<64x208xf32>
    %39 = tpu.matmul %37, %38, %cst_34 {dimension_numbers = #tpu.dot_dimension_numbers<[1], [0], [0], [1], [0, 0, 1, 1], [], []>} : vector<64x32xbf16>, vector<32x208xbf16>, vector<64x208xf32> -> vector<64x208xf32>
    %40 = arith.addf %35, %39 : vector<64x208xf32>
    %c1_35 = arith.constant 1 : index
    %c2_36 = arith.constant 2 : index
    %c0_37 = arith.constant 0 : index
    %c0_38 = arith.constant 0 : index
    %41 = vector.load %arg4[%c1_35, %c2_36, %c0_37, %c0_38] : memref<4x4x64x32xbf16, #tpu.memory_space<vmem>>, vector<1x1x64x32xbf16>
    %42 = vector.shape_cast %41 : vector<1x1x64x32xbf16> to vector<64x32xbf16>
    %43 = vector.extract_strided_slice %9 {offsets = [0, 441], sizes = [32, 208], strides = [1, 1]} : vector<32x896xbf16> to vector<32x208xbf16>
    %cst_39 = arith.constant dense<0.000000e+00> : vector<64x208xf32>
    %44 = tpu.matmul %42, %43, %cst_39 {dimension_numbers = #tpu.dot_dimension_numbers<[1], [0], [0], [1], [0, 0, 1, 1], [], []>} : vector<64x32xbf16>, vector<32x208xbf16>, vector<64x208xf32> -> vector<64x208xf32>
    %45 = arith.addf %40, %44 : vector<64x208xf32>
    %c1_40 = arith.constant 1 : index
    %c3_41 = arith.constant 3 : index
    %c0_42 = arith.constant 0 : index
    %c0_43 = arith.constant 0 : index
    %46 = vector.load %arg4[%c1_40, %c3_41, %c0_42, %c0_43] : memref<4x4x64x32xbf16, #tpu.memory_space<vmem>>, vector<1x1x64x32xbf16>
    %47 = vector.shape_cast %46 : vector<1x1x64x32xbf16> to vector<64x32xbf16>
    %48 = vector.extract_strided_slice %9 {offsets = [0, 661], sizes = [32, 208], strides = [1, 1]} : vector<32x896xbf16> to vector<32x208xbf16>
    %cst_44 = arith.constant dense<0.000000e+00> : vector<64x208xf32>
    %49 = tpu.matmul %47, %48, %cst_44 {dimension_numbers = #tpu.dot_dimension_numbers<[1], [0], [0], [1], [0, 0, 1, 1], [], []>} : vector<64x32xbf16>, vector<32x208xbf16>, vector<64x208xf32> -> vector<64x208xf32>
    %50 = arith.addf %45, %49 : vector<64x208xf32>
    %c2_45 = arith.constant 2 : index
    %c0_46 = arith.constant 0 : index
    %c0_47 = arith.constant 0 : index
    %c0_48 = arith.constant 0 : index
    %51 = vector.load %arg4[%c2_45, %c0_46, %c0_47, %c0_48] : memref<4x4x64x32xbf16, #tpu.memory_space<vmem>>, vector<1x1x64x32xbf16>
    %52 = vector.shape_cast %51 : vector<1x1x64x32xbf16> to vector<64x32xbf16>
    %53 = vector.extract_strided_slice %9 {offsets = [0, 20], sizes = [32, 208], strides = [1, 1]} : vector<32x896xbf16> to vector<32x208xbf16>
    %cst_49 = arith.constant dense<0.000000e+00> : vector<64x208xf32>
    %54 = tpu.matmul %52, %53, %cst_49 {dimension_numbers = #tpu.dot_dimension_numbers<[1], [0], [0], [1], [0, 0, 1, 1], [], []>} : vector<64x32xbf16>, vector<32x208xbf16>, vector<64x208xf32> -> vector<64x208xf32>
    %55 = arith.addf %50, %54 : vector<64x208xf32>
    %c2_50 = arith.constant 2 : index
    %c1_51 = arith.constant 1 : index
    %c0_52 = arith.constant 0 : index
    %c0_53 = arith.constant 0 : index
    %56 = vector.load %arg4[%c2_50, %c1_51, %c0_52, %c0_53] : memref<4x4x64x32xbf16, #tpu.memory_space<vmem>>, vector<1x1x64x32xbf16>
    %57 = vector.shape_cast %56 : vector<1x1x64x32xbf16> to vector<64x32xbf16>
    %58 = vector.extract_strided_slice %9 {offsets = [0, 240], sizes = [32, 208], strides = [1, 1]} : vector<32x896xbf16> to vector<32x208xbf16>
    %cst_54 = arith.constant dense<0.000000e+00> : vector<64x208xf32>
    %59 = tpu.matmul %57, %58, %cst_54 {dimension_numbers = #tpu.dot_dimension_numbers<[1], [0], [0], [1], [0, 0, 1, 1], [], []>} : vector<64x32xbf16>, vector<32x208xbf16>, vector<64x208xf32> -> vector<64x208xf32>
    %60 = arith.addf %55, %59 : vector<64x208xf32>
    %c2_55 = arith.constant 2 : index
    %c2_56 = arith.constant 2 : index
    %c0_57 = arith.constant 0 : index
    %c0_58 = arith.constant 0 : index
    %61 = vector.load %arg4[%c2_55, %c2_56, %c0_57, %c0_58] : memref<4x4x64x32xbf16, #tpu.memory_space<vmem>>, vector<1x1x64x32xbf16>
    %62 = vector.shape_cast %61 : vector<1x1x64x32xbf16> to vector<64x32xbf16>
    %63 = vector.extract_strided_slice %9 {offsets = [0, 21], sizes = [32, 208], strides = [1, 1]} : vector<32x896xbf16> to vector<32x208xbf16>
    %cst_59 = arith.constant dense<0.000000e+00> : vector<64x208xf32>
    %64 = tpu.matmul %62, %63, %cst_59 {dimension_numbers = #tpu.dot_dimension_numbers<[1], [0], [0], [1], [0, 0, 1, 1], [], []>} : vector<64x32xbf16>, vector<32x208xbf16>, vector<64x208xf32> -> vector<64x208xf32>
    %65 = arith.addf %60, %64 : vector<64x208xf32>
    %c2_60 = arith.constant 2 : index
    %c3_61 = arith.constant 3 : index
    %c0_62 = arith.constant 0 : index
    %c0_63 = arith.constant 0 : index
    %66 = vector.load %arg4[%c2_60, %c3_61, %c0_62, %c0_63] : memref<4x4x64x32xbf16, #tpu.memory_space<vmem>>, vector<1x1x64x32xbf16>
    %67 = vector.shape_cast %66 : vector<1x1x64x32xbf16> to vector<64x32xbf16>
    %68 = vector.extract_strided_slice %9 {offsets = [0, 241], sizes = [32, 208], strides = [1, 1]} : vector<32x896xbf16> to vector<32x208xbf16>
    %cst_64 = arith.constant dense<0.000000e+00> : vector<64x208xf32>
    %69 = tpu.matmul %67, %68, %cst_64 {dimension_numbers = #tpu.dot_dimension_numbers<[1], [0], [0], [1], [0, 0, 1, 1], [], []>} : vector<64x32xbf16>, vector<32x208xbf16>, vector<64x208xf32> -> vector<64x208xf32>
    %70 = arith.addf %65, %69 : vector<64x208xf32>
    %c3_65 = arith.constant 3 : index
    %c0_66 = arith.constant 0 : index
    %c0_67 = arith.constant 0 : index
    %c0_68 = arith.constant 0 : index
    %71 = vector.load %arg4[%c3_65, %c0_66, %c0_67, %c0_68] : memref<4x4x64x32xbf16, #tpu.memory_space<vmem>>, vector<1x1x64x32xbf16>
    %72 = vector.shape_cast %71 : vector<1x1x64x32xbf16> to vector<64x32xbf16>
    %73 = vector.extract_strided_slice %9 {offsets = [0, 460], sizes = [32, 208], strides = [1, 1]} : vector<32x896xbf16> to vector<32x208xbf16>
    %cst_69 = arith.constant dense<0.000000e+00> : vector<64x208xf32>
    %74 = tpu.matmul %72, %73, %cst_69 {dimension_numbers = #tpu.dot_dimension_numbers<[1], [0], [0], [1], [0, 0, 1, 1], [], []>} : vector<64x32xbf16>, vector<32x208xbf16>, vector<64x208xf32> -> vector<64x208xf32>
    %75 = arith.addf %70, %74 : vector<64x208xf32>
    %c3_70 = arith.constant 3 : index
    %c1_71 = arith.constant 1 : index
    %c0_72 = arith.constant 0 : index
    %c0_73 = arith.constant 0 : index
    %76 = vector.load %arg4[%c3_70, %c1_71, %c0_72, %c0_73] : memref<4x4x64x32xbf16, #tpu.memory_space<vmem>>, vector<1x1x64x32xbf16>
    %77 = vector.shape_cast %76 : vector<1x1x64x32xbf16> to vector<64x32xbf16>
    %78 = vector.extract_strided_slice %9 {offsets = [0, 680], sizes = [32, 208], strides = [1, 1]} : vector<32x896xbf16> to vector<32x208xbf16>
    %cst_74 = arith.constant dense<0.000000e+00> : vector<64x208xf32>
    %79 = tpu.matmul %77, %78, %cst_74 {dimension_numbers = #tpu.dot_dimension_numbers<[1], [0], [0], [1], [0, 0, 1, 1], [], []>} : vector<64x32xbf16>, vector<32x208xbf16>, vector<64x208xf32> -> vector<64x208xf32>
    %80 = arith.addf %75, %79 : vector<64x208xf32>
    %c3_75 = arith.constant 3 : index
    %c2_76 = arith.constant 2 : index
    %c0_77 = arith.constant 0 : index
    %c0_78 = arith.constant 0 : index
    %81 = vector.load %arg4[%c3_75, %c2_76, %c0_77, %c0_78] : memref<4x4x64x32xbf16, #tpu.memory_space<vmem>>, vector<1x1x64x32xbf16>
    %82 = vector.shape_cast %81 : vector<1x1x64x32xbf16> to vector<64x32xbf16>
    %83 = vector.extract_strided_slice %9 {offsets = [0, 461], sizes = [32, 208], strides = [1, 1]} : vector<32x896xbf16> to vector<32x208xbf16>
    %cst_79 = arith.constant dense<0.000000e+00> : vector<64x208xf32>
    %84 = tpu.matmul %82, %83, %cst_79 {dimension_numbers = #tpu.dot_dimension_numbers<[1], [0], [0], [1], [0, 0, 1, 1], [], []>} : vector<64x32xbf16>, vector<32x208xbf16>, vector<64x208xf32> -> vector<64x208xf32>
    %85 = arith.addf %80, %84 : vector<64x208xf32>
    %c3_80 = arith.constant 3 : index
    %c3_81 = arith.constant 3 : index
    %c0_82 = arith.constant 0 : index
    %c0_83 = arith.constant 0 : index
    %86 = vector.load %arg4[%c3_80, %c3_81, %c0_82, %c0_83] : memref<4x4x64x32xbf16, #tpu.memory_space<vmem>>, vector<1x1x64x32xbf16>
    %87 = vector.shape_cast %86 : vector<1x1x64x32xbf16> to vector<64x32xbf16>
    %88 = vector.extract_strided_slice %9 {offsets = [0, 681], sizes = [32, 208], strides = [1, 1]} : vector<32x896xbf16> to vector<32x208xbf16>
    %cst_84 = arith.constant dense<0.000000e+00> : vector<64x208xf32>
    %89 = tpu.matmul %87, %88, %cst_84 {dimension_numbers = #tpu.dot_dimension_numbers<[1], [0], [0], [1], [0, 0, 1, 1], [], []>} : vector<64x32xbf16>, vector<32x208xbf16>, vector<64x208xf32> -> vector<64x208xf32>
    %90 = arith.addf %85, %89 : vector<64x208xf32>
    %c0_85 = arith.constant 0 : index
    %c0_86 = arith.constant 0 : index
    %91 = vector.load %arg5[%c0_85, %c0_86] : memref<64x1xf32, #tpu.memory_space<vmem>>, vector<64x1xf32>
    %92 = vector.broadcast %91 : vector<64x1xf32> to vector<64x208xf32>
    %93 = arith.addf %90, %92 : vector<64x208xf32>
    %cst_87 = arith.constant 0.000000e+00 : f32
    %94 = vector.broadcast %cst_87 : f32 to vector<64x208xf32>
    %95 = arith.maximumf %93, %94 : vector<64x208xf32>
    %96 = arith.truncf %95 : vector<64x208xf32> to vector<64x208xbf16>
    %cst_88 = arith.constant 0.000000e+00 : f32
    %97 = vector.broadcast %cst_88 : f32 to vector<64x160xf32>
    %c0_89 = arith.constant 0 : index
    %c0_90 = arith.constant 0 : index
    %c0_91 = arith.constant 0 : index
    %c0_92 = arith.constant 0 : index
    %98 = vector.load %arg6[%c0_89, %c0_90, %c0_91, %c0_92] : memref<3x3x64x64xbf16, #tpu.memory_space<vmem>>, vector<1x1x64x64xbf16>
    %99 = vector.shape_cast %98 : vector<1x1x64x64xbf16> to vector<64x64xbf16>
    %100 = vector.extract_strided_slice %96 {offsets = [0, 0], sizes = [64, 160], strides = [1, 1]} : vector<64x208xbf16> to vector<64x160xbf16>
    %cst_93 = arith.constant dense<0.000000e+00> : vector<64x160xf32>
    %101 = tpu.matmul %99, %100, %cst_93 {dimension_numbers = #tpu.dot_dimension_numbers<[1], [0], [0], [1], [0, 0, 1, 1], [], []>} : vector<64x64xbf16>, vector<64x160xbf16>, vector<64x160xf32> -> vector<64x160xf32>
    %102 = arith.addf %97, %101 : vector<64x160xf32>
    %c0_94 = arith.constant 0 : index
    %c1_95 = arith.constant 1 : index
    %c0_96 = arith.constant 0 : index
    %c0_97 = arith.constant 0 : index
    %103 = vector.load %arg6[%c0_94, %c1_95, %c0_96, %c0_97] : memref<3x3x64x64xbf16, #tpu.memory_space<vmem>>, vector<1x1x64x64xbf16>
    %104 = vector.shape_cast %103 : vector<1x1x64x64xbf16> to vector<64x64xbf16>
    %105 = vector.extract_strided_slice %96 {offsets = [0, 1], sizes = [64, 160], strides = [1, 1]} : vector<64x208xbf16> to vector<64x160xbf16>
    %cst_98 = arith.constant dense<0.000000e+00> : vector<64x160xf32>
    %106 = tpu.matmul %104, %105, %cst_98 {dimension_numbers = #tpu.dot_dimension_numbers<[1], [0], [0], [1], [0, 0, 1, 1], [], []>} : vector<64x64xbf16>, vector<64x160xbf16>, vector<64x160xf32> -> vector<64x160xf32>
    %107 = arith.addf %102, %106 : vector<64x160xf32>
    %c0_99 = arith.constant 0 : index
    %c2_100 = arith.constant 2 : index
    %c0_101 = arith.constant 0 : index
    %c0_102 = arith.constant 0 : index
    %108 = vector.load %arg6[%c0_99, %c2_100, %c0_101, %c0_102] : memref<3x3x64x64xbf16, #tpu.memory_space<vmem>>, vector<1x1x64x64xbf16>
    %109 = vector.shape_cast %108 : vector<1x1x64x64xbf16> to vector<64x64xbf16>
    %110 = vector.extract_strided_slice %96 {offsets = [0, 2], sizes = [64, 160], strides = [1, 1]} : vector<64x208xbf16> to vector<64x160xbf16>
    %cst_103 = arith.constant dense<0.000000e+00> : vector<64x160xf32>
    %111 = tpu.matmul %109, %110, %cst_103 {dimension_numbers = #tpu.dot_dimension_numbers<[1], [0], [0], [1], [0, 0, 1, 1], [], []>} : vector<64x64xbf16>, vector<64x160xbf16>, vector<64x160xf32> -> vector<64x160xf32>
    %112 = arith.addf %107, %111 : vector<64x160xf32>
    %c1_104 = arith.constant 1 : index
    %c0_105 = arith.constant 0 : index
    %c0_106 = arith.constant 0 : index
    %c0_107 = arith.constant 0 : index
    %113 = vector.load %arg6[%c1_104, %c0_105, %c0_106, %c0_107] : memref<3x3x64x64xbf16, #tpu.memory_space<vmem>>, vector<1x1x64x64xbf16>
    %114 = vector.shape_cast %113 : vector<1x1x64x64xbf16> to vector<64x64xbf16>
    %115 = vector.extract_strided_slice %96 {offsets = [0, 20], sizes = [64, 160], strides = [1, 1]} : vector<64x208xbf16> to vector<64x160xbf16>
    %cst_108 = arith.constant dense<0.000000e+00> : vector<64x160xf32>
    %116 = tpu.matmul %114, %115, %cst_108 {dimension_numbers = #tpu.dot_dimension_numbers<[1], [0], [0], [1], [0, 0, 1, 1], [], []>} : vector<64x64xbf16>, vector<64x160xbf16>, vector<64x160xf32> -> vector<64x160xf32>
    %117 = arith.addf %112, %116 : vector<64x160xf32>
    %c1_109 = arith.constant 1 : index
    %c1_110 = arith.constant 1 : index
    %c0_111 = arith.constant 0 : index
    %c0_112 = arith.constant 0 : index
    %118 = vector.load %arg6[%c1_109, %c1_110, %c0_111, %c0_112] : memref<3x3x64x64xbf16, #tpu.memory_space<vmem>>, vector<1x1x64x64xbf16>
    %119 = vector.shape_cast %118 : vector<1x1x64x64xbf16> to vector<64x64xbf16>
    %120 = vector.extract_strided_slice %96 {offsets = [0, 21], sizes = [64, 160], strides = [1, 1]} : vector<64x208xbf16> to vector<64x160xbf16>
    %cst_113 = arith.constant dense<0.000000e+00> : vector<64x160xf32>
    %121 = tpu.matmul %119, %120, %cst_113 {dimension_numbers = #tpu.dot_dimension_numbers<[1], [0], [0], [1], [0, 0, 1, 1], [], []>} : vector<64x64xbf16>, vector<64x160xbf16>, vector<64x160xf32> -> vector<64x160xf32>
    %122 = arith.addf %117, %121 : vector<64x160xf32>
    %c1_114 = arith.constant 1 : index
    %c2_115 = arith.constant 2 : index
    %c0_116 = arith.constant 0 : index
    %c0_117 = arith.constant 0 : index
    %123 = vector.load %arg6[%c1_114, %c2_115, %c0_116, %c0_117] : memref<3x3x64x64xbf16, #tpu.memory_space<vmem>>, vector<1x1x64x64xbf16>
    %124 = vector.shape_cast %123 : vector<1x1x64x64xbf16> to vector<64x64xbf16>
    %125 = vector.extract_strided_slice %96 {offsets = [0, 22], sizes = [64, 160], strides = [1, 1]} : vector<64x208xbf16> to vector<64x160xbf16>
    %cst_118 = arith.constant dense<0.000000e+00> : vector<64x160xf32>
    %126 = tpu.matmul %124, %125, %cst_118 {dimension_numbers = #tpu.dot_dimension_numbers<[1], [0], [0], [1], [0, 0, 1, 1], [], []>} : vector<64x64xbf16>, vector<64x160xbf16>, vector<64x160xf32> -> vector<64x160xf32>
    %127 = arith.addf %122, %126 : vector<64x160xf32>
    %c2_119 = arith.constant 2 : index
    %c0_120 = arith.constant 0 : index
    %c0_121 = arith.constant 0 : index
    %c0_122 = arith.constant 0 : index
    %128 = vector.load %arg6[%c2_119, %c0_120, %c0_121, %c0_122] : memref<3x3x64x64xbf16, #tpu.memory_space<vmem>>, vector<1x1x64x64xbf16>
    %129 = vector.shape_cast %128 : vector<1x1x64x64xbf16> to vector<64x64xbf16>
    %130 = vector.extract_strided_slice %96 {offsets = [0, 40], sizes = [64, 160], strides = [1, 1]} : vector<64x208xbf16> to vector<64x160xbf16>
    %cst_123 = arith.constant dense<0.000000e+00> : vector<64x160xf32>
    %131 = tpu.matmul %129, %130, %cst_123 {dimension_numbers = #tpu.dot_dimension_numbers<[1], [0], [0], [1], [0, 0, 1, 1], [], []>} : vector<64x64xbf16>, vector<64x160xbf16>, vector<64x160xf32> -> vector<64x160xf32>
    %132 = arith.addf %127, %131 : vector<64x160xf32>
    %c2_124 = arith.constant 2 : index
    %c1_125 = arith.constant 1 : index
    %c0_126 = arith.constant 0 : index
    %c0_127 = arith.constant 0 : index
    %133 = vector.load %arg6[%c2_124, %c1_125, %c0_126, %c0_127] : memref<3x3x64x64xbf16, #tpu.memory_space<vmem>>, vector<1x1x64x64xbf16>
    %134 = vector.shape_cast %133 : vector<1x1x64x64xbf16> to vector<64x64xbf16>
    %135 = vector.extract_strided_slice %96 {offsets = [0, 41], sizes = [64, 160], strides = [1, 1]} : vector<64x208xbf16> to vector<64x160xbf16>
    %cst_128 = arith.constant dense<0.000000e+00> : vector<64x160xf32>
    %136 = tpu.matmul %134, %135, %cst_128 {dimension_numbers = #tpu.dot_dimension_numbers<[1], [0], [0], [1], [0, 0, 1, 1], [], []>} : vector<64x64xbf16>, vector<64x160xbf16>, vector<64x160xf32> -> vector<64x160xf32>
    %137 = arith.addf %132, %136 : vector<64x160xf32>
    %c2_129 = arith.constant 2 : index
    %c2_130 = arith.constant 2 : index
    %c0_131 = arith.constant 0 : index
    %c0_132 = arith.constant 0 : index
    %138 = vector.load %arg6[%c2_129, %c2_130, %c0_131, %c0_132] : memref<3x3x64x64xbf16, #tpu.memory_space<vmem>>, vector<1x1x64x64xbf16>
    %139 = vector.shape_cast %138 : vector<1x1x64x64xbf16> to vector<64x64xbf16>
    %140 = vector.extract_strided_slice %96 {offsets = [0, 42], sizes = [64, 160], strides = [1, 1]} : vector<64x208xbf16> to vector<64x160xbf16>
    %cst_133 = arith.constant dense<0.000000e+00> : vector<64x160xf32>
    %141 = tpu.matmul %139, %140, %cst_133 {dimension_numbers = #tpu.dot_dimension_numbers<[1], [0], [0], [1], [0, 0, 1, 1], [], []>} : vector<64x64xbf16>, vector<64x160xbf16>, vector<64x160xf32> -> vector<64x160xf32>
    %142 = arith.addf %137, %141 : vector<64x160xf32>
    %c0_134 = arith.constant 0 : index
    %c0_135 = arith.constant 0 : index
    %143 = vector.load %arg7[%c0_134, %c0_135] : memref<64x1xf32, #tpu.memory_space<vmem>>, vector<64x1xf32>
    %144 = vector.broadcast %143 : vector<64x1xf32> to vector<64x160xf32>
    %145 = arith.addf %142, %144 : vector<64x160xf32>
    %cst_136 = arith.constant 0.000000e+00 : f32
    %146 = vector.broadcast %cst_136 : f32 to vector<64x160xf32>
    %147 = arith.maximumf %145, %146 : vector<64x160xf32>
    %c0_137 = arith.constant 0 : index
    %c0_138 = arith.constant 0 : index
    %c0_139 = arith.constant 0 : index
    %148 = vector.load %arg8[%c0_137, %c0_138, %c0_139] : memref<8x64x160xf32, #tpu.memory_space<vmem>>, vector<8x64x160xf32>
    %149 = vector.shape_cast %147 : vector<64x160xf32> to vector<1x64x160xf32>
    %150 = vector.broadcast %149 : vector<1x64x160xf32> to vector<8x64x160xf32>
    %151 = arith.mulf %148, %150 : vector<8x64x160xf32>
    %cst_140 = arith.constant dense<0.000000e+00> : vector<8x64xf32>
    %152 = vector.multi_reduction <add>, %151, %cst_140 [2] : vector<8x64x160xf32> to vector<8x64xf32>
    %cst_141 = arith.constant dense<0.000000e+00> : vector<8xf32>
    %153 = vector.multi_reduction <add>, %152, %cst_141 [1] : vector<8x64xf32> to vector<8xf32>
    %154 = vector.shape_cast %153 : vector<8xf32> to vector<8x1xf32>
    %c0_142 = arith.constant 0 : index
    %c0_143 = arith.constant 0 : index
    %155 = vector.load %arg9[%c0_142, %c0_143] : memref<8x1xf32, #tpu.memory_space<vmem>>, vector<8x1xf32>
    %156 = arith.addf %154, %155 : vector<8x1xf32>
    %157 = vector.shape_cast %156 : vector<8x1xf32> to vector<1x8x1xf32>
    %158 = vector.broadcast %157 : vector<1x8x1xf32> to vector<1x8x128xf32>
    %c0_144 = arith.constant 0 : index
    %c0_145 = arith.constant 0 : index
    %c0_146 = arith.constant 0 : index
    %159 = vector.load %arg10[%c0_144, %c0_145, %c0_146] : memref<1x8x128xf32, #tpu.memory_space<vmem>>, vector<1x8x128xf32>
    tpu.vector_store %arg10[%c0_144, %c0_145, %c0_146], %158 {strides = array<i32>} : memref<1x8x128xf32, #tpu.memory_space<vmem>>, vector<1x8x128xf32>,
    return
  }
  func.func @transform_0(%arg0: i32) -> (i32, i32, i32) {
    %c0_i32 = arith.constant 0 : i32
    %c0_i32_0 = arith.constant 0 : i32
    %c0_i32_1 = arith.constant 0 : i32
    return %arg0, %c0_i32, %c0_i32_0 : i32, i32, i32
  }
  func.func @transform_1(%arg0: i32) -> (i32, i32) {
    %c0_i32 = arith.constant 0 : i32
    %c0_i32_0 = arith.constant 0 : i32
    %c0_i32_1 = arith.constant 0 : i32
    return %c0_i32, %c0_i32_0 : i32, i32
  }
  func.func @transform_2(%arg0: i32) -> (i32, i32) {
    %c0_i32 = arith.constant 0 : i32
    %c0_i32_0 = arith.constant 0 : i32
    %c0_i32_1 = arith.constant 0 : i32
    return %c0_i32, %c0_i32_0 : i32, i32
  }
  func.func @transform_3(%arg0: i32) -> (i32, i32, i32, i32) {
    %c0_i32 = arith.constant 0 : i32
    %c0_i32_0 = arith.constant 0 : i32
    %c0_i32_1 = arith.constant 0 : i32
    %c0_i32_2 = arith.constant 0 : i32
    %c0_i32_3 = arith.constant 0 : i32
    return %c0_i32, %c0_i32_0, %c0_i32_1, %c0_i32_2 : i32, i32, i32, i32
  }
  func.func @transform_4(%arg0: i32) -> (i32, i32) {
    %c0_i32 = arith.constant 0 : i32
    %c0_i32_0 = arith.constant 0 : i32
    %c0_i32_1 = arith.constant 0 : i32
    return %c0_i32, %c0_i32_0 : i32, i32
  }
  func.func @transform_5(%arg0: i32) -> (i32, i32, i32, i32) {
    %c0_i32 = arith.constant 0 : i32
    %c0_i32_0 = arith.constant 0 : i32
    %c0_i32_1 = arith.constant 0 : i32
    %c0_i32_2 = arith.constant 0 : i32
    %c0_i32_3 = arith.constant 0 : i32
    return %c0_i32, %c0_i32_0, %c0_i32_1, %c0_i32_2 : i32, i32, i32, i32
  }
  func.func @transform_6(%arg0: i32) -> (i32, i32) {
    %c0_i32 = arith.constant 0 : i32
    %c0_i32_0 = arith.constant 0 : i32
    %c0_i32_1 = arith.constant 0 : i32
    return %c0_i32, %c0_i32_0 : i32, i32
  }
  func.func @transform_7(%arg0: i32) -> (i32, i32, i32) {
    %c0_i32 = arith.constant 0 : i32
    %c0_i32_0 = arith.constant 0 : i32
    %c0_i32_1 = arith.constant 0 : i32
    %c0_i32_2 = arith.constant 0 : i32
    return %c0_i32, %c0_i32_0, %c0_i32_1 : i32, i32, i32
  }
  func.func @transform_8(%arg0: i32) -> (i32, i32) {
    %c0_i32 = arith.constant 0 : i32
    %c0_i32_0 = arith.constant 0 : i32
    %c0_i32_1 = arith.constant 0 : i32
    return %c0_i32, %c0_i32_0 : i32, i32
  }
  func.func @transform_9(%arg0: i32) -> (i32, i32, i32) {
    %c0_i32 = arith.constant 0 : i32
    %c0_i32_0 = arith.constant 0 : i32
    %c0_i32_1 = arith.constant 0 : i32
    return %arg0, %c0_i32, %c0_i32_0 : i32, i32, i32
  }
}

</mosaic_0001>

<bundles_post_ra>
// kernel: deep_q_network_forward.1
= control target key start
LH: loop header
LB: loop body
LE: loop exit
PB: predicated region body
PF: predicated region fallthrough
CT: control target
= control target key end

     0   :  { %s8322_s30 = smov 0   ;;  %s10596_s0 = inlined_call_operand.vmem [shape: bf16[2,400,896], index: 0, kind: input, shape index: {}]   ;;  %s10597_s1 = inlined_call_operand.vmem [shape: bf16[32,400], index: 1, kind: input, shape index: {}]   ;;  %s10598_s2 = inlined_call_operand.vmem [shape: f32[32,1], index: 2, kind: input, shape index: {}]   ;;  %s10599_s3 = inlined_call_operand.vmem [shape: bf16[4,4,64,32], index: 3, kind: input, shape index: {}]   ;;  %s10600_s4 = inlined_call_operand.vmem [shape: f32[64,1], index: 4, kind: input, shape index: {}]   ;;  %s10601_s5 = inlined_call_operand.vmem [shape: bf16[3,3,64,64], index: 5, kind: input, shape index: {}]   ;;  %s10602_s6 = inlined_call_operand.vmem [shape: f32[64,1], index: 6, kind: input, shape index: {}]   ;;  %s10603_s7 = inlined_call_operand.vmem [shape: f32[8,64,160], index: 7, kind: input, shape index: {}]   ;;  %s10604_s8 = inlined_call_operand.vmem [shape: f32[8,1], index: 8, kind: input, shape index: {}]   ;;  %s10605_s9 = inlined_call_operand.vmem [shape: f32[2,8,128], index: 9, kind: output, shape index: {}]  }
   0x1 LB: > { %s6824_s10 = sadd.s32 4294967295, %s8253_s30   ;;  %p6828_p0 = scmp.ge.s32.totalorder %s8253_s30, 1  ;;  %s8253_s30 = sphi %s8322_s30, %s19_s30  }
   0x2   : > { %p287_p1 = scmp.lt.s32.totalorder %s8253_s30, 3 }
   0x4   : > { %p288_p2 = pnand %p6828_p0, %p287_p1 }
   0x5   : > { %p322_p3 = scmp.lt.s32.totalorder (!%p288_p2), %s6824_s10, 1  ;;  %v8333_v0 = vld [vmem:[%s10597_s1 + $0x4] ss:$16 sps:$4 sm:$0xff] (!%p288_p2)   ;;  %v8341_v1 = vld [vmem:[%s10597_s1 + $0xc] ss:$16 sps:$4 sm:$0xff] (!%p288_p2)   ;;  %vm1502_vm0 = vcmask (!%p288_p2), 130048  }
   0x6   : > { %291 = sbr.rel (%p288_p2) target bundleno = 2405 (0x965), region = 56  ;;  %1541 = vmatprep.mubr.bf16.mxu0 (!%p288_p2), %v8333_v0  ;;  %7016 = vmatprep.mubr.msk.bf16.mxu1 (!%p288_p2), %vm1502_vm0, %v8341_v1  ;;  %v8255_v38 = vmov (!%p288_p2), 0   ;;  %v8400_v47 = vld [vmem:[%s10597_s1] ss:$16 sps:$4 sm:$0xff] (!%p288_p2)   ;;  %v8407_v50 = vld [vmem:[%s10597_s1 + $0x24] ss:$16 sps:$4 sm:$0xff] (!%p288_p2)  }
   0x7   : > { %7878 = vset.pattern.permute.xlu0 (!%p288_p2), %v8255_v38  ;;  %7879 = vset.pattern.permute.xlu1 (!%p288_p2), %v8255_v38  ;;  %v8420_v57 = vld [vmem:[%s10597_s1 + $0x20] ss:$16 sps:$4 sm:$0xff] (!%p288_p2)   ;;  %s8257_s12 = smov (!%p288_p2), 127   ;;  %s8258_s13 = smov (!%p288_p2), 35   ;;  %vm2022_vm1 = vcmask (!%p288_p2), 293888   ;;  %vm2031_vm2 = vcmask (!%p288_p2), 261120  }
   0x8   : > { %v540_v62 = vld [vmem:[%s10598_s2] sm:$0xff] (!%p288_p2)  ;;  %s8259_s14 = smov (!%p288_p2), 72   ;;  %s8261_s16 = smov (!%p288_p2), 71   ;;  %vm2261_vm3 = vcmask (!%p288_p2), 1039360   ;;  %vm2410_vm4 = vcmask (!%p288_p2), 285696   ;;  %vm2565_vm5 = vcmask (!%p288_p2), 588800  }
   0x9   : > { %546 = vperm.xlu0 (!%p288_p2), %7878, %v540_v62   ;;  %s8262_s20 = smov (!%p288_p2), 107   ;;  %s8263_s25 = smov (!%p288_p2), 16   ;;  %vm2714_vm6 = vcmask (!%p288_p2), 883712   ;;  %vm2863_vm7 = vcmask (!%p288_p2), 580608   ;;  %vm3010_vm8 = vcmask (!%p288_p2), 875520   ;;  %vm3598_vm9 = vcmask (!%p288_p2), 121856  }
   0xa   : > { %s8265_s17 = smov (!%p288_p2), 52   ;;  %s8266_s24 = smov (!%p288_p2), 88   ;;  %vm3749_vm10 = vcmask (!%p288_p2), 424960   ;;  %vm3896_vm11 = vcmask (!%p288_p2), 719872   ;;  %vm4045_vm12 = vcmask (!%p288_p2), 416768   ;;  %vm4192_vm13 = vcmask (!%p288_p2), 711680  }
   0xb   : > { %s8267_s27 = smov (!%p288_p2), 51   ;;  %s8268_s11 = smov (!%p288_p2), 87   ;;  %vm4461_vm14 = vcmask (!%p288_p2), 523264   ;;  %vm4697_vm15 = vcmask (!%p288_p2), 1031168  }
   0xc   : > { %s8269_s26 = smov (!%p288_p2), 126  }
   0xd   : > { %s10607_s10 = smov (!%p322_p3, %s6824_s10), 1 }
   0xe   : > { %s7852_s15 = smul.u32 1400, %s10607_s10  ;;  %s6830_s29 = sshll.u32 %s10607_s10, 3 }
  0x10   : > { %s8349_s18 = scalar_lea.vmem %s10596_s0, %s7852_s15  ;;  %s8260_s15 = smov 108  }
  0x11   : > { %v7880_v2 = vld [vmem:[%s8349_s18 + $0x4] ss:$28 sps:$4 sm:$0xff]   ;;  %v7883_v4 = vld [vmem:[%s8349_s18 + $0x3c] ss:$28 sps:$4 sm:$0xff]   ;;  %v7886_v6 = vld [vmem:[%s8349_s18 + $0x74] ss:$28 sps:$4 sm:$0xff]  }
  0x12   : > { %v7882_v3 = vld [vmem:[%s8349_s18] ss:$28 sps:$4 sm:$0xff]   ;;  %1509 = vmatprep.subr.bf16.mxu0 %v7880_v2  ;;  %v7885_v5 = vld [vmem:[%s8349_s18 + $0x38] ss:$28 sps:$4 sm:$0xff]   ;;  %v7888_v7 = vld [vmem:[%s8349_s18 + $0x70] ss:$28 sps:$4 sm:$0xff]  }
  0x13   : > { %1510 = vmatpush1.bf16.msra.mxu0 %v7882_v3  ;;  %v7889_v8 = vld [vmem:[%s8349_s18 + $0xac] ss:$28 sps:$4 sm:$0xff]   ;;  %v7892_v10 = vld [vmem:[%s8349_s18 + $0xe4] ss:$28 sps:$4 sm:$0xff]   ;;  %v7895_v12 = vld [vmem:[%s8349_s18 + $0x11c] ss:$28 sps:$4 sm:$0xff]  }
  0x14   : > { %1511 = vmatprep.subr.bf16.mxu0 %v7883_v4  ;;  %v7891_v9 = vld [vmem:[%s8349_s18 + $0xa8] ss:$28 sps:$4 sm:$0xff]   ;;  %v7894_v11 = vld [vmem:[%s8349_s18 + $0xe0] ss:$28 sps:$4 sm:$0xff]   ;;  %v7897_v13 = vld [vmem:[%s8349_s18 + $0x118] ss:$28 sps:$4 sm:$0xff]  }
  0x15   : > { %v7898_v14 = vld [vmem:[%s8349_s18 + $0x154] ss:$28 sps:$4 sm:$0xff]   ;;  %v7901_v16 = vld [vmem:[%s8349_s18 + $0x18c] ss:$28 sps:$4 sm:$0xff]   ;;  %v7904_v18 = vld [vmem:[%s8349_s18 + $0x1c4] ss:$28 sps:$4 sm:$0xff]  }
  0x16   : > { %v7900_v15 = vld [vmem:[%s8349_s18 + $0x150] ss:$28 sps:$4 sm:$0xff]   ;;  %v7903_v17 = vld [vmem:[%s8349_s18 + $0x188] ss:$28 sps:$4 sm:$0xff]   ;;  %v7906_v19 = vld [vmem:[%s8349_s18 + $0x1c0] ss:$28 sps:$4 sm:$0xff]  }
  0x17   : > { %1512 = vmatpush1.bf16.msra.mxu0 %v7885_v5  ;;  %v7907_v20 = vld [vmem:[%s8349_s18 + $0x1fc] ss:$28 sps:$4 sm:$0xff]   ;;  %v7910_v22 = vld [vmem:[%s8349_s18 + $0x234] ss:$28 sps:$4 sm:$0xff]   ;;  %v7913_v24 = vld [vmem:[%s8349_s18 + $0x26c] ss:$28 sps:$4 sm:$0xff]  }
  0x18   : > { %1513 = vmatprep.subr.bf16.mxu0 %v7886_v6  ;;  %v7909_v21 = vld [vmem:[%s8349_s18 + $0x1f8] ss:$28 sps:$4 sm:$0xff]   ;;  %v7912_v23 = vld [vmem:[%s8349_s18 + $0x230] ss:$28 sps:$4 sm:$0xff]   ;;  %v7915_v25 = vld [vmem:[%s8349_s18 + $0x268] ss:$28 sps:$4 sm:$0xff]  }
  0x19   : > { %v7988_v26 = vld [vmem:[%s8349_s18 + $0x38c] ss:$28 sps:$4 sm:$0xff]   ;;  %v7916_v27 = vld [vmem:[%s8349_s18 + $0x2a4] ss:$28 sps:$4 sm:$0xff]   ;;  %v7919_v31 = vld [vmem:[%s8349_s18 + $0x2dc] ss:$28 sps:$4 sm:$0xff]  }
  0x1a   : > { %1668 = vmatprep.subr.bf16.mxu1 %v7988_v26  ;;  %v7993_v28 = vld [vmem:[%s8349_s18 + $0x388] ss:$28 sps:$4 sm:$0xff]   ;;  %v7918_v30 = vld [vmem:[%s8349_s18 + $0x2a0] ss:$28 sps:$4 sm:$0xff]   ;;  %v7921_v34 = vld [vmem:[%s8349_s18 + $0x2d8] ss:$28 sps:$4 sm:$0xff]  }
  0x1b   : > { %1514 = vmatpush1.bf16.msra.mxu0 %v7888_v7  ;;  %v7994_v29 = vld [vmem:[%s8349_s18 + $0x3c4] ss:$28 sps:$4 sm:$0xff]   ;;  %1669 = vmatpush1.bf16.msra.mxu1 %v7993_v28  ;;  %v8000_v33 = vld [vmem:[%s8349_s18 + $0x3fc] ss:$28 sps:$4 sm:$0xff]   ;;  %v7922_v36 = vld [vmem:[%s8349_s18 + $0x314] ss:$28 sps:$4 sm:$0xff]  }
  0x1c   : > { %1515 = vmatprep.subr.bf16.mxu0 %v7889_v8  ;;  %v7999_v32 = vld [vmem:[%s8349_s18 + $0x3c0] ss:$28 sps:$4 sm:$0xff]   ;;  %1670 = vmatprep.subr.bf16.mxu1 %v7994_v29  ;;  %v8005_v35 = vld [vmem:[%s8349_s18 + $0x3f8] ss:$28 sps:$4 sm:$0xff]   ;;  %v7924_v39 = vld [vmem:[%s8349_s18 + $0x310] ss:$28 sps:$4 sm:$0xff]  }
  0x1d   : > { %v8006_v37 = vld [vmem:[%s8349_s18 + $0x434] ss:$28 sps:$4 sm:$0xff]   ;;  %v7925_v40 = vld [vmem:[%s8349_s18 + $0x34c] ss:$28 sps:$4 sm:$0xff]   ;;  %v7932_v45 = vld [vmem:[%s8349_s18 + $0x384] ss:$28 sps:$4 sm:$0xff]  }
  0x1e   : > { %v8011_v41 = vld [vmem:[%s8349_s18 + $0x430] ss:$28 sps:$4 sm:$0xff]   ;;  %v7927_v43 = vld [vmem:[%s8349_s18 + $0x348] ss:$28 sps:$4 sm:$0xff]   ;;  %v7930_v48 = vld [vmem:[%s8349_s18 + $0x380] ss:$28 sps:$4 sm:$0xff]  }
  0x1f   : > { %1516 = vmatpush1.bf16.msra.mxu0 %v7891_v9  ;;  %1671 = vmatpush1.bf16.msra.mxu1 %v7999_v32  ;;  %v8012_v42 = vld [vmem:[%s8349_s18 + $0x46c] ss:$28 sps:$4 sm:$0xff]   ;;  %v8018_v46 = vld [vmem:[%s8349_s18 + $0x4a4] ss:$28 sps:$4 sm:$0xff]   ;;  %v7936_v49 = vld [vmem:[%s8349_s18 + $0x3bc] ss:$28 sps:$4 sm:$0xff]  }
  0x20   : > { %1517 = vmatprep.subr.bf16.mxu0 %v7892_v10  ;;  %1672 = vmatprep.subr.bf16.mxu1 %v8000_v33  ;;  %v8017_v44 = vld [vmem:[%s8349_s18 + $0x468] ss:$28 sps:$4 sm:$0xff]   ;;  %v8023_v51 = vld [vmem:[%s8349_s18 + $0x4a0] ss:$28 sps:$4 sm:$0xff]   ;;  %v7934_v53 = vld [vmem:[%s8349_s18 + $0x3b8] ss:$28 sps:$4 sm:$0xff]  }
  0x21   : > { %v8024_v52 = vld [vmem:[%s8349_s18 + $0x4dc] ss:$28 sps:$4 sm:$0xff]   ;;  %v7939_v54 = vld [vmem:[%s8349_s18 + $0x3f4] ss:$28 sps:$4 sm:$0xff]   ;;  %v7942_v59 = vld [vmem:[%s8349_s18 + $0x42c] ss:$28 sps:$4 sm:$0xff]  }
  0x22   : > { %v8029_v55 = vld [vmem:[%s8349_s18 + $0x4d8] ss:$28 sps:$4 sm:$0xff]   ;;  %v7937_v58 = vld [vmem:[%s8349_s18 + $0x3f0] ss:$28 sps:$4 sm:$0xff]   ;;  %v7940_v63 = vld [vmem:[%s8349_s18 + $0x428] ss:$28 sps:$4 sm:$0xff]  }
  0x23   : > { %1518 = vmatpush1.bf16.msra.mxu0 %v7894_v11  ;;  %1673 = vmatpush1.bf16.msra.mxu1 %v8005_v35  ;;  %v8030_v56 = vld [vmem:[%s8349_s18 + $0x514] ss:$28 sps:$4 sm:$0xff]   ;;  %v8036_v61 = vld [vmem:[%s8349_s18 + $0x54c] ss:$28 sps:$4 sm:$0xff]   ;;  %v7945_v3 = vld [vmem:[%s8349_s18 + $0x464] ss:$28 sps:$4 sm:$0xff]  }
  0x24   : > { %1519 = vmatprep.subr.bf16.mxu0 %v7895_v12  ;;  %1674 = vmatprep.subr.bf16.mxu1 %v8006_v37  ;;  %v8035_v60 = vld [vmem:[%s8349_s18 + $0x510] ss:$28 sps:$4 sm:$0xff]   ;;  %v8041_v4 = vld [vmem:[%s8349_s18 + $0x548] ss:$28 sps:$4 sm:$0xff]   ;;  %v543_v6 = vld [vmem:[%s10598_s2 + $0x18] sm:$0xff] }
  0x25   : > { %v541_v2 = vld [vmem:[%s10598_s2 + $0x8] sm:$0xff]  ;;  %v542_v5 = vld [vmem:[%s10598_s2 + $0x10] sm:$0xff]  ;;  %v7943_v7 = vld [vmem:[%s8349_s18 + $0x460] ss:$28 sps:$4 sm:$0xff]  }
  0x26   : > { %556 = vperm.xlu1 %7879, %v542_v5   ;;  %551 = vperm.xlu0 %7878, %v541_v2   ;;  %v7948_v8 = vld [vmem:[%s8349_s18 + $0x49c] ss:$28 sps:$4 sm:$0xff]   ;;  %v7951_v12 = vld [vmem:[%s8349_s18 + $0x4d4] ss:$28 sps:$4 sm:$0xff]   ;;  %v7981_v26 = vld [vmem:[%s8349_s18 + $0xec] ss:$28 sps:$4 sm:$0xff]  }
  0x27   : > { %1520 = vmatpush1.bf16.msra.mxu0 %v7897_v13  ;;  %1675 = vmatpush1.bf16.msra.mxu1 %v8011_v41  ;;  %v8449_v9 = vld [vmem:[%s10597_s1 + $0x8] ss:$16 sps:$4 sm:$0xff]   ;;  %v8455_v10 = vld [vmem:[%s10597_s1 + $0x2c] ss:$16 sps:$4 sm:$0xff]   ;;  %v7984_v28 = vld [vmem:[%s8349_s18 + $0x124] ss:$28 sps:$4 sm:$0xff]  }
  0x28   : > { %1521 = vmatprep.subr.bf16.mxu0 %v7898_v14  ;;  %1676 = vmatprep.subr.bf16.mxu1 %v8012_v42  ;;  %v7946_v11 = vld [vmem:[%s8349_s18 + $0x498] ss:$28 sps:$4 sm:$0xff]   ;;  %v7949_v13 = vld [vmem:[%s8349_s18 + $0x4d0] ss:$28 sps:$4 sm:$0xff]   ;;  %v7982_v29 = vld [vmem:[%s8349_s18 + $0x120] ss:$28 sps:$4 sm:$0xff]  }
  0x29   : > { %v7957_v14 = vld [vmem:[%s8349_s18 + $0x50c] ss:$28 sps:$4 sm:$0xff]   ;;  %v7992_v32 = vld [vmem:[%s8349_s18 + $0x194] ss:$28 sps:$4 sm:$0xff]   ;;  %v8004_v35 = vld [vmem:[%s8349_s18 + $0x204] ss:$28 sps:$4 sm:$0xff]  }
  0x2a   : > { %561 = vperm.xlu1 %7879, %v543_v6   ;;  %v7998_v33 = vld [vmem:[%s8349_s18 + $0x1cc] ss:$28 sps:$4 sm:$0xff]   ;;  %v8010_v37 = vld [vmem:[%s8349_s18 + $0x23c] ss:$28 sps:$4 sm:$0xff]   ;;  %v8016_v41 = vld [vmem:[%s8349_s18 + $0x274] ss:$28 sps:$4 sm:$0xff]  }
  0x2b   : > { %1522 = vmatpush1.bf16.msra.mxu0 %v7900_v15  ;;  %1677 = vmatpush1.bf16.msra.mxu1 %v8017_v44  ;;  %v8467_v15 = vld [vmem:[%s10597_s1 + $0x28] ss:$16 sps:$4 sm:$0xff]   ;;  %v8014_v42 = vld [vmem:[%s8349_s18 + $0x270] ss:$28 sps:$4 sm:$0xff]   ;;  %v8050_v2 = vld [vmem:[%s8349_s18 + $0x84] ss:$28 sps:$4 sm:$0xff]  }
  0x2c   : > { %1523 = vmatprep.subr.bf16.mxu0 %v7901_v16  ;;  %1678 = vmatprep.subr.bf16.mxu1 %v8018_v46  ;;  %v7955_v16 = vld [vmem:[%s8349_s18 + $0x508] ss:$28 sps:$4 sm:$0xff]   ;;  %v8053_v5 = vld [vmem:[%s8349_s18 + $0xbc] ss:$28 sps:$4 sm:$0xff]  }
  0x2d   : > { %v8022_v44 = vld [vmem:[%s8349_s18 + $0x2ac] ss:$28 sps:$4 sm:$0xff]   ;;  %v8141_v6 = vld [vmem:[%s8349_s18 + $0x558] ss:$28 sps:$4 sm:$0xff]  }
  0x2e   : > { %v8020_v46 = vld [vmem:[%s8349_s18 + $0x2a8] ss:$28 sps:$4 sm:$0xff]  }
  0x2f   : > { %1524 = vmatpush1.bf16.msra.mxu0 %v7903_v17  ;;  %1679 = vmatpush1.bf16.msra.mxu1 %v8023_v51  ;;  %v7960_v17 = vld [vmem:[%s8349_s18 + $0x544] ss:$28 sps:$4 sm:$0xff]   ;;  %v8047_v62 = vld [vmem:[%s8349_s18 + $0x4c] ss:$28 sps:$4 sm:$0xff]  }
  0x30   : > { %1525 = vmatprep.subr.bf16.mxu0 %v7904_v18  ;;  %1680 = vmatprep.subr.bf16.mxu1 %v8024_v52  ;;  %v7958_v18 = vld [vmem:[%s8349_s18 + $0x540] ss:$28 sps:$4 sm:$0xff]  }
  0x31   : > { %v8026_v51 = vld [vmem:[%s8349_s18 + $0x2e0] ss:$28 sps:$4 sm:$0xff]  }
  0x32   : > { %v8034_v52 = vld [vmem:[%s8349_s18 + $0x31c] ss:$28 sps:$4 sm:$0xff]  }
  0x33   : > { %1526 = vmatpush1.bf16.msra.mxu0 %v7906_v19  ;;  %1681 = vmatpush1.bf16.msra.mxu1 %v8029_v55  ;;  %v7966_v19 = vld [vmem:[%s8349_s18 + $0xc] ss:$28 sps:$4 sm:$0xff]   ;;  %v8040_v55 = vld [vmem:[%s8349_s18 + $0x354] ss:$28 sps:$4 sm:$0xff]  }
  0x34   : > { %1527 = vmatprep.subr.bf16.mxu0 %v7907_v20  ;;  %1682 = vmatprep.subr.bf16.mxu1 %v8030_v56  ;;  %v7964_v20 = vld [vmem:[%s8349_s18 + $0x8] ss:$28 sps:$4 sm:$0xff]   ;;  %v8134_v56 = vld [vmem:[%s8349_s18 + $0x4b0] ss:$28 sps:$4 sm:$0xff]  }
  0x37   : > { %1528 = vmatpush1.bf16.msra.mxu0 %v7909_v21  ;;  %1683 = vmatpush1.bf16.msra.mxu1 %v8035_v60  ;;  %v7969_v21 = vld [vmem:[%s8349_s18 + $0x44] ss:$28 sps:$4 sm:$0xff]  }
  0x38   : > { %1529 = vmatprep.subr.bf16.mxu0 %v7910_v22  ;;  %1684 = vmatprep.subr.bf16.mxu1 %v8036_v61  ;;  %v7967_v22 = vld [vmem:[%s8349_s18 + $0x40] ss:$28 sps:$4 sm:$0xff]   ;;  %v8137_v60 = vld [vmem:[%s8349_s18 + $0x4e8] ss:$28 sps:$4 sm:$0xff]   ;;  %v8042_v61 = vld [vmem:[%s8349_s18 + $0x10] ss:$28 sps:$4 sm:$0xff]  }
  0x3b   : > { %1530 = vmatpush1.bf16.msra.mxu0 %v7912_v23  ;;  %1685 = vmatpush1.bf16.msra.mxu1 %v8041_v4  ;;  %v7973_v23 = vld [vmem:[%s8349_s18 + $0x78] ss:$28 sps:$4 sm:$0xff]   ;;  %v8048_v4 = vld [vmem:[%s8349_s18 + $0x80] ss:$28 sps:$4 sm:$0xff]  }
  0x3c   : > { %1531 = vmatprep.subr.bf16.mxu0 %v7913_v24  ;;  %1876 = vmatprep.subr.bf16.mxu1 %v8255_v38  ;;  %v7978_v24 = vld [vmem:[%s8349_s18 + $0xb4] ss:$28 sps:$4 sm:$0xff]  }
  0x3e   : > { %1701 = vmatmul.mubr.bf16.vlgmr.msra.gmra.mrb[0].mxu1 %v8449_v9 }
  0x3f   : > { %1532 = vmatpush1.bf16.msra.mxu0 %v7915_v25  ;;  %7017 = vmatprep.mubr.msk.bf16.mxu1 %vm1502_vm0, %v8455_v10  ;;  %v7976_v25 = vld [vmem:[%s8349_s18 + $0xb0] ss:$28 sps:$4 sm:$0xff]  }
  0x40   : > { %1533 = vmatprep.subr.bf16.mxu0 %v7916_v27  ;;  %v7979_v27 = vld [vmem:[%s8349_s18 + $0xe8] ss:$28 sps:$4 sm:$0xff]  }
  0x43   : > { %1534 = vmatpush1.bf16.msra.mxu0 %v7918_v30  ;;  %v7987_v30 = vld [vmem:[%s8349_s18 + $0x15c] ss:$28 sps:$4 sm:$0xff]  }
  0x44   : > { %1535 = vmatprep.subr.bf16.mxu0 %v7919_v31  ;;  %v7985_v31 = vld [vmem:[%s8349_s18 + $0x158] ss:$28 sps:$4 sm:$0xff]  }
  0x46   : > { %1711 = vmatmul.mubr.bf16.gmra.mrb[4].mxu1 %v8467_v15 }
  0x47   : > { %1536 = vmatpush1.bf16.msra.mxu0 %v7921_v34  ;;  %7020 = vmatprep.mubr.msk.bf16.mxu1 %vm1502_vm0, %v8341_v1  ;;  %v7996_v34 = vld [vmem:[%s8349_s18 + $0x1c8] ss:$28 sps:$4 sm:$0xff]  }
  0x48   : > { %1537 = vmatprep.subr.bf16.mxu0 %v7922_v36  ;;  %v8002_v36 = vld [vmem:[%s8349_s18 + $0x200] ss:$28 sps:$4 sm:$0xff]  }
  0x4b   : > { %1538 = vmatpush1.bf16.msra.mxu0 %v7924_v39  ;;  %v8119_v39 = vld [vmem:[%s8349_s18 + $0x398] ss:$28 sps:$4 sm:$0xff]  }
  0x4c   : > { %1539 = vmatprep.subr.bf16.mxu0 %v7925_v40  ;;  %v8008_v40 = vld [vmem:[%s8349_s18 + $0x238] ss:$28 sps:$4 sm:$0xff]   ;;  %1877 = vmatpush1.bf16.msra.mxu1 %v8119_v39  ;;  %v8096_v39 = vld [vmem:[%s8349_s18 + $0x400] ss:$28 sps:$4 sm:$0xff]  }
  0x4d   : > { %1878 = vmatprep.subr.bf16.mxu1 %v8255_v38 }
  0x4f   : > { %1540 = vmatpush1.bf16.msra.mxu0 %v7927_v43  ;;  %v8122_v43 = vld [vmem:[%s8349_s18 + $0x3d0] ss:$28 sps:$4 sm:$0xff]  }
  0x50   : > { %1562 = vmatprep.subr.bf16.mxu0 %v7932_v45  ;;  %1879 = vmatpush1.bf16.msra.mxu1 %v8122_v43  ;;  %v8125_v45 = vld [vmem:[%s8349_s18 + $0x408] ss:$28 sps:$4 sm:$0xff]   ;;  %v8246_v43 = vld [vmem:[%s10597_s1 + $0xc] ss:$16 sps:$4 sm:$0xff]  }
  0x51   : > { %1880 = vmatprep.subr.bf16.mxu1 %v8255_v38 }
  0x52   : > { %1542 = vmatmul.mubr.bf16.vlgmr.msra.gmra.mrb[0].mxu0 %v8400_v47 }
  0x53   : > { %1563 = vmatpush1.bf16.msra.mxu0 %v7930_v48  ;;  %1551 = vmatprep.mubr.bf16.mxu0 %v8407_v50  ;;  %v8028_v48 = vld [vmem:[%s8349_s18 + $0x2e4] ss:$28 sps:$4 sm:$0xff]  }
  0x54   : > { %1564 = vmatprep.subr.bf16.mxu0 %v7936_v49  ;;  %1881 = vmatpush1.bf16.msra.mxu1 %v8125_v45  ;;  %v8128_v49 = vld [vmem:[%s8349_s18 + $0x440] ss:$28 sps:$4 sm:$0xff]   ;;  %v8102_v45 = vld [vmem:[%s8349_s18 + $0x470] ss:$28 sps:$4 sm:$0xff]  }
  0x55   : > { %1882 = vmatprep.subr.bf16.mxu1 %v8255_v38 }
  0x57   : > { %1565 = vmatpush1.bf16.msra.mxu0 %v7934_v53  ;;  %v8131_v53 = vld [vmem:[%s8349_s18 + $0x478] ss:$28 sps:$4 sm:$0xff]  }
  0x58   : > { %1566 = vmatprep.subr.bf16.mxu0 %v7939_v54  ;;  %1883 = vmatpush1.bf16.msra.mxu1 %v8128_v49  ;;  %v8032_v54 = vld [vmem:[%s8349_s18 + $0x318] ss:$28 sps:$4 sm:$0xff]   ;;  %v8110_v49 = vld [vmem:[%s8349_s18 + $0x4e4] ss:$28 sps:$4 sm:$0xff]  }
  0x59   : > { %1884 = vmatprep.subr.bf16.mxu1 %v8255_v38 }
  0x5a   : > { %1552 = vmatmul.mubr.bf16.gmra.mrb[4].mxu0 %v8420_v57 }
  0x5b   : > { %1567 = vmatpush1.bf16.msra.mxu0 %v7937_v58  ;;  %7014 = vmatprep.mubr.msk.bf16.mxu0 %vm1502_vm0, %v8341_v1  ;;  %v7975_v1 = vld [vmem:[%s8349_s18 + $0x7c] ss:$28 sps:$4 sm:$0xff]   ;;  %v8038_v58 = vld [vmem:[%s8349_s18 + $0x350] ss:$28 sps:$4 sm:$0xff]  }
  0x5c   : > { %1568 = vmatprep.subr.bf16.mxu0 %v7942_v59  ;;  %1885 = vmatpush1.bf16.msra.mxu1 %v8131_v53  ;;  %v8044_v59 = vld [vmem:[%s8349_s18 + $0x14] ss:$28 sps:$4 sm:$0xff]  }
  0x5d   : > { %1886 = vmatprep.subr.bf16.mxu1 %v8255_v38  ;;  %v8111_v53 = vld [vmem:[%s8349_s18 + $0x518] ss:$28 sps:$4 sm:$0xff]  }
  0x5f   : > { %1569 = vmatpush1.bf16.msra.mxu0 %v7940_v63  ;;  %v8045_v63 = vld [vmem:[%s8349_s18 + $0x48] ss:$28 sps:$4 sm:$0xff]  }
  0x60   : > { %1570 = vmatprep.subr.bf16.mxu0 %v7945_v3  ;;  %1887 = vmatpush1.bf16.msra.mxu1 %v8134_v56  ;;  %v8140_v3 = vld [vmem:[%s8349_s18 + $0x520] ss:$28 sps:$4 sm:$0xff]   ;;  %v8117_v56 = vld [vmem:[%s8349_s18 + $0x1d8] ss:$28 sps:$4 sm:$0xff]  }
  0x61   : > { %1888 = vmatprep.subr.bf16.mxu1 %v8255_v38 }
  0x63   : > { %1571 = vmatpush1.bf16.msra.mxu0 %v7943_v7  ;;  %v8056_v7 = vld [vmem:[%s8349_s18 + $0xf4] ss:$28 sps:$4 sm:$0xff]  }
  0x64   : > { %1572 = vmatprep.subr.bf16.mxu0 %v7948_v8  ;;  %1889 = vmatpush1.bf16.msra.mxu1 %v8137_v60  ;;  %v8054_v8 = vld [vmem:[%s8349_s18 + $0xf0] ss:$28 sps:$4 sm:$0xff]  }
  0x65   : > { %1890 = vmatprep.subr.bf16.mxu1 %v8255_v38  ;;  %v8121_v60 = vld [vmem:[%s8349_s18 + $0x50] ss:$28 sps:$4 sm:$0xff]  }
  0x67   : > { %1573 = vmatpush1.bf16.msra.mxu0 %v7946_v11  ;;  %v8057_v11 = vld [vmem:[%s8349_s18 + $0x128] ss:$28 sps:$4 sm:$0xff]  }
  0x68   : > { %1574 = vmatprep.subr.bf16.mxu0 %v7951_v12  ;;  %1891 = vmatpush1.bf16.msra.mxu1 %v8140_v3  ;;  %v8062_v12 = vld [vmem:[%s8349_s18 + $0x164] ss:$28 sps:$4 sm:$0xff]   ;;  %v8132_v3 = vld [vmem:[%s8349_s18 + $0x2f0] ss:$28 sps:$4 sm:$0xff]  }
  0x69   : > { %1892 = vmatprep.subr.bf16.mxu1 %v8255_v38 }
  0x6b   : > { %1575 = vmatpush1.bf16.msra.mxu0 %v7949_v13  ;;  %v8060_v13 = vld [vmem:[%s8349_s18 + $0x160] ss:$28 sps:$4 sm:$0xff]  }
  0x6c   : > { %1576 = vmatprep.subr.bf16.mxu0 %v7957_v14  ;;  %1893 = vmatpush1.bf16.msra.mxu1 %v8141_v6  ;;  %v8065_v14 = vld [vmem:[%s8349_s18 + $0x19c] ss:$28 sps:$4 sm:$0xff]   ;;  %v8136_v6 = vld [vmem:[%s8349_s18 + $0x168] ss:$28 sps:$4 sm:$0xff]  }
  0x6f   : > { %1577 = vmatpush1.bf16.msra.mxu0 %v7955_v16  ;;  %1909 = vmatmul.mubr.bf16.vlgmr.msra.gmra.mrb[8].mxu1 %v8449_v9  ;;  %v8063_v16 = vld [vmem:[%s8349_s18 + $0x198] ss:$28 sps:$4 sm:$0xff]  }
  0x70   : > { %1578 = vmatprep.subr.bf16.mxu0 %v7960_v17  ;;  %7021 = vmatprep.mubr.msk.bf16.mxu1 %vm1502_vm0, %v8455_v10  ;;  %v8068_v17 = vld [vmem:[%s8349_s18 + $0x1d4] ss:$28 sps:$4 sm:$0xff]  }
  0x73   : > { %1579 = vmatpush1.bf16.msra.mxu0 %v7958_v18  ;;  %v8066_v18 = vld [vmem:[%s8349_s18 + $0x1d0] ss:$28 sps:$4 sm:$0xff]  }
  0x74   : > { %1615 = vmatprep.subr.bf16.mxu0 %v7966_v19  ;;  %v8071_v19 = vld [vmem:[%s8349_s18 + $0x20c] ss:$28 sps:$4 sm:$0xff]  }
  0x76   : > { %1595 = vmatmul.mubr.bf16.vlgmr.msra.gmra.mrb[0].mxu0 %v8449_v9 }
  0x77   : > { %1616 = vmatpush1.bf16.msra.mxu0 %v7964_v20  ;;  %7015 = vmatprep.mubr.msk.bf16.mxu0 %vm1502_vm0, %v8455_v10  ;;  %v8069_v20 = vld [vmem:[%s8349_s18 + $0x208] ss:$28 sps:$4 sm:$0xff]  }
  0x78   : > { %1617 = vmatprep.subr.bf16.mxu0 %v7969_v21  ;;  %1917 = vmatmul.mubr.bf16.gmra.mrb[12].mxu1 %v8467_v15  ;;  %v8074_v21 = vld [vmem:[%s8349_s18 + $0x244] ss:$28 sps:$4 sm:$0xff]  }
  0x79   : > { %2076 = vmatprep.mubr.bf16.mxu1 %v8255_v38 }
  0x7b   : > { %1618 = vmatpush1.bf16.msra.mxu0 %v7967_v22  ;;  %v8072_v22 = vld [vmem:[%s8349_s18 + $0x240] ss:$28 sps:$4 sm:$0xff]  }
  0x7c   : > { %1619 = vmatprep.subr.bf16.mxu0 %v7975_v1  ;;  %v8077_v1 = vld [vmem:[%s8349_s18 + $0x27c] ss:$28 sps:$4 sm:$0xff]  }
  0x7e   : > { %1605 = vmatmul.mubr.bf16.gmra.mrb[4].mxu0 %v8467_v15 }
  0x7f   : > { %1620 = vmatpush1.bf16.msra.mxu0 %v7973_v23  ;;  %1647 = vmatprep.mubr.bf16.mxu0 %v8333_v0  ;;  %v7990_v0 = vld [vmem:[%s8349_s18 + $0x190] ss:$28 sps:$4 sm:$0xff]   ;;  %v8075_v23 = vld [vmem:[%s8349_s18 + $0x278] ss:$28 sps:$4 sm:$0xff]  }
  0x80   : > { %1621 = vmatprep.subr.bf16.mxu0 %v7978_v24  ;;  %v8080_v24 = vld [vmem:[%s8349_s18 + $0x2b4] ss:$28 sps:$4 sm:$0xff]  }
  0x83   : > { %1622 = vmatpush1.bf16.msra.mxu0 %v7976_v25  ;;  %v8078_v25 = vld [vmem:[%s8349_s18 + $0x2b0] ss:$28 sps:$4 sm:$0xff]  }
  0x84   : > { %1623 = vmatprep.subr.bf16.mxu0 %v7981_v26  ;;  %v8083_v26 = vld [vmem:[%s8349_s18 + $0x2ec] ss:$28 sps:$4 sm:$0xff]  }
  0x87   : > { %1624 = vmatpush1.bf16.msra.mxu0 %v7979_v27  ;;  %v8081_v27 = vld [vmem:[%s8349_s18 + $0x2e8] ss:$28 sps:$4 sm:$0xff]  }
  0x88   : > { %1625 = vmatprep.subr.bf16.mxu0 %v7984_v28  ;;  %v8086_v28 = vld [vmem:[%s8349_s18 + $0x324] ss:$28 sps:$4 sm:$0xff]  }
  0x8b   : > { %1626 = vmatpush1.bf16.msra.mxu0 %v7982_v29  ;;  %v8084_v29 = vld [vmem:[%s8349_s18 + $0x320] ss:$28 sps:$4 sm:$0xff]  }
  0x8c   : > { %1627 = vmatprep.subr.bf16.mxu0 %v7987_v30  ;;  %v8089_v30 = vld [vmem:[%s8349_s18 + $0x35c] ss:$28 sps:$4 sm:$0xff]  }
  0x8f   : > { %1628 = vmatpush1.bf16.msra.mxu0 %v7985_v31  ;;  %v8087_v31 = vld [vmem:[%s8349_s18 + $0x358] ss:$28 sps:$4 sm:$0xff]  }
  0x90   : > { %1629 = vmatprep.subr.bf16.mxu0 %v7992_v32  ;;  %v8092_v32 = vld [vmem:[%s8349_s18 + $0x394] ss:$28 sps:$4 sm:$0xff]  }
  0x93   : > { %1630 = vmatpush1.bf16.msra.mxu0 %v7990_v0  ;;  %v8090_v0 = vld [vmem:[%s8349_s18 + $0x390] ss:$28 sps:$4 sm:$0xff]  }
  0x94   : > { %1631 = vmatprep.subr.bf16.mxu0 %v7998_v33  ;;  %v8095_v33 = vld [vmem:[%s8349_s18 + $0x3cc] ss:$28 sps:$4 sm:$0xff]  }
  0x97   : > { %1632 = vmatpush1.bf16.msra.mxu0 %v7996_v34  ;;  %v8581_v34 = vld [vmem:[%s10597_s1] ss:$16 sps:$4 sm:$0xff]  }
  0x98   : > { %1633 = vmatprep.subr.bf16.mxu0 %v8004_v35  ;;  %v8093_v35 = vld [vmem:[%s8349_s18 + $0x3c8] ss:$28 sps:$4 sm:$0xff]  }
  0x9b   : > { %1634 = vmatpush1.bf16.msra.mxu0 %v8002_v36  ;;  %v8588_v36 = vld [vmem:[%s10597_s1 + $0x24] ss:$16 sps:$4 sm:$0xff]  }
  0x9c   : > { %1635 = vmatprep.subr.bf16.mxu0 %v8010_v37  ;;  %v8098_v37 = vld [vmem:[%s8349_s18 + $0x404] ss:$28 sps:$4 sm:$0xff]  }
  0x9f   : > { %1636 = vmatpush1.bf16.msra.mxu0 %v8008_v40  ;;  %v8101_v40 = vld [vmem:[%s8349_s18 + $0x43c] ss:$28 sps:$4 sm:$0xff]  }
  0xa0   : > { %1637 = vmatprep.subr.bf16.mxu0 %v8016_v41  ;;  %v8597_v41 = vld [vmem:[%s10597_s1 + $0x20] ss:$16 sps:$4 sm:$0xff]  }
  0xa3   : > { %1638 = vmatpush1.bf16.msra.mxu0 %v8014_v42  ;;  %v8099_v42 = vld [vmem:[%s8349_s18 + $0x438] ss:$28 sps:$4 sm:$0xff]  }
  0xa4   : > { %1639 = vmatprep.subr.bf16.mxu0 %v8022_v44  ;;  %v8104_v44 = vld [vmem:[%s8349_s18 + $0x474] ss:$28 sps:$4 sm:$0xff]  }
  0xa7   : > { %1640 = vmatpush1.bf16.msra.mxu0 %v8020_v46  ;;  %v8107_v46 = vld [vmem:[%s8349_s18 + $0x4ac] ss:$28 sps:$4 sm:$0xff]  }
  0xa8   : > { %1641 = vmatprep.subr.bf16.mxu0 %v8028_v48  ;;  %v8105_v48 = vld [vmem:[%s8349_s18 + $0x4a8] ss:$28 sps:$4 sm:$0xff]  }
  0xab   : > { %1642 = vmatpush1.bf16.msra.mxu0 %v8026_v51  ;;  %v8108_v51 = vld [vmem:[%s8349_s18 + $0x4e0] ss:$28 sps:$4 sm:$0xff]  }
  0xac   : > { %1643 = vmatprep.subr.bf16.mxu0 %v8034_v52  ;;  %v8113_v52 = vld [vmem:[%s8349_s18 + $0x51c] ss:$28 sps:$4 sm:$0xff]  }
  0xaf   : > { %1644 = vmatpush1.bf16.msra.mxu0 %v8032_v54  ;;  %v8116_v54 = vld [vmem:[%s8349_s18 + $0x554] ss:$28 sps:$4 sm:$0xff]  }
  0xb0   : > { %1645 = vmatprep.subr.bf16.mxu0 %v8040_v55  ;;  %v8114_v55 = vld [vmem:[%s8349_s18 + $0x550] ss:$28 sps:$4 sm:$0xff]  }
  0xb3   : > { %1646 = vmatpush1.bf16.msra.mxu0 %v8038_v58  ;;  %v8118_v58 = vld [vmem:[%s8349_s18 + $0x18] ss:$28 sps:$4 sm:$0xff]  }
  0xb4   : > { %1721 = vmatprep.subr.bf16.mxu0 %v8044_v59  ;;  %v8120_v59 = vld [vmem:[%s8349_s18 + $0x210] ss:$28 sps:$4 sm:$0xff]  }
  0xb6   : > { %1648 = vmatmul.mubr.bf16.vlgmr.msra.gmra.mrb[8].mxu0 %v8400_v47  ;;  %v8051_v47 = vld [vmem:[%s8349_s18 + $0xb8] ss:$28 sps:$4 sm:$0xff]  }
  0xb7   : > { %1722 = vmatpush1.bf16.msra.mxu0 %v8042_v61  ;;  %1657 = vmatprep.mubr.bf16.mxu0 %v8407_v50  ;;  %v8544_v50 = vld [vmem:[%s10597_s1 + $0x4] ss:$16 sps:$4 sm:$0xff]  }
  0xb8   : > { %1723 = vmatprep.subr.bf16.mxu0 %v8047_v62  ;;  %v8123_v61 = vld [vmem:[%s8349_s18 + $0x248] ss:$28 sps:$4 sm:$0xff]  }
  0xb9   : > { %v8124_v62 = vld [vmem:[%s8349_s18 + $0x88] ss:$28 sps:$4 sm:$0xff]  }
  0xbb   : > { %1724 = vmatpush1.bf16.msra.mxu0 %v8045_v63  ;;  %v8126_v63 = vld [vmem:[%s8349_s18 + $0x280] ss:$28 sps:$4 sm:$0xff]  }
  0xbc   : > { %1725 = vmatprep.subr.bf16.mxu0 %v8050_v2  ;;  %v8130_v2 = vld [vmem:[%s8349_s18 + $0xf8] ss:$28 sps:$4 sm:$0xff]  }
  0xbe   : > { %1658 = vmatmul.mubr.bf16.gmra.mrb[12].mxu0 %v8420_v57  ;;  %v8059_v57 = vld [vmem:[%s8349_s18 + $0x12c] ss:$28 sps:$4 sm:$0xff]  }
  0xbf   : > { %1726 = vmatpush1.bf16.msra.mxu0 %v8048_v4  ;;  %1753 = vmatprep.mubr.bf16.mxu0 %v8544_v50  ;;  %v8133_v4 = vld [vmem:[%s8349_s18 + $0x130] ss:$28 sps:$4 sm:$0xff]  }
  0xc0   : > { %1727 = vmatprep.subr.bf16.mxu0 %v8053_v5  ;;  %v8135_v5 = vld [vmem:[%s8349_s18 + $0x328] ss:$28 sps:$4 sm:$0xff]  }
  0xc3   : > { %1728 = vmatpush1.bf16.msra.mxu0 %v8051_v47  ;;  %v8139_v47 = vld [vmem:[%s8349_s18 + $0x1a0] ss:$28 sps:$4 sm:$0xff]  }
  0xc4   : > { %1729 = vmatprep.subr.bf16.mxu0 %v8056_v7 }
  0xc7   : > { %1730 = vmatpush1.bf16.msra.mxu0 %v8054_v8 }
  0xc8   : > { %1731 = vmatprep.subr.bf16.mxu0 %v8059_v57 }
  0xcb   : > { %1732 = vmatpush1.bf16.msra.mxu0 %v8057_v11 }
  0xcc   : > { %1733 = vmatprep.subr.bf16.mxu0 %v8062_v12 }
  0xcf   : > { %1734 = vmatpush1.bf16.msra.mxu0 %v8060_v13 }
  0xd0   : > { %1735 = vmatprep.subr.bf16.mxu0 %v8065_v14 }
  0xd3   : > { %1736 = vmatpush1.bf16.msra.mxu0 %v8063_v16  ;;  %v8647_v16 = vpop.permute.xlu0 %546 }
  0xd4   : > { %1737 = vmatprep.subr.bf16.mxu0 %v8068_v17 }
  0xd7   : > { %1738 = vmatpush1.bf16.msra.mxu0 %v8066_v18  ;;  %v8650_v18 = vpop.permute.xlu0 %551 }
  0xd8   : > { %1739 = vmatprep.subr.bf16.mxu0 %v8071_v19 }
  0xdb   : > { %1740 = vmatpush1.bf16.msra.mxu0 %v8069_v20 }
  0xdc   : > { %1741 = vmatprep.subr.bf16.mxu0 %v8074_v21 }
  0xdf   : > { %1742 = vmatpush1.bf16.msra.mxu0 %v8072_v22 }
  0xe0   : > { %1743 = vmatprep.subr.bf16.mxu0 %v8077_v1  ;;  %v8654_v1 = vpop.permute.xlu1 %556 }
  0xe3   : > { %1744 = vmatpush1.bf16.msra.mxu0 %v8075_v23 }
  0xe4   : > { %1745 = vmatprep.subr.bf16.mxu0 %v8080_v24 }
  0xe7   : > { %1746 = vmatpush1.bf16.msra.mxu0 %v8078_v25 }
  0xe8   : > { %1747 = vmatprep.subr.bf16.mxu0 %v8083_v26 }
  0xeb   : > { %1748 = vmatpush1.bf16.msra.mxu0 %v8081_v27 }
  0xec   : > { %1749 = vmatprep.subr.bf16.mxu0 %v8086_v28 }
  0xef   : > { %1750 = vmatpush1.bf16.msra.mxu0 %v8084_v29 }
  0xf0   : > { %1751 = vmatprep.subr.bf16.mxu0 %v8089_v30 }
  0xf3   : > { %1752 = vmatpush1.bf16.msra.mxu0 %v8087_v31 }
  0xf4   : > { %1774 = vmatprep.subr.bf16.mxu0 %v8092_v32 }
  0xf6   : > { %1754 = vmatmul.mubr.bf16.vlgmr.msra.gmra.mrb[16].mxu0 %v8581_v34 }
  0xf7   : > { %1775 = vmatpush1.bf16.msra.mxu0 %v8090_v0  ;;  %1763 = vmatprep.mubr.bf16.mxu0 %v8588_v36  ;;  %v8662_v0 = vpop.permute.xlu1 %561 }
  0xf8   : > { %1776 = vmatprep.subr.bf16.mxu0 %v8095_v33 }
  0xfb   : > { %1777 = vmatpush1.bf16.msra.mxu0 %v8093_v35 }
  0xfc   : > { %1778 = vmatprep.subr.bf16.mxu0 %v8098_v37 }
  0xfe   : > { %1764 = vmatmul.mubr.bf16.gmra.mrb[20].mxu0 %v8597_v41 }
  0xff   : > { %1779 = vmatpush1.bf16.msra.mxu0 %v8096_v39  ;;  %7018 = vmatprep.mubr.msk.bf16.mxu0 %vm1502_vm0, %v8246_v43 }
 0x100   : > { %1780 = vmatprep.subr.bf16.mxu0 %v8101_v40 }
 0x103   : > { %1781 = vmatpush1.bf16.msra.mxu0 %v8099_v42 }
 0x104   : > { %1782 = vmatprep.subr.bf16.mxu0 %v8104_v44 }
 0x107   : > { %1783 = vmatpush1.bf16.msra.mxu0 %v8102_v45 }
 0x108   : > { %1784 = vmatprep.subr.bf16.mxu0 %v8107_v46 }
 0x10b   : > { %1785 = vmatpush1.bf16.msra.mxu0 %v8105_v48 }
 0x10c   : > { %1786 = vmatprep.subr.bf16.mxu0 %v8110_v49 }
 0x10f   : > { %1787 = vmatpush1.bf16.msra.mxu0 %v8108_v51 }
 0x110   : > { %1788 = vmatprep.subr.bf16.mxu0 %v8113_v52 }
 0x111   : > { %v1702_v7 = vpop.f32.mrb[0].mxu1 }
 0x113   : > { %1789 = vmatpush1.bf16.msra.mxu0 %v8111_v53 }
 0x114   : > { %1790 = vmatprep.subr.bf16.mxu0 %v8116_v54 }
 0x117   : > { %1791 = vmatpush1.bf16.msra.mxu0 %v8114_v55 }
 0x118   : > { %7408 = vmatprep.subr.bf16.mxu0 %v8117_v56 }
 0x11a   : > { %1807 = vmatmul.mubr.bf16.vlgmr.msra.gmra.mrb[16].mxu0 %v8449_v9  ;;  %v8127_v9 = vld [vmem:[%s8349_s18 + $0xc0] ss:$28 sps:$4 sm:$0xff]  }
 0x11b   : > { %7409 = vmatpush3.bf16.msra.mxu0 %v8118_v58  ;;  %7019 = vmatprep.mubr.msk.bf16.mxu0 %vm1502_vm0, %v8455_v10  ;;  %v8129_v10 = vld [vmem:[%s8349_s18 + $0x2b8] ss:$28 sps:$4 sm:$0xff]  }
 0x11c   : > { %7410 = vmatprep.subr.bf16.mxu0 %v8120_v59 }
 0x11f   : > { %7411 = vmatpush3.bf16.msra.mxu0 %v8121_v60 }
 0x120   : > { %7412 = vmatprep.subr.bf16.mxu0 %v8123_v61 }
 0x122   : > { %1817 = vmatmul.mubr.bf16.gmra.mrb[20].mxu0 %v8467_v15  ;;  %v8138_v15 = vld [vmem:[%s8349_s18 + $0x360] ss:$28 sps:$4 sm:$0xff]   ;;  %s8256_s18 = smov 36  }
 0x123   : > { %7413 = vmatpush3.bf16.msra.mxu0 %v8124_v62  ;;  %1859 = vmatprep.mubr.bf16.mxu0 %v8544_v50  ;;  %v1704_v50 = vpop.f32.mrb[1].mxu1 }
 0x124   : > { %7414 = vmatprep.subr.bf16.mxu0 %v8126_v63  ;;  %v1706_v8 = vpop.f32.mrb[2].mxu1 }
 0x125   : > { %v1708_v57 = vpop.f32.mrb[3].mxu1 }
 0x126   : > { %v8638_v11 = vpop.f32.mrb[4].mxu1 }
 0x127   : > { %7415 = vmatpush3.bf16.msra.mxu0 %v8127_v9  ;;  %v8640_v12 = vpop.f32.mrb[5].mxu1 }
 0x128   : > { %7416 = vmatprep.subr.bf16.mxu0 %v8129_v10  ;;  %v8642_v13 = vpop.f32.mrb[6].mxu1 }
 0x129   : > { %v8644_v14 = vpop.f32.mrb[7].mxu1 }
 0x12b   : > { %7417 = vmatpush3.bf16.msra.mxu0 %v8130_v2 }
 0x12c   : > { %7418 = vmatprep.subr.bf16.mxu0 %v8132_v3 }
 0x12f   : > { %7419 = vmatpush3.bf16.msra.mxu0 %v8133_v4 }
 0x130   : > { %7420 = vmatprep.subr.bf16.mxu0 %v8135_v5 }
 0x133   : > { %7421 = vmatpush3.bf16.msra.mxu0 %v8136_v6 }
 0x134   : > { %7422 = vmatprep.subr.bf16.mxu0 %v8138_v15 }
 0x137   : > { %7423 = vmatpush3.bf16.msra.mxu0 %v8139_v47 }
 0x13a   : > { %1860 = vmatmul.mubr.bf16.vlgmr.msra.gmra.mrb[24].mxu0 %v8581_v34 }
 0x13b   : > { %1867 = vmatprep.mubr.bf16.mxu0 %v8588_v36 }
 0x142   : > { %1868 = vmatmul.mubr.bf16.gmra.mrb[28].mxu0 %v8597_v41 }
 0x143   : > { %4506 = vmatprep.mubr.bf16.mxu0 %v8255_v38 }
 0x149   : > { %v1596_v17 = vpop.f32.mrb[0].mxu0 }
 0x14a   : > { %v7436_v19 = vadd.f32 %v1596_v17, %v8647_v16  ;;  %v1598_v20 = vpop.f32.mrb[1].mxu0 }
 0x14b   : > { %v7437_v21 = vadd.f32 %v1598_v20, %v8647_v16  ;;  %v1600_v22 = vpop.f32.mrb[2].mxu0 }
 0x14c   : > { %v7438_v23 = vadd.f32 %v1600_v22, %v8650_v18  ;;  %v1602_v24 = vpop.f32.mrb[3].mxu0  ;;  %v1925_v26 = vmax.f32 %v7436_v19, 0.0 }
 0x14d   : > { %v7439_v25 = vadd.f32 %v1602_v24, %v8650_v18  ;;  %v1926_v28 = vmax.f32 %v7437_v21, 0.0 }
 0x14e   : > { %v1932_v27 = vmax.f32 %v7438_v23, 0.0 }
 0x14f   : > { %v1933_v29 = vmax.f32 %v7439_v25, 0.0 }
 0x150   : > { %v8658_v30 = vpack.c.bf16 %v1932_v27, %v1925_v26 }
 0x151   : > { %v8660_v31 = vpack.c.bf16 %v1933_v29, %v1926_v28  ;;  %v1606_v32 = vpop.f32.mrb[4].mxu0 }
 0x152   : > { %v7440_v33 = vadd.f32 %v1606_v32, %v8654_v1  ;;  %v1608_v34 = vpop.f32.mrb[5].mxu0 }
 0x153   : > { %v7441_v35 = vadd.f32 %v1608_v34, %v8654_v1  ;;  %v1610_v36 = vpop.f32.mrb[6].mxu0  ;;  %2010 = vrot.lane.b32.xlu0 %v8660_v31, %s8256_s18 }
 0x154   : > { %v7442_v37 = vadd.f32 %v1610_v36, %v8662_v0  ;;  %v1612_v39 = vpop.f32.mrb[7].mxu0  ;;  %v1939_v41 = vmax.f32 %v7440_v33, 0.0 }
 0x155   : > { %v7443_v40 = vadd.f32 %v1612_v39, %v8662_v0  ;;  %v1940_v43 = vmax.f32 %v7441_v35, 0.0 }
 0x156   : > { %v1946_v42 = vmax.f32 %v7442_v37, 0.0 }
 0x157   : > { %v1947_v44 = vmax.f32 %v7443_v40, 0.0 }
 0x158   : > { %v8670_v45 = vpack.c.bf16 %v1946_v42, %v1939_v41 }
 0x159   : > { %v8672_v46 = vpack.c.bf16 %v1947_v44, %v1940_v43 }
 0x189   : > { %v1649_v48 = vpop.f32.mrb[8].mxu0 }
 0x18a   : > { %v1650_v49 = vadd.f32 %v1649_v48, %v8647_v16  ;;  %v1651_v51 = vpop.f32.mrb[9].mxu0 }
 0x18b   : > { %v1652_v52 = vadd.f32 %v1651_v51, %v8647_v16  ;;  %v1653_v53 = vpop.f32.mrb[10].mxu0 }
 0x18c   : > { %v1703_v54 = vadd.f32 %v1702_v7, %v1650_v49  ;;  %v1654_v55 = vadd.f32 %v1653_v53, %v8650_v18  ;;  %v1655_v56 = vpop.f32.mrb[11].mxu0  ;;  %v8684_v7 = vpop.f32.mrb[8].mxu1 }
 0x18d   : > { %v1705_v58 = vadd.f32 %v1704_v50, %v1652_v52  ;;  %v1656_v59 = vadd.f32 %v1655_v56, %v8650_v18  ;;  %v1912_v17 = vpop.f32.mrb[9].mxu1 }
 0x18e   : > { %v1707_v60 = vadd.f32 %v1706_v8, %v1654_v55  ;;  %v1927_v62 = vmax.f32 %v1703_v54, 0.0  ;;  %v8694_v21 = vpop.f32.mrb[10].mxu1 }
 0x18f   : > { %v1709_v61 = vadd.f32 %v1708_v57, %v1656_v59  ;;  %v1928_v9 = vmax.f32 %v1705_v58, 0.0  ;;  %v1915_v23 = vpop.f32.mrb[11].mxu1 }
 0x190   : > { %v1934_v63 = vmax.f32 %v1707_v60, 0.0 }
 0x191   : > { %v1935_v10 = vmax.f32 %v1709_v61, 0.0  ;;  %v1659_v2 = vpop.f32.mrb[12].mxu0 }
 0x192   : > { %v8678_v3 = vpack.c.bf16 %v1934_v63, %v1927_v62  ;;  %v1660_v4 = vadd.f32 %v1659_v2, %v8654_v1  ;;  %v1661_v5 = vpop.f32.mrb[13].mxu0 }
 0x193   : > { %v8681_v6 = vpack.c.bf16 %v1935_v10, %v1928_v9  ;;  %v1662_v15 = vadd.f32 %v1661_v5, %v8654_v1  ;;  %v1663_v47 = vpop.f32.mrb[14].mxu0 }
 0x194   : > { %v1713_v50 = vadd.f32 %v8638_v11, %v1660_v4  ;;  %v1664_v8 = vadd.f32 %v1663_v47, %v8662_v0  ;;  %v1665_v57 = vpop.f32.mrb[15].mxu0  ;;  %2012 = vrot.lane.b32.xlu0 %v8678_v3, %s8256_s18 }
 0x195   : > { %v1715_v19 = vadd.f32 %v8640_v12, %v1662_v15  ;;  %v1666_v20 = vadd.f32 %v1665_v57, %v8662_v0  ;;  %2014 = vrot.lane.b32.xlu1 %v8681_v6, %s8256_s18  ;;  %v8702_v12 = vpop.f32.mrb[12].mxu1 }
 0x196   : > { %v1717_v22 = vadd.f32 %v8642_v13, %v1664_v8  ;;  %v1941_v24 = vmax.f32 %v1713_v50, 0.0  ;;  %v1920_v32 = vpop.f32.mrb[13].mxu1 }
 0x197   : > { %v1719_v11 = vadd.f32 %v8644_v14, %v1666_v20  ;;  %v1942_v26 = vmax.f32 %v1715_v19, 0.0  ;;  %v8708_v13 = vpop.f32.mrb[14].mxu1 }
 0x198   : > { %v1948_v25 = vmax.f32 %v1717_v22, 0.0  ;;  %v1923_v14 = vpop.f32.mrb[15].mxu1 }
 0x199   : > { %v1949_v27 = vmax.f32 %v1719_v11, 0.0 }
 0x19a   : > { %v8698_v28 = vpack.c.bf16 %v1948_v25, %v1941_v24 }
 0x19b   : > { %v8700_v29 = vpack.c.bf16 %v1949_v27, %v1942_v26 }
 0x19c   : > { %2018 = vrot.lane.b32.xlu1 %v8698_v28, %s8256_s18 }
 0x19d   : > { %2020 = vrot.lane.b32.xlu0 %v8700_v29, %s8256_s18 }
 0x1a0   : > { %2016 = vrot.lane.b32.xlu1 %v8672_v46, %s8256_s18 }
 0x1a1   : > { %2253 = vrot.lane.b32.xlu0 %v8658_v30, %s8257_s12 }
 0x1a4   : > { %2255 = vrot.lane.b32.xlu1 %v8660_v31, %s8257_s12 }
 0x1a5   : > { %2257 = vrot.lane.b32.xlu0 %v8670_v45, %s8257_s12 }
 0x1a8   : > { %2259 = vrot.lane.b32.xlu1 %v8672_v46, %s8257_s12 }
 0x1a9   : > { %2400 = vrot.lane.b32.xlu0 %v8678_v3, %s8258_s13 }
 0x1ac   : > { %2402 = vrot.lane.b32.xlu1 %v8681_v6, %s8258_s13 }
 0x1ad   : > { %2398 = vrot.lane.b32.xlu0 %v8660_v31, %s8258_s13 }
 0x1b0   : > { %2406 = vrot.lane.b32.xlu1 %v8698_v28, %s8258_s13 }
 0x1b1   : > { %2408 = vrot.lane.b32.xlu0 %v8700_v29, %s8258_s13 }
 0x1b4   : > { %2404 = vrot.lane.b32.xlu1 %v8672_v46, %s8258_s13  ;;  %s8264_s13 = smov 15  }
 0x1b5   : > { %2553 = vrot.lane.b32.xlu0 %v8681_v6, %s8259_s14 }
 0x1c5   : > { %v2011_v4 = vpop.permute.xlu0 %2010 }
 0x1ed   : > { %v1808_v33 = vpop.f32.mrb[16].mxu0 }
 0x1ee   : > { %v7460_v34 = vadd.f32 %v1808_v33, %v8647_v16  ;;  %v1810_v35 = vpop.f32.mrb[17].mxu0  ;;  %v8142_v33 = vld [vmem:[%s10599_s3 + $0x20] sm:$0xff]  }
 0x1ef   : > { %v7461_v36 = vadd.f32 %v1810_v35, %v8647_v16  ;;  %v1812_v37 = vpop.f32.mrb[18].mxu0 }
 0x1f0   : > { %v7462_v39 = vadd.f32 %v1812_v37, %v8650_v18  ;;  %v1814_v40 = vpop.f32.mrb[19].mxu0  ;;  %v1929_v42 = vmax.f32 %v7460_v34, 0.0 }
 0x1f1   : > { %v7463_v41 = vadd.f32 %v1814_v40, %v8650_v18  ;;  %v1930_v44 = vmax.f32 %v7461_v36, 0.0 }
 0x1f2   : > { %v1936_v43 = vmax.f32 %v7462_v39, 0.0 }
 0x1f3   : > { %v1937_v48 = vmax.f32 %v7463_v41, 0.0 }
 0x1f4   : > { %v8732_v49 = vpack.c.bf16 %v1936_v43, %v1929_v42 }
 0x1f5   : > { %v8734_v51 = vpack.c.bf16 %v1937_v48, %v1930_v44  ;;  %v1818_v52 = vpop.f32.mrb[20].mxu0  ;;  %v8143_v44 = vld [vmem:[%s10599_s3 + $0x28] sm:$0xff]  }
 0x1f6   : > { %v7464_v53 = vadd.f32 %v1818_v52, %v8654_v1  ;;  %v1820_v54 = vpop.f32.mrb[21].mxu0  ;;  %2555 = vrot.lane.b32.xlu0 %v8732_v49, %s8259_s14 }
 0x1f7   : > { %v7465_v55 = vadd.f32 %v1820_v54, %v8654_v1  ;;  %v1822_v56 = vpop.f32.mrb[22].mxu0  ;;  %2557 = vrot.lane.b32.xlu1 %v8734_v51, %s8259_s14 }
 0x1f8   : > { %v7466_v58 = vadd.f32 %v1822_v56, %v8662_v0  ;;  %v1824_v59 = vpop.f32.mrb[23].mxu0  ;;  %v1943_v61 = vmax.f32 %v7464_v53, 0.0  ;;  %v8145_v53 = vld [vmem:[%s10599_s3 + $0x38] sm:$0xff]   ;;  %v8146_v56 = vld [vmem:[%s10599_s3] sm:$0xff]  }
 0x1f9   : > { %v7467_v60 = vadd.f32 %v1824_v59, %v8662_v0  ;;  %v1944_v63 = vmax.f32 %v7465_v55, 0.0 }
 0x1fa   : > { %v1950_v62 = vmax.f32 %v7466_v58, 0.0 }
 0x1fb   : > { %v1951_v9 = vmax.f32 %v7467_v60, 0.0 }
 0x1fc   : > { %v8744_v10 = vpack.c.bf16 %v1950_v62, %v1943_v61  ;;  %v8147_v62 = vld [vmem:[%s10599_s3 + $0x8] sm:$0xff]  }
 0x1fd   : > { %v8746_v2 = vpack.c.bf16 %v1951_v9, %v1944_v63  ;;  %v8149_v63 = vld [vmem:[%s10599_s3 + $0x18] sm:$0xff]  }
 0x1fe   : > { %2561 = vrot.lane.b32.xlu1 %v8744_v10, %s8259_s14 }
 0x1ff   : > { %2563 = vrot.lane.b32.xlu0 %v8746_v2, %s8259_s14 }
 0x202   : > { %2559 = vrot.lane.b32.xlu1 %v8700_v29, %s8259_s14  ;;  %s330_s14 = scalar_lea.vmem %s10605_s9, %s6830_s29 }
 0x203   : > { %2706 = vrot.lane.b32.xlu0 %v8734_v51, %s8260_s15 }
 0x206   : > { %v2013_v5 = vpop.permute.xlu0 %2012 }
 0x207   : > { %v2015_v15 = vpop.permute.xlu1 %2014  ;;  %2710 = vrot.lane.b32.xlu0 %v8746_v2, %s8260_s15  ;;  %v2023_v50 = vsel %vm2022_vm1, %v2011_v4, %v2013_v5 }
 0x208   : > { %v2024_v47 = vsel %vm2022_vm1, %v2013_v5, %v2015_v15  ;;  %v8150_v5 = vld [vmem:[%s10599_s3 + $0x40] sm:$0xff]  }
 0x209   : > { %2044 = vmatprep.subr.bf16.mxu1 %v2024_v47 }
 0x20a   : > { %2045 = vmatpush1.bf16.msra.mxu1 %v2023_v50 }
 0x20b   : > { %2853 = vrot.lane.b32.xlu0 %v8732_v49, %s8261_s16 }
 0x20d   : > { %v7424_v8 = vpop.f32.mrb[24].mxu0 }
 0x20e   : > { %v7425_v57 = vpop.f32.mrb[25].mxu0  ;;  %v2019_v17 = vpop.permute.xlu1 %2018 }
 0x20f   : > { %v7426_v19 = vadd.f32 %v7425_v57, %v7424_v8  ;;  %v7427_v20 = vpop.f32.mrb[26].mxu0  ;;  %v2021_v22 = vpop.permute.xlu0 %2020  ;;  %2851 = vrot.lane.b32.xlu0 %v8681_v6, %s8261_s16  ;;  %v8151_v57 = vld [vmem:[%s10599_s3 + $0x48] sm:$0xff]  }
 0x210   : > { %v7428_v23 = vpop.f32.mrb[27].mxu0  ;;  %v2026_v11 = vsel %vm2022_vm1, %v2019_v17, %v2021_v22  ;;  %v4302_v22 = vld [vmem:[%s10600_s4 + $0x10] sm:$0xff] }
 0x211   : > { %v7429_v24 = vadd.f32 %v7428_v23, %v7427_v20  ;;  %2046 = vmatprep.subr.bf16.mxu1 %v2026_v11  ;;  %v1862_v25 = vadd.f32 %v7426_v19, %v8647_v16  ;;  %v8153_v19 = vld [vmem:[%s10599_s3 + $0x58] sm:$0xff]   ;;  %v4300_v20 = vld [vmem:[%s10600_s4] sm:$0xff] }
 0x212   : > { %v2017_v26 = vpop.permute.xlu1 %2016 }
 0x213   : > { %v1911_v27 = vadd.f32 %v8684_v7, %v1862_v25  ;;  %v2025_v32 = vsel %vm2022_vm1, %v2017_v26, %v2019_v17  ;;  %2861 = vrot.lane.b32.xlu0 %v8746_v2, %s8261_s16  ;;  %v1865_v14 = vadd.f32 %v7429_v24, %v8650_v18  ;;  %v2254_v54 = vpop.permute.xlu0 %2253  ;;  %v4304_v24 = vld [vmem:[%s10600_s4 + $0x20] sm:$0xff]  ;;  %vm5647_vm1 = vcmask 703488  }
 0x214   : > { %2047 = vmatpush1.bf16.msra.mxu1 %v2025_v32  ;;  %v4306_v32 = vld [vmem:[%s10600_s4 + $0x30] sm:$0xff] }
 0x215   : > { %v1914_v34 = vadd.f32 %v8694_v21, %v1865_v14  ;;  %v7430_v35 = vpop.f32.mrb[28].mxu0  ;;  %2149 = vmatprep.subr.bf16.mxu1 %v8660_v31  ;;  %v1931_v7 = vmax.f32 %v1911_v27, 0.0 }
 0x216   : > { %v7431_v16 = vpop.f32.mrb[29].mxu0  ;;  %v2256_v48 = vpop.permute.xlu1 %2255 }
 0x217   : > { %v1938_v36 = vmax.f32 %v1914_v34, 0.0  ;;  %v7432_v37 = vadd.f32 %v7431_v16, %v7430_v35  ;;  %v7433_v39 = vpop.f32.mrb[30].mxu0  ;;  %7034 = vmatmul.mubr.msk.bf16.vlgmr.msra.gmra.mrb[16].mxu1 %vm2031_vm2, %v8142_v33  ;;  %3002 = vrot.lane.b32.xlu0 %v8734_v51, %s8262_s20  ;;  %v2258_v58 = vpop.permute.xlu0 %2257  ;;  %v2262_v59 = vsel %vm2261_vm3, %v2254_v54, %v2256_v48  ;;  %v8157_v33 = vld [vmem:[%s10599_s3 + $0x78] sm:$0xff]  }
 0x218   : > { %v7434_v18 = vpop.f32.mrb[31].mxu0  ;;  %2150 = vmatpush1.bf16.msra.mxu1 %v8658_v30  ;;  %2086 = vmatprep.mubr.bf16.mxu1 %v8255_v38  ;;  %v4303_v34 = vld [vmem:[%s10600_s4 + $0x18] sm:$0xff] }
 0x219   : > { %v8781_v21 = vpack.c.bf16 %v1938_v36, %v1931_v7  ;;  %v7435_v40 = vadd.f32 %v7434_v18, %v7433_v39  ;;  %2151 = vmatprep.subr.bf16.mxu1 %v8672_v46  ;;  %v1870_v41 = vadd.f32 %v7432_v37, %v8654_v1  ;;  %v4305_v7 = vld [vmem:[%s10600_s4 + $0x28] sm:$0xff]  ;;  %v8158_v37 = vld [vmem:[%s10599_s3 + $0x80] sm:$0xff]   ;;  %v4307_v39 = vld [vmem:[%s10600_s4 + $0x38] sm:$0xff] }
 0x21a   : > { %v2260_v55 = vpop.permute.xlu1 %2259 }
 0x21b   : > { %v1919_v42 = vadd.f32 %v8702_v12, %v1870_v41  ;;  %2708 = vrot.lane.b32.xlu1 %v8781_v21, %s8260_s15  ;;  %3006 = vrot.lane.b32.xlu0 %v8746_v2, %s8262_s20  ;;  %v1873_v43 = vadd.f32 %v7435_v40, %v8662_v0  ;;  %v2401_v61 = vpop.permute.xlu0 %2400 }
 0x21c   : > { %2152 = vmatpush1.bf16.msra.mxu1 %v8670_v45 }
 0x21d   : > { %v1922_v52 = vadd.f32 %v8708_v13, %v1873_v43  ;;  %2280 = vmatprep.subr.bf16.mxu1 %v2256_v48  ;;  %v1945_v1 = vmax.f32 %v1919_v42, 0.0  ;;  %v8144_v13 = vld [vmem:[%s10599_s3 + $0x30] sm:$0xff]  }
 0x21e   : > { %v2403_v60 = vpop.permute.xlu1 %2402  ;;  %v8160_v48 = vld [vmem:[%s10599_s3 + $0x90] sm:$0xff]  }
 0x21f   : > { %v1952_v12 = vmax.f32 %v1922_v52, 0.0  ;;  %7035 = vmatmul.mubr.msk.bf16.gmra.mrb[20].mxu1 %vm2031_vm2, %v8143_v44  ;;  %3147 = vrot.lane.b32.xlu0 %v8658_v30, %s8260_s15  ;;  %v2399_v9 = vpop.permute.xlu0 %2398  ;;  %v8159_v44 = vld [vmem:[%s10599_s3 + $0x88] sm:$0xff]   ;;  %v8161_v52 = vld [vmem:[%s10599_s3 + $0x98] sm:$0xff]  }
 0x220   : > { %2096 = vmatprep.mubr.bf16.mxu1 %v8255_v38  ;;  %v2411_v15 = vsel %vm2410_vm4, %v2399_v9, %v2401_v61 }
 0x221   : > { %v8800_v0 = vpack.c.bf16 %v1952_v12, %v1945_v1 }
 0x222   : > { %v2407_v4 = vpop.permute.xlu1 %2406 }
 0x223   : > { %2712 = vrot.lane.b32.xlu1 %v8800_v0, %s8260_s15  ;;  %3151 = vrot.lane.b32.xlu0 %v8670_v45, %s8260_s15 }
 0x226   : > { %v2405_v47 = vpop.permute.xlu1 %2404 }
 0x227   : > { %2855 = vrot.lane.b32.xlu1 %v8734_v51, %s8261_s16  ;;  %7036 = vmatmul.mubr.msk.bf16.gmra.mrb[24].mxu1 %vm2031_vm2, %v8144_v13  ;;  %v2413_v8 = vsel %vm2410_vm4, %v2405_v47, %v2407_v4 }
 0x228   : > { %3293 = vrot.lane.b32.xlu0 %v8678_v3, %s8263_s25  ;;  %2106 = vmatprep.mubr.bf16.mxu1 %v8255_v38 }
 0x22b   : > { %2859 = vrot.lane.b32.xlu1 %v8744_v10, %s8261_s16 }
 0x22c   : > { %3291 = vrot.lane.b32.xlu0 %v8660_v31, %s8263_s25 }
 0x22f   : > { %2857 = vrot.lane.b32.xlu1 %v8700_v29, %s8261_s16  ;;  %7037 = vmatmul.mubr.msk.bf16.gmra.mrb[28].mxu1 %vm2031_vm2, %v8145_v53 }
 0x230   : > { %3301 = vrot.lane.b32.xlu0 %v8700_v29, %s8263_s25  ;;  %2181 = vmatprep.mubr.bf16.mxu1 %v8255_v38 }
 0x233   : > { %3004 = vrot.lane.b32.xlu1 %v8781_v21, %s8262_s20 }
 0x234   : > { %3442 = vrot.lane.b32.xlu0 %v8658_v30, %s8262_s20  ;;  %v2263_v30 = vsel %vm2261_vm3, %v2258_v58, %v2260_v55  ;;  %v8163_v58 = vld [vmem:[%s10599_s3 + $0xa8] sm:$0xff]  }
 0x237   : > { %3008 = vrot.lane.b32.xlu1 %v8800_v0, %s8262_s20  ;;  %7042 = vmatmul.mubr.msk.bf16.vlgmr.msra.gmra.mrb[16].mxu1 %vm2031_vm2, %v8146_v56 }
 0x238   : > { %3446 = vrot.lane.b32.xlu0 %v8670_v45, %s8262_s20  ;;  %2281 = vmatpush1.bf16.msra.mxu1 %v2262_v59  ;;  %v2412_v45 = vsel %vm2410_vm4, %v2401_v61, %v2403_v60  ;;  %v8164_v60 = vld [vmem:[%s10599_s3 + $0xb0] sm:$0xff]   ;;  %v8165_v61 = vld [vmem:[%s10599_s3 + $0xb8] sm:$0xff]  }
 0x239   : > { %2282 = vmatprep.subr.bf16.mxu1 %v2260_v55  ;;  %2191 = vmatprep.mubr.bf16.mxu1 %v8255_v38 }
 0x23b   : > { %3149 = vrot.lane.b32.xlu1 %v8660_v31, %s8260_s15 }
 0x23c   : > { %3588 = vrot.lane.b32.xlu0 %v8678_v3, %s8264_s13  ;;  %2283 = vmatpush1.bf16.msra.mxu1 %v2263_v30  ;;  %v8148_v3 = vld [vmem:[%s10599_s3 + $0x10] sm:$0xff]   ;;  %v8166_v30 = vld [vmem:[%s10599_s3 + $0xc0] sm:$0xff]  }
 0x23d   : > { %2431 = vmatprep.subr.bf16.mxu1 %v2412_v45 }
 0x23f   : > { %3153 = vrot.lane.b32.xlu1 %v8672_v46, %s8260_s15  ;;  %7043 = vmatmul.mubr.msk.bf16.gmra.mrb[20].mxu1 %vm2031_vm2, %v8147_v62 }
 0x240   : > { %3586 = vrot.lane.b32.xlu0 %v8660_v31, %s8264_s13  ;;  %2201 = vmatprep.mubr.bf16.mxu1 %v8255_v38 }
 0x243   : > { %3295 = vrot.lane.b32.xlu1 %v8681_v6, %s8263_s25 }
 0x244   : > { %3596 = vrot.lane.b32.xlu0 %v8700_v29, %s8264_s13 }
 0x247   : > { %3299 = vrot.lane.b32.xlu1 %v8698_v28, %s8263_s25  ;;  %7044 = vmatmul.mubr.msk.bf16.gmra.mrb[24].mxu1 %vm2031_vm2, %v8148_v3 }
 0x248   : > { %3739 = vrot.lane.b32.xlu0 %v8732_v49, %s8265_s17  ;;  %2211 = vmatprep.mubr.bf16.mxu1 %v8255_v38 }
 0x24b   : > { %3297 = vrot.lane.b32.xlu1 %v8672_v46, %s8263_s25 }
 0x24c   : > { %3737 = vrot.lane.b32.xlu0 %v8681_v6, %s8265_s17 }
 0x24f   : > { %3444 = vrot.lane.b32.xlu1 %v8660_v31, %s8262_s20  ;;  %7045 = vmatmul.mubr.msk.bf16.gmra.mrb[28].mxu1 %vm2031_vm2, %v8149_v63  ;;  %v2409_v31 = vpop.permute.xlu0 %2408 }
 0x250   : > { %3747 = vrot.lane.b32.xlu0 %v8746_v2, %s8265_s17  ;;  %2312 = vmatprep.mubr.bf16.mxu1 %v8255_v38  ;;  %v2414_v50 = vsel %vm2410_vm4, %v2407_v4, %v2409_v31  ;;  %v8167_v4 = vld [vmem:[%s10599_s3 + $0xc8] sm:$0xff]   ;;  %v8168_v31 = vld [vmem:[%s10599_s3 + $0xd0] sm:$0xff]   ;;  %vm6442_vm4 = vcmask 261312  }
 0x253   : > { %3448 = vrot.lane.b32.xlu1 %v8672_v46, %s8262_s20  ;;  %v2554_v17 = vpop.permute.xlu0 %2553 }
 0x254   : > { %3888 = vrot.lane.b32.xlu0 %v8734_v51, %s8266_s24 }
 0x257   : > { %3590 = vrot.lane.b32.xlu1 %v8681_v6, %s8264_s13  ;;  %7058 = vmatmul.mubr.msk.bf16.vlgmr.msra.gmra.mrb[16].mxu1 %vm2031_vm2, %v8150_v5 }
 0x258   : > { %3892 = vrot.lane.b32.xlu0 %v8746_v2, %s8266_s24  ;;  %2432 = vmatpush1.bf16.msra.mxu1 %v2411_v15  ;;  %v8169_v15 = vld [vmem:[%s10599_s3 + $0xd8] sm:$0xff]  }
 0x259   : > { %2433 = vmatprep.subr.bf16.mxu1 %v2414_v50  ;;  %2322 = vmatprep.mubr.bf16.mxu1 %v8255_v38 }
 0x25b   : > { %3594 = vrot.lane.b32.xlu1 %v8698_v28, %s8264_s13  ;;  %v8152_v28 = vld [vmem:[%s10599_s3 + $0x50] sm:$0xff]  }
 0x25c   : > { %4035 = vrot.lane.b32.xlu0 %v8732_v49, %s8267_s27  ;;  %2434 = vmatpush1.bf16.msra.mxu1 %v2413_v8  ;;  %v8170_v8 = vld [vmem:[%s10599_s3 + $0xe0] sm:$0xff]  }
 0x25f   : > { %3592 = vrot.lane.b32.xlu1 %v8672_v46, %s8264_s13  ;;  %7059 = vmatmul.mubr.msk.bf16.gmra.mrb[20].mxu1 %vm2031_vm2, %v8151_v57 }
 0x260   : > { %4033 = vrot.lane.b32.xlu0 %v8681_v6, %s8267_s27  ;;  %2332 = vmatprep.mubr.bf16.mxu1 %v8255_v38 }
 0x263   : > { %3741 = vrot.lane.b32.xlu1 %v8734_v51, %s8265_s17 }
 0x264   : > { %4043 = vrot.lane.b32.xlu0 %v8746_v2, %s8267_s27 }
 0x267   : > { %3745 = vrot.lane.b32.xlu1 %v8744_v10, %s8265_s17  ;;  %7060 = vmatmul.mubr.msk.bf16.gmra.mrb[24].mxu1 %vm2031_vm2, %v8152_v28 }
 0x268   : > { %4184 = vrot.lane.b32.xlu0 %v8734_v51, %s8268_s11  ;;  %v2556_v46 = vpop.permute.xlu0 %2555  ;;  %2342 = vmatprep.mubr.bf16.mxu1 %v8255_v38 }
 0x269   : > { %v2558_v6 = vpop.permute.xlu1 %2557  ;;  %v2566_v25 = vsel %vm2565_vm5, %v2554_v17, %v2556_v46 }
 0x26a   : > { %v2567_v49 = vsel %vm2565_vm5, %v2556_v46, %v2558_v6 }
 0x26b   : > { %3743 = vrot.lane.b32.xlu1 %v8700_v29, %s8265_s17  ;;  %2586 = vmatprep.subr.bf16.mxu1 %v2567_v49  ;;  %v8171_v49 = vld [vmem:[%s10599_s3 + $0xe8] sm:$0xff]  }
 0x26c   : > { %4188 = vrot.lane.b32.xlu0 %v8746_v2, %s8268_s11  ;;  %v8154_v2 = vld [vmem:[%s10599_s3 + $0x60] sm:$0xff]  }
 0x26f   : > { %3890 = vrot.lane.b32.xlu1 %v8781_v21, %s8266_s24  ;;  %7061 = vmatmul.mubr.msk.bf16.gmra.mrb[28].mxu1 %vm2031_vm2, %v8153_v19 }
 0x270   : > { %4310 = vperm.xlu0 %7878, %v4300_v20   ;;  %2463 = vmatprep.mubr.bf16.mxu1 %v8255_v38  ;;  %v2562_v23 = vpop.permute.xlu1 %2561  ;;  %v8172_v20 = vld [vmem:[%s10599_s3 + $0xf0] sm:$0xff]  }
 0x271   : > { %v2564_v11 = vpop.permute.xlu0 %2563 }
 0x272   : > { %v2569_v27 = vsel %vm2565_vm5, %v2562_v23, %v2564_v11  ;;  %v8174_v11 = vld [vmem:[%s10599_s3 + $0x100] sm:$0xff]  }
 0x273   : > { %3894 = vrot.lane.b32.xlu1 %v8800_v0, %s8266_s24 }
 0x274   : > { %4320 = vperm.xlu0 %7878, %v4302_v22   ;;  %v2560_v26 = vpop.permute.xlu1 %2559  ;;  %v8173_v22 = vld [vmem:[%s10599_s3 + $0xf8] sm:$0xff]  }
 0x275   : > { %v2568_v14 = vsel %vm2565_vm5, %v2560_v26, %v2562_v23  ;;  %v2707_v35 = vpop.permute.xlu0 %2706  ;;  %vm6449_vm5 = vcmask 326912  }
 0x277   : > { %4037 = vrot.lane.b32.xlu1 %v8734_v51, %s8267_s27  ;;  %7074 = vmatmul.mubr.msk.bf16.vlgmr.msra.gmra.mrb[16].mxu1 %vm2031_vm2, %v8154_v2  ;;  %v8155_v51 = vld [vmem:[%s10599_s3 + $0x68] sm:$0xff]  }
 0x278   : > { %4330 = vperm.xlu0 %7878, %v4304_v24   ;;  %2587 = vmatpush1.bf16.msra.mxu1 %v2566_v25 }
 0x279   : > { %2588 = vmatprep.subr.bf16.mxu1 %v2569_v27  ;;  %2473 = vmatprep.mubr.bf16.mxu1 %v8255_v38  ;;  %v2711_v36 = vpop.permute.xlu0 %2710 }
 0x27b   : > { %4041 = vrot.lane.b32.xlu1 %v8744_v10, %s8267_s27  ;;  %v8156_v10 = vld [vmem:[%s10599_s3 + $0x70] sm:$0xff]  }
 0x27c   : > { %4340 = vperm.xlu0 %7878, %v4306_v32   ;;  %2589 = vmatpush1.bf16.msra.mxu1 %v2568_v14  ;;  %v8175_v14 = vld [vmem:[%s10599_s3 + $0x108] sm:$0xff]  }
 0x27d   : > { %v2854_v40 = vpop.permute.xlu0 %2853 }
 0x27f   : > { %4039 = vrot.lane.b32.xlu1 %v8700_v29, %s8267_s27  ;;  %7075 = vmatmul.mubr.msk.bf16.gmra.mrb[20].mxu1 %vm2031_vm2, %v8155_v51  ;;  %v4301_v29 = vld [vmem:[%s10600_s4 + $0x8] sm:$0xff] }
 0x280   : > { %2483 = vmatprep.mubr.bf16.mxu1 %v8255_v38 }
 0x281   : > { %v2852_v12 = vpop.permute.xlu0 %2851 }
 0x282   : > { %v2864_v53 = vsel %vm2863_vm7, %v2852_v12, %v2854_v40 }
 0x283   : > { %4186 = vrot.lane.b32.xlu1 %v8781_v21, %s8268_s11 }
 0x285   : > { %v2862_v54 = vpop.permute.xlu0 %2861 }
 0x287   : > { %4190 = vrot.lane.b32.xlu1 %v8800_v0, %s8268_s11  ;;  %7076 = vmatmul.mubr.msk.bf16.gmra.mrb[24].mxu1 %vm2031_vm2, %v8156_v10  ;;  %v8162_v0 = vld [vmem:[%s10599_s3 + $0xa0] sm:$0xff]   ;;  %v8176_v10 = vld [vmem:[%s10599_s3 + $0x110] sm:$0xff]  }
 0x288   : > { %2493 = vmatprep.mubr.bf16.mxu1 %v8255_v38 }
 0x289   : > { %v3003_v62 = vpop.permute.xlu0 %3002 }
 0x28b   : > { %4315 = vperm.xlu1 %7879, %v4301_v29   ;;  %v8177_v29 = vld [vmem:[%s10599_s3 + $0x118] sm:$0xff]  }
 0x28d   : > { %v2709_v16 = vpop.permute.xlu1 %2708  ;;  %v3007_v63 = vpop.permute.xlu0 %3006 }
 0x28e   : > { %2733 = vmatprep.subr.bf16.mxu1 %v2709_v16  ;;  %v2715_v21 = vsel %vm2714_vm6, %v2707_v35, %v2709_v16  ;;  %v8178_v35 = vld [vmem:[%s10599_s3 + $0x120] sm:$0xff]  }
 0x28f   : > { %4325 = vperm.xlu1 %7879, %v4303_v34   ;;  %7077 = vmatmul.mubr.msk.bf16.gmra.mrb[28].mxu1 %vm2031_vm2, %v8157_v33 }
 0x290   : > { %2618 = vmatprep.mubr.bf16.mxu1 %v8255_v38 }
 0x291   : > { %v3148_v47 = vpop.permute.xlu0 %3147 }
 0x293   : > { %4335 = vperm.xlu1 %7879, %v4305_v7  }
 0x295   : > { %v2713_v18 = vpop.permute.xlu1 %2712  ;;  %v3152_v57 = vpop.permute.xlu0 %3151 }
 0x296   : > { %v2716_v43 = vsel %vm2714_vm6, %v2711_v36, %v2713_v18 }
 0x297   : > { %4345 = vperm.xlu1 %7879, %v4307_v39   ;;  %7090 = vmatmul.mubr.msk.bf16.vlgmr.msra.gmra.mrb[16].mxu1 %vm2031_vm2, %v8158_v37 }
 0x298   : > { %2734 = vmatpush1.bf16.msra.mxu1 %v2715_v21  ;;  %2628 = vmatprep.mubr.bf16.mxu1 %v8255_v38 }
 0x299   : > { %2735 = vmatprep.subr.bf16.mxu1 %v2713_v18  ;;  %v2856_v41 = vpop.permute.xlu1 %2855  ;;  %v8179_v18 = vld [vmem:[%s10599_s3 + $0x128] sm:$0xff]  }
 0x29a   : > { %v2865_v42 = vsel %vm2863_vm7, %v2854_v40, %v2856_v41  ;;  %v3294_v46 = vpop.permute.xlu0 %3293  ;;  %v8180_v40 = vld [vmem:[%s10599_s3 + $0x130] sm:$0xff]   ;;  %v8181_v41 = vld [vmem:[%s10599_s3 + $0x138] sm:$0xff]  }
 0x29c   : > { %2736 = vmatpush1.bf16.msra.mxu1 %v2716_v43 }
 0x29d   : > { %2884 = vmatprep.subr.bf16.mxu1 %v2865_v42  ;;  %v2860_v1 = vpop.permute.xlu1 %2859 }
 0x29e   : > { %v2867_v55 = vsel %vm2863_vm7, %v2860_v1, %v2862_v54  ;;  %v3292_v2 = vpop.permute.xlu0 %3291  ;;  %v8183_v54 = vld [vmem:[%s10599_s3 + $0x148] sm:$0xff]  }
 0x29f   : > { %7091 = vmatmul.mubr.msk.bf16.gmra.mrb[20].mxu1 %vm2031_vm2, %v8159_v44  ;;  %v3304_v25 = vsel %vm1502_vm0, %v3292_v2, %v3294_v46  ;;  %v8194_v2 = vld [vmem:[%s10599_s3 + $0x1a0] sm:$0xff]  }
 0x2a0   : > { %2638 = vmatprep.mubr.bf16.mxu1 %v8255_v38 }
 0x2a1   : > { %v2858_v13 = vpop.permute.xlu1 %2857 }
 0x2a2   : > { %v2866_v56 = vsel %vm2863_vm7, %v2858_v13, %v2860_v1  ;;  %v3302_v26 = vpop.permute.xlu0 %3301  ;;  %vm6463_vm7 = vcmask 458112  }
 0x2a5   : > { %v3005_v59 = vpop.permute.xlu1 %3004 }
 0x2a6   : > { %v3011_v3 = vsel %vm3010_vm8, %v3003_v62, %v3005_v59  ;;  %v3443_v33 = vpop.permute.xlu0 %3442 }
 0x2a7   : > { %7092 = vmatmul.mubr.msk.bf16.gmra.mrb[24].mxu1 %vm2031_vm2, %v8160_v48  ;;  %v8182_v48 = vld [vmem:[%s10599_s3 + $0x140] sm:$0xff]  }
 0x2a8   : > { %2648 = vmatprep.mubr.bf16.mxu1 %v8255_v38 }
 0x2a9   : > { %v3009_v45 = vpop.permute.xlu1 %3008 }
 0x2aa   : > { %v3012_v9 = vsel %vm3010_vm8, %v3007_v63, %v3009_v45  ;;  %v3447_v16 = vpop.permute.xlu0 %3446 }
 0x2ad   : > { %v3150_v5 = vpop.permute.xlu1 %3149 }
 0x2ae   : > { %v3155_v28 = vsel %vm2714_vm6, %v3148_v47, %v3150_v5  ;;  %v3589_v37 = vpop.permute.xlu0 %3588 }
 0x2af   : > { %7093 = vmatmul.mubr.msk.bf16.gmra.mrb[28].mxu1 %vm2031_vm2, %v8161_v52 }
 0x2b0   : > { %2765 = vmatprep.mubr.bf16.mxu1 %v8255_v38 }
 0x2b1   : > { %v3154_v50 = vpop.permute.xlu1 %3153 }
 0x2b2   : > { %v3156_v6 = vsel %vm2714_vm6, %v3152_v57, %v3154_v50  ;;  %v3587_v43 = vpop.permute.xlu0 %3586 }
 0x2b3   : > { %v3599_v1 = vsel %vm3598_vm9, %v3587_v43, %v3589_v37 }
 0x2b5   : > { %v3296_v17 = vpop.permute.xlu1 %3295 }
 0x2b6   : > { %v3305_v19 = vsel %vm1502_vm0, %v3294_v46, %v3296_v17  ;;  %v3597_v52 = vpop.permute.xlu0 %3596 }
 0x2b7   : > { %7106 = vmatmul.mubr.msk.bf16.vlgmr.msra.gmra.mrb[16].mxu1 %vm2031_vm2, %v8162_v0 }
 0x2b8   : > { %2885 = vmatpush1.bf16.msra.mxu1 %v2864_v53  ;;  %2775 = vmatprep.mubr.bf16.mxu1 %v8255_v38 }
 0x2b9   : > { %2886 = vmatprep.subr.bf16.mxu1 %v2867_v55  ;;  %v3300_v23 = vpop.permute.xlu1 %3299 }
 0x2ba   : > { %v3307_v27 = vsel %vm1502_vm0, %v3300_v23, %v3302_v26  ;;  %v3740_v13 = vpop.permute.xlu0 %3739 }
 0x2bc   : > { %2887 = vmatpush1.bf16.msra.mxu1 %v2866_v56  ;;  %v8184_v56 = vld [vmem:[%s10599_s3 + $0x150] sm:$0xff]  }
 0x2bd   : > { %3029 = vmatprep.subr.bf16.mxu1 %v3005_v59  ;;  %v3298_v24 = vpop.permute.xlu1 %3297 }
 0x2be   : > { %v3306_v32 = vsel %vm1502_vm0, %v3298_v24, %v3300_v23  ;;  %vm5172_vm0 = vcmask 867328  }
 0x2bf   : > { %7107 = vmatmul.mubr.msk.bf16.gmra.mrb[20].mxu1 %vm2031_vm2, %v8163_v58  ;;  %v8185_v58 = vld [vmem:[%s10599_s3 + $0x158] sm:$0xff]  }
 0x2c0   : > { %2785 = vmatprep.mubr.bf16.mxu1 %v8255_v38 }
 0x2c1   : > { %v3445_v51 = vpop.permute.xlu1 %3444 }
 0x2c2   : > { %v3450_v7 = vsel %vm3010_vm8, %v3443_v33, %v3445_v51 }
 0x2c5   : > { %v3449_v34 = vpop.permute.xlu1 %3448 }
 0x2c6   : > { %v3451_v39 = vsel %vm3010_vm8, %v3447_v16, %v3449_v34 }
 0x2c7   : > { %7108 = vmatmul.mubr.msk.bf16.gmra.mrb[24].mxu1 %vm2031_vm2, %v8164_v60  ;;  %v3738_v60 = vpop.permute.xlu0 %3737 }
 0x2c8   : > { %2795 = vmatprep.mubr.bf16.mxu1 %v8255_v38  ;;  %v3750_v62 = vsel %vm3749_vm10, %v3738_v60, %v3740_v13 }
 0x2c9   : > { %v3591_v36 = vpop.permute.xlu1 %3590 }
 0x2ca   : > { %v3600_v21 = vsel %vm3598_vm9, %v3589_v37, %v3591_v36  ;;  %v8199_v36 = vld [vmem:[%s10599_s3 + $0x1c8] sm:$0xff]   ;;  %v8200_v37 = vld [vmem:[%s10599_s3 + $0x1d0] sm:$0xff]  }
 0x2cd   : > { %v3595_v42 = vpop.permute.xlu1 %3594 }
 0x2ce   : > { %v3602_v12 = vsel %vm3598_vm9, %v3595_v42, %v3597_v52 }
 0x2cf   : > { %7109 = vmatmul.mubr.msk.bf16.gmra.mrb[28].mxu1 %vm2031_vm2, %v8165_v61  ;;  %v8186_v61 = vld [vmem:[%s10599_s3 + $0x160] sm:$0xff]  }
 0x2d0   : > { %2916 = vmatprep.mubr.bf16.mxu1 %v8255_v38 }
 0x2d1   : > { %v3593_v44 = vpop.permute.xlu1 %3592 }
 0x2d2   : > { %v3601_v53 = vsel %vm3598_vm9, %v3593_v44, %v3595_v42  ;;  %vm6745_vm9 = vcmask 1041409  }
 0x2d5   : > { %v3742_v0 = vpop.permute.xlu1 %3741 }
 0x2d6   : > { %v3751_v55 = vsel %vm3749_vm10, %v3740_v13, %v3742_v0 }
 0x2d7   : > { %7122 = vmatmul.mubr.msk.bf16.vlgmr.msra.gmra.mrb[16].mxu1 %vm2031_vm2, %v8166_v30 }
 0x2d8   : > { %3030 = vmatpush1.bf16.msra.mxu1 %v3011_v3  ;;  %2926 = vmatprep.mubr.bf16.mxu1 %v8255_v38 }
 0x2d9   : > { %3031 = vmatprep.subr.bf16.mxu1 %v3009_v45  ;;  %v3746_v59 = vpop.permute.xlu1 %3745  ;;  %v3748_v45 = vpop.permute.xlu0 %3747 }
 0x2da   : > { %v3753_v3 = vsel %vm3749_vm10, %v3746_v59, %v3748_v45 }
 0x2dc   : > { %3032 = vmatpush1.bf16.msra.mxu1 %v3012_v9  ;;  %v8187_v9 = vld [vmem:[%s10599_s3 + $0x168] sm:$0xff]  }
 0x2dd   : > { %3173 = vmatprep.subr.bf16.mxu1 %v3150_v5  ;;  %v3744_v30 = vpop.permute.xlu1 %3743  ;;  %v8188_v5 = vld [vmem:[%s10599_s3 + $0x170] sm:$0xff]  }
 0x2de   : > { %v3752_v63 = vsel %vm3749_vm10, %v3744_v30, %v3746_v59  ;;  %vm6747_vm10 = vcmask 1042434  }
 0x2df   : > { %7123 = vmatmul.mubr.msk.bf16.gmra.mrb[20].mxu1 %vm2031_vm2, %v8167_v4 }
 0x2e0   : > { %2936 = vmatprep.mubr.bf16.mxu1 %v8255_v38 }
 0x2e1   : > { %v3891_v4 = vpop.permute.xlu1 %3890 }
 0x2e5   : > { %v3895_v47 = vpop.permute.xlu1 %3894 }
 0x2e7   : > { %7124 = vmatmul.mubr.msk.bf16.gmra.mrb[24].mxu1 %vm2031_vm2, %v8168_v31  ;;  %v8189_v31 = vld [vmem:[%s10599_s3 + $0x178] sm:$0xff]  }
 0x2e8   : > { %2946 = vmatprep.mubr.bf16.mxu1 %v8255_v38 }
 0x2ef   : > { %7125 = vmatmul.mubr.msk.bf16.gmra.mrb[28].mxu1 %vm2031_vm2, %v8169_v15  ;;  %v3889_v15 = vpop.permute.xlu0 %3888 }
 0x2f0   : > { %3061 = vmatprep.mubr.bf16.mxu1 %v8255_v38  ;;  %v3897_v57 = vsel %vm3896_vm11, %v3889_v15, %v3891_v4 }
 0x2f7   : > { %7138 = vmatmul.mubr.msk.bf16.vlgmr.msra.gmra.mrb[16].mxu1 %vm2031_vm2, %v8170_v8  ;;  %v3893_v8 = vpop.permute.xlu0 %3892 }
 0x2f8   : > { %3174 = vmatpush1.bf16.msra.mxu1 %v3155_v28  ;;  %3071 = vmatprep.mubr.bf16.mxu1 %v8255_v38  ;;  %v4038_v28 = vpop.permute.xlu1 %4037  ;;  %v3898_v46 = vsel %vm3896_vm11, %v3893_v8, %v3895_v47 }
 0x2f9   : > { %3175 = vmatprep.subr.bf16.mxu1 %v3154_v50  ;;  %v8190_v50 = vld [vmem:[%s10599_s3 + $0x180] sm:$0xff]  }
 0x2fb   : > { %v4036_v17 = vpop.permute.xlu0 %4035 }
 0x2fc   : > { %3176 = vmatpush1.bf16.msra.mxu1 %v3156_v6  ;;  %v8191_v6 = vld [vmem:[%s10599_s3 + $0x188] sm:$0xff]  }
 0x2fd   : > { %3324 = vmatprep.subr.bf16.mxu1 %v3305_v19  ;;  %v8192_v19 = vld [vmem:[%s10599_s3 + $0x190] sm:$0xff]  }
 0x2ff   : > { %7139 = vmatmul.mubr.msk.bf16.gmra.mrb[20].mxu1 %vm2031_vm2, %v8171_v49  ;;  %v4047_v49 = vsel %vm4045_vm12, %v4036_v17, %v4038_v28  ;;  %v4034_v23 = vpop.permute.xlu0 %4033 }
 0x300   : > { %3081 = vmatprep.mubr.bf16.mxu1 %v8255_v38  ;;  %v4046_v24 = vsel %vm4045_vm12, %v4034_v23, %v4036_v17 }
 0x307   : > { %7140 = vmatmul.mubr.msk.bf16.gmra.mrb[24].mxu1 %vm2031_vm2, %v8172_v20  ;;  %v8193_v20 = vld [vmem:[%s10599_s3 + $0x198] sm:$0xff]  }
 0x308   : > { %3091 = vmatprep.mubr.bf16.mxu1 %v8255_v38 }
 0x30f   : > { %7141 = vmatmul.mubr.msk.bf16.gmra.mrb[28].mxu1 %vm2031_vm2, %v8173_v22  ;;  %v4042_v22 = vpop.permute.xlu1 %4041 }
 0x310   : > { %3205 = vmatprep.mubr.bf16.mxu1 %v8255_v38 }
 0x317   : > { %7154 = vmatmul.mubr.msk.bf16.vlgmr.msra.gmra.mrb[16].mxu1 %vm2031_vm2, %v8174_v11  ;;  %v4040_v11 = vpop.permute.xlu1 %4039 }
 0x318   : > { %3325 = vmatpush1.bf16.msra.mxu1 %v3304_v25  ;;  %3215 = vmatprep.mubr.bf16.mxu1 %v8255_v38  ;;  %v4044_v25 = vpop.permute.xlu0 %4043 }
 0x319   : > { %3326 = vmatprep.subr.bf16.mxu1 %v3307_v27  ;;  %v4049_v26 = vsel %vm4045_vm12, %v4042_v22, %v4044_v25  ;;  %v4048_v27 = vsel %vm4045_vm12, %v4040_v11, %v4042_v22  ;;  %vm6751_vm12 = vcmask 1044484  }
 0x31c   : > { %3327 = vmatpush1.bf16.msra.mxu1 %v3306_v32  ;;  %v8195_v32 = vld [vmem:[%s10599_s3 + $0x1a8] sm:$0xff]   ;;  %v4185_v33 = vpop.permute.xlu0 %4184 }
 0x31d   : > { %3468 = vmatprep.subr.bf16.mxu1 %v3445_v51  ;;  %v8196_v51 = vld [vmem:[%s10599_s3 + $0x1b0] sm:$0xff]  }
 0x31f   : > { %7155 = vmatmul.mubr.msk.bf16.gmra.mrb[20].mxu1 %vm2031_vm2, %v8175_v14  ;;  %v4187_v14 = vpop.permute.xlu1 %4186 }
 0x320   : > { %3225 = vmatprep.mubr.bf16.mxu1 %v8255_v38  ;;  %v4189_v16 = vpop.permute.xlu0 %4188 }
 0x324   : > { %v4311_v42 = vpop.permute.xlu0 %4310 }
 0x327   : > { %7156 = vmatmul.mubr.msk.bf16.gmra.mrb[24].mxu1 %vm2031_vm2, %v8176_v10  ;;  %v8197_v10 = vld [vmem:[%s10599_s3 + $0x1b8] sm:$0xff]  }
 0x328   : > { %3235 = vmatprep.mubr.bf16.mxu1 %v8255_v38  ;;  %v4321_v60 = vpop.permute.xlu0 %4320 }
 0x32c   : > { %v4331_v28 = vpop.permute.xlu0 %4330 }
 0x32f   : > { %7157 = vmatmul.mubr.msk.bf16.gmra.mrb[28].mxu1 %vm2031_vm2, %v8177_v29  ;;  %v8198_v29 = vld [vmem:[%s10599_s3 + $0x1c0] sm:$0xff]  }
 0x330   : > { %3356 = vmatprep.mubr.bf16.mxu1 %v8255_v38 }
 0x337   : > { %7170 = vmatmul.mubr.msk.bf16.vlgmr.msra.gmra.mrb[16].mxu1 %vm2031_vm2, %v8178_v35  ;;  %v4191_v35 = vpop.permute.xlu1 %4190 }
 0x338   : > { %3469 = vmatpush1.bf16.msra.mxu1 %v3450_v7  ;;  %3366 = vmatprep.mubr.bf16.mxu1 %v8255_v38  ;;  %v4194_v7 = vsel %vm4192_vm13, %v4189_v16, %v4191_v35 }
 0x339   : > { %3470 = vmatprep.subr.bf16.mxu1 %v3449_v34  ;;  %v4193_v34 = vsel %vm4192_vm13, %v4185_v33, %v4187_v14 }
 0x33b   : > { %v4316_v52 = vpop.permute.xlu1 %4315 }
 0x33c   : > { %3471 = vmatpush1.bf16.msra.mxu1 %v3451_v39  ;;  %v8201_v39 = vld [vmem:[%s10599_s3 + $0x1d8] sm:$0xff]  }
 0x33d   : > { %3619 = vmatprep.subr.bf16.mxu1 %v3600_v21  ;;  %v8203_v21 = vld [vmem:[%s10599_s3 + $0x1e8] sm:$0xff]  }
 0x33f   : > { %7171 = vmatmul.mubr.msk.bf16.gmra.mrb[20].mxu1 %vm2031_vm2, %v8179_v18  ;;  %v8202_v18 = vld [vmem:[%s10599_s3 + $0x1e0] sm:$0xff]  }
 0x340   : > { %3376 = vmatprep.mubr.bf16.mxu1 %v8255_v38 }
 0x347   : > { %7172 = vmatmul.mubr.msk.bf16.gmra.mrb[24].mxu1 %vm2031_vm2, %v8180_v40  ;;  %v8204_v40 = vld [vmem:[%s10599_s3 + $0x1f0] sm:$0xff]  }
 0x348   : > { %3386 = vmatprep.mubr.bf16.mxu1 %v8255_v38 }
 0x34f   : > { %7173 = vmatmul.mubr.msk.bf16.gmra.mrb[28].mxu1 %vm2031_vm2, %v8181_v41  ;;  %v8205_v41 = vld [vmem:[%s10599_s3 + $0x1f8] sm:$0xff]  }
 0x350   : > { %3500 = vmatprep.mubr.bf16.mxu1 %v8255_v38 }
 0x357   : > { %7186 = vmatmul.mubr.msk.bf16.vlgmr.msra.gmra.mrb[16].mxu1 %vm2031_vm2, %v8182_v48 }
 0x358   : > { %3620 = vmatpush1.bf16.msra.mxu1 %v3599_v1  ;;  %3510 = vmatprep.mubr.bf16.mxu1 %v8255_v38 }
 0x359   : > { %3621 = vmatprep.subr.bf16.mxu1 %v3602_v12 }
 0x35c   : > { %3622 = vmatpush1.bf16.msra.mxu1 %v3601_v53 }
 0x35d   : > { %3770 = vmatprep.subr.bf16.mxu1 %v3751_v55 }
 0x35f   : > { %7187 = vmatmul.mubr.msk.bf16.gmra.mrb[20].mxu1 %vm2031_vm2, %v8183_v54 }
 0x360   : > { %3520 = vmatprep.mubr.bf16.mxu1 %v8255_v38 }
 0x367   : > { %7188 = vmatmul.mubr.msk.bf16.gmra.mrb[24].mxu1 %vm2031_vm2, %v8184_v56 }
 0x368   : > { %3530 = vmatprep.mubr.bf16.mxu1 %v8255_v38 }
 0x36f   : > { %7189 = vmatmul.mubr.msk.bf16.gmra.mrb[28].mxu1 %vm2031_vm2, %v8185_v58 }
 0x370   : > { %3651 = vmatprep.mubr.bf16.mxu1 %v8255_v38 }
 0x377   : > { %7202 = vmatmul.mubr.msk.bf16.vlgmr.msra.gmra.mrb[16].mxu1 %vm2031_vm2, %v8186_v61 }
 0x378   : > { %3771 = vmatpush1.bf16.msra.mxu1 %v3750_v62  ;;  %3661 = vmatprep.mubr.bf16.mxu1 %v8255_v38 }
 0x379   : > { %3772 = vmatprep.subr.bf16.mxu1 %v3753_v3  ;;  %v4326_v3 = vpop.permute.xlu1 %4325 }
 0x37c   : > { %3773 = vmatpush1.bf16.msra.mxu1 %v3752_v63 }
 0x37d   : > { %3915 = vmatprep.subr.bf16.mxu1 %v3891_v4 }
 0x37f   : > { %7203 = vmatmul.mubr.msk.bf16.gmra.mrb[20].mxu1 %vm2031_vm2, %v8187_v9 }
 0x380   : > { %3671 = vmatprep.mubr.bf16.mxu1 %v8255_v38 }
 0x387   : > { %7204 = vmatmul.mubr.msk.bf16.gmra.mrb[24].mxu1 %vm2031_vm2, %v8188_v5 }
 0x388   : > { %3681 = vmatprep.mubr.bf16.mxu1 %v8255_v38 }
 0x38f   : > { %7205 = vmatmul.mubr.msk.bf16.gmra.mrb[28].mxu1 %vm2031_vm2, %v8189_v31 }
 0x390   : > { %3802 = vmatprep.mubr.bf16.mxu1 %v8255_v38 }
 0x397   : > { %7218 = vmatmul.mubr.msk.bf16.vlgmr.msra.gmra.mrb[16].mxu1 %vm2031_vm2, %v8190_v50 }
 0x398   : > { %3916 = vmatpush1.bf16.msra.mxu1 %v3897_v57  ;;  %3812 = vmatprep.mubr.bf16.mxu1 %v8255_v38 }
 0x399   : > { %3917 = vmatprep.subr.bf16.mxu1 %v3895_v47 }
 0x39c   : > { %3918 = vmatpush1.bf16.msra.mxu1 %v3898_v46 }
 0x39d   : > { %4066 = vmatprep.subr.bf16.mxu1 %v4047_v49 }
 0x39f   : > { %7219 = vmatmul.mubr.msk.bf16.gmra.mrb[20].mxu1 %vm2031_vm2, %v8191_v6 }
 0x3a0   : > { %3822 = vmatprep.mubr.bf16.mxu1 %v8255_v38 }
 0x3a7   : > { %7220 = vmatmul.mubr.msk.bf16.gmra.mrb[24].mxu1 %vm2031_vm2, %v8192_v19  ;;  %v4336_v19 = vpop.permute.xlu1 %4335 }
 0x3a8   : > { %3832 = vmatprep.mubr.bf16.mxu1 %v8255_v38 }
 0x3af   : > { %7221 = vmatmul.mubr.msk.bf16.gmra.mrb[28].mxu1 %vm2031_vm2, %v8193_v20 }
 0x3b0   : > { %3947 = vmatprep.mubr.bf16.mxu1 %v8255_v38 }
 0x3b7   : > { %7234 = vmatmul.mubr.msk.bf16.vlgmr.msra.gmra.mrb[16].mxu1 %vm2031_vm2, %v8194_v2 }
 0x3b8   : > { %4067 = vmatpush1.bf16.msra.mxu1 %v4046_v24  ;;  %3957 = vmatprep.mubr.bf16.mxu1 %v8255_v38 }
 0x3b9   : > { %4068 = vmatprep.subr.bf16.mxu1 %v4049_v26 }
 0x3bc   : > { %4069 = vmatpush1.bf16.msra.mxu1 %v4048_v27 }
 0x3bd   : > { %4211 = vmatprep.subr.bf16.mxu1 %v4187_v14  ;;  %v4341_v14 = vpop.permute.xlu0 %4340 }
 0x3bf   : > { %7235 = vmatmul.mubr.msk.bf16.gmra.mrb[20].mxu1 %vm2031_vm2, %v8195_v32 }
 0x3c0   : > { %3967 = vmatprep.mubr.bf16.mxu1 %v8255_v38 }
 0x3c7   : > { %7236 = vmatmul.mubr.msk.bf16.gmra.mrb[24].mxu1 %vm2031_vm2, %v8196_v51 }
 0x3c8   : > { %3977 = vmatprep.mubr.bf16.mxu1 %v8255_v38 }
 0x3cf   : > { %7237 = vmatmul.mubr.msk.bf16.gmra.mrb[28].mxu1 %vm2031_vm2, %v8197_v10 }
 0x3d0   : > { %4098 = vmatprep.mubr.bf16.mxu1 %v8255_v38 }
 0x3d7   : > { %7250 = vmatmul.mubr.msk.bf16.vlgmr.msra.gmra.mrb[16].mxu1 %vm2031_vm2, %v8198_v29 }
 0x3d8   : > { %4212 = vmatpush1.bf16.msra.mxu1 %v4193_v34  ;;  %4108 = vmatprep.mubr.bf16.mxu1 %v8255_v38  ;;  %v4346_v34 = vpop.permute.xlu1 %4345 }
 0x3d9   : > { %4213 = vmatprep.subr.bf16.mxu1 %v4191_v35 }
 0x3dc   : > { %4214 = vmatpush1.bf16.msra.mxu1 %v4194_v7 }
 0x3df   : > { %7251 = vmatmul.mubr.msk.bf16.gmra.mrb[20].mxu1 %vm2031_vm2, %v8199_v36 }
 0x3e0   : > { %4118 = vmatprep.mubr.bf16.mxu1 %v8255_v38 }
 0x3e7   : > { %7252 = vmatmul.mubr.msk.bf16.gmra.mrb[24].mxu1 %vm2031_vm2, %v8200_v37 }
 0x3e8   : > { %4128 = vmatprep.mubr.bf16.mxu1 %v8255_v38 }
 0x3ef   : > { %7253 = vmatmul.mubr.msk.bf16.gmra.mrb[28].mxu1 %vm2031_vm2, %v8201_v39 }
 0x3f0   : > { %4243 = vmatprep.mubr.bf16.mxu1 %v8255_v38 }
 0x3f7   : > { %7266 = vmatmul.mubr.msk.bf16.vlgmr.msra.gmra.mrb[16].mxu1 %vm2031_vm2, %v8202_v18 }
 0x3f8   : > { %4253 = vmatprep.mubr.bf16.mxu1 %v8255_v38 }
 0x3ff   : > { %7267 = vmatmul.mubr.msk.bf16.gmra.mrb[20].mxu1 %vm2031_vm2, %v8203_v21 }
 0x400   : > { %4263 = vmatprep.mubr.bf16.mxu1 %v8255_v38 }
 0x407   : > { %7268 = vmatmul.mubr.msk.bf16.gmra.mrb[24].mxu1 %vm2031_vm2, %v8204_v40 }
 0x408   : > { %4273 = vmatprep.mubr.bf16.mxu1 %v8255_v38 }
 0x40f   : > { %7269 = vmatmul.mubr.msk.bf16.gmra.mrb[28].mxu1 %vm2031_vm2, %v8205_v41 }
 0x4ca   : > { %v4245_v43 = vpop.f32.mrb[16].mxu1 }
 0x4cb   : > { %v4348_v44 = vadd.f32 %v4311_v42, %v4245_v43  ;;  %v4247_v48 = vpop.f32.mrb[17].mxu1 }
 0x4cc   : > { %v4349_v1 = vadd.f32 %v4311_v42, %v4247_v48  ;;  %v4249_v12 = vpop.f32.mrb[18].mxu1 }
 0x4cd   : > { %v4350_v0 = vadd.f32 %v4316_v52, %v4249_v12  ;;  %v4251_v13 = vpop.f32.mrb[19].mxu1  ;;  %v4364_v54 = vmax.f32 %v4348_v44, 0.0 }
 0x4ce   : > { %v4351_v53 = vadd.f32 %v4316_v52, %v4251_v13  ;;  %v4365_v56 = vmax.f32 %v4349_v1, 0.0 }
 0x4cf   : > { %v4366_v55 = vmax.f32 %v4350_v0, 0.0 }
 0x4d0   : > { %v4367_v58 = vmax.f32 %v4351_v53, 0.0 }
 0x4d1   : > { %v9267_v59 = vpack.c.bf16 %v4366_v55, %v4364_v54  ;;  %v5761_v54 = vld [vmem:[%s10602_s6] sm:$0xff] }
 0x4d2   : > { %v9269_v61 = vpack.c.bf16 %v4367_v58, %v4365_v56  ;;  %v4255_v30 = vpop.f32.mrb[20].mxu1  ;;  %v5762_v56 = vld [vmem:[%s10602_s6 + $0x8] sm:$0xff] }
 0x4d3   : > { %v4352_v62 = vadd.f32 %v4321_v60, %v4255_v30  ;;  %4433 = vrot.lane.b32.xlu0 %v9267_v59, %s8257_s12  ;;  %v4257_v45 = vpop.f32.mrb[21].mxu1  ;;  %v8206_v30 = vld [vmem:[%s10601_s5 + $0x20] sm:$0xff]  }
 0x4d4   : > { %v4353_v63 = vadd.f32 %v4321_v60, %v4257_v45  ;;  %4435 = vrot.lane.b32.xlu1 %v9269_v61, %s8257_s12  ;;  %v4259_v9 = vpop.f32.mrb[22].mxu1  ;;  %v5764_v45 = vld [vmem:[%s10602_s6 + $0x18] sm:$0xff] }
 0x4d5   : > { %v4354_v4 = vadd.f32 %v4326_v3, %v4259_v9  ;;  %v4261_v5 = vpop.f32.mrb[23].mxu1  ;;  %v4368_v15 = vmax.f32 %v4352_v62, 0.0  ;;  %v5763_v62 = vld [vmem:[%s10602_s6 + $0x10] sm:$0xff]  ;;  %v5768_v9 = vld [vmem:[%s10602_s6 + $0x38] sm:$0xff] }
 0x4d6   : > { %v4355_v31 = vadd.f32 %v4326_v3, %v4261_v5  ;;  %v4369_v50 = vmax.f32 %v4353_v63, 0.0  ;;  %v5765_v3 = vld [vmem:[%s10602_s6 + $0x20] sm:$0xff]  ;;  %v8207_v63 = vld [vmem:[%s10601_s5 + $0x28] sm:$0xff]  }
 0x4d7   : > { %v4370_v47 = vmax.f32 %v4354_v4, 0.0  ;;  %v8208_v4 = vld [vmem:[%s10601_s5 + $0x30] sm:$0xff]  }
 0x4d8   : > { %v4371_v8 = vmax.f32 %v4355_v31, 0.0  ;;  %v8209_v31 = vld [vmem:[%s10601_s5 + $0x38] sm:$0xff]  }
 0x4d9   : > { %v9275_v57 = vpack.c.bf16 %v4370_v47, %v4368_v15 }
 0x4da   : > { %v9277_v17 = vpack.c.bf16 %v4371_v8, %v4369_v50  ;;  %v4265_v46 = vpop.f32.mrb[24].mxu1  ;;  %v8210_v50 = vld [vmem:[%s10601_s5] sm:$0xff]  }
 0x4db   : > { %v4356_v6 = vadd.f32 %v4331_v28, %v4265_v46  ;;  %4437 = vrot.lane.b32.xlu0 %v9275_v57, %s8257_s12  ;;  %v4267_v49 = vpop.f32.mrb[25].mxu1 }
 0x4dc   : > { %v4357_v20 = vadd.f32 %v4331_v28, %v4267_v49  ;;  %4439 = vrot.lane.b32.xlu1 %v9277_v17, %s8257_s12  ;;  %v4269_v22 = vpop.f32.mrb[26].mxu1 }
 0x4dd   : > { %v4358_v23 = vadd.f32 %v4336_v19, %v4269_v22  ;;  %v4271_v2 = vpop.f32.mrb[27].mxu1  ;;  %v4372_v24 = vmax.f32 %v4356_v6, 0.0  ;;  %v8211_v6 = vld [vmem:[%s10601_s5 + $0x8] sm:$0xff]  }
 0x4de   : > { %v4359_v11 = vadd.f32 %v4336_v19, %v4271_v2  ;;  %v4373_v26 = vmax.f32 %v4357_v20, 0.0 }
 0x4df   : > { %v4374_v25 = vmax.f32 %v4358_v23, 0.0  ;;  %v8212_v23 = vld [vmem:[%s10601_s5 + $0x10] sm:$0xff]  }
 0x4e0   : > { %v4375_v27 = vmax.f32 %v4359_v11, 0.0  ;;  %v8213_v11 = vld [vmem:[%s10601_s5 + $0x18] sm:$0xff]  }
 0x4e1   : > { %v9283_v32 = vpack.c.bf16 %v4374_v25, %v4372_v24 }
 0x4e2   : > { %v9285_v51 = vpack.c.bf16 %v4375_v27, %v4373_v26  ;;  %v4275_v10 = vpop.f32.mrb[28].mxu1  ;;  %v8214_v26 = vld [vmem:[%s10601_s5 + $0x40] sm:$0xff]  }
 0x4e3   : > { %v4360_v29 = vadd.f32 %v4341_v14, %v4275_v10  ;;  %4441 = vrot.lane.b32.xlu0 %v9283_v32, %s8257_s12  ;;  %v4277_v33 = vpop.f32.mrb[29].mxu1 }
 0x4e4   : > { %v4361_v35 = vadd.f32 %v4341_v14, %v4277_v33  ;;  %4443 = vrot.lane.b32.xlu1 %v9285_v51, %s8257_s12  ;;  %v4279_v16 = vpop.f32.mrb[30].mxu1 }
 0x4e5   : > { %v4362_v7 = vadd.f32 %v4346_v34, %v4279_v16  ;;  %v4281_v36 = vpop.f32.mrb[31].mxu1  ;;  %v4376_v39 = vmax.f32 %v4360_v29, 0.0  ;;  %v8215_v29 = vld [vmem:[%s10601_s5 + $0x48] sm:$0xff]  }
 0x4e6   : > { %v4363_v37 = vadd.f32 %v4346_v34, %v4281_v36  ;;  %v4377_v21 = vmax.f32 %v4361_v35, 0.0 }
 0x4e7   : > { %v4378_v18 = vmax.f32 %v4362_v7, 0.0  ;;  %v8216_v7 = vld [vmem:[%s10601_s5 + $0x50] sm:$0xff]  }
 0x4e8   : > { %v4379_v40 = vmax.f32 %v4363_v37, 0.0  ;;  %v8217_v37 = vld [vmem:[%s10601_s5 + $0x58] sm:$0xff]  }
 0x4e9   : > { %v9291_v41 = vpack.c.bf16 %v4378_v18, %v4376_v39 }
 0x4ea   : > { %v9293_v42 = vpack.c.bf16 %v4379_v40, %v4377_v21  ;;  %v8218_v21 = vld [vmem:[%s10601_s5 + $0x60] sm:$0xff]  }
 0x4eb   : > { %4445 = vrot.lane.b32.xlu0 %v9291_v41, %s8257_s12 }
 0x4ec   : > { %4447 = vrot.lane.b32.xlu1 %v9293_v42, %s8257_s12  ;;  %s8270_s12 = smov 106  }
 0x4ef   : > { %4681 = vrot.lane.b32.xlu0 %v9267_v59, %s8269_s26 }
 0x4f0   : > { %4683 = vrot.lane.b32.xlu1 %v9269_v61, %s8269_s26 }
 0x4f3   : > { %4685 = vrot.lane.b32.xlu0 %v9275_v57, %s8269_s26 }
 0x4f4   : > { %4687 = vrot.lane.b32.xlu1 %v9277_v17, %s8269_s26 }
 0x4f7   : > { %4689 = vrot.lane.b32.xlu0 %v9283_v32, %s8269_s26 }
 0x4f8   : > { %4691 = vrot.lane.b32.xlu1 %v9285_v51, %s8269_s26 }
 0x4fb   : > { %4693 = vrot.lane.b32.xlu0 %v9291_v41, %s8269_s26 }
 0x4fc   : > { %4695 = vrot.lane.b32.xlu1 %v9293_v42, %s8269_s26 }
 0x4ff   : > { %4840 = vrot.lane.b32.xlu0 %v9267_v59, %s8260_s15 }
 0x500   : > { %4842 = vrot.lane.b32.xlu1 %v9269_v61, %s8260_s15 }
 0x503   : > { %4844 = vrot.lane.b32.xlu0 %v9275_v57, %s8260_s15 }
 0x504   : > { %4846 = vrot.lane.b32.xlu1 %v9277_v17, %s8260_s15 }
 0x507   : > { %4848 = vrot.lane.b32.xlu0 %v9283_v32, %s8260_s15 }
 0x508   : > { %4850 = vrot.lane.b32.xlu1 %v9285_v51, %s8260_s15 }
 0x50b   : > { %4852 = vrot.lane.b32.xlu0 %v9291_v41, %s8260_s15 }
 0x50c   : > { %4854 = vrot.lane.b32.xlu1 %v9293_v42, %s8260_s15  ;;  %s8271_s15 = smov 86  }
 0x50f   : > { %4998 = vrot.lane.b32.xlu0 %v9267_v59, %s8262_s20 }
 0x510   : > { %5000 = vrot.lane.b32.xlu1 %v9269_v61, %s8262_s20 }
 0x513   : > { %5002 = vrot.lane.b32.xlu0 %v9275_v57, %s8262_s20 }
 0x514   : > { %5004 = vrot.lane.b32.xlu1 %v9277_v17, %s8262_s20 }
 0x517   : > { %5006 = vrot.lane.b32.xlu0 %v9283_v32, %s8262_s20 }
 0x518   : > { %5008 = vrot.lane.b32.xlu1 %v9285_v51, %s8262_s20 }
 0x51b   : > { %5010 = vrot.lane.b32.xlu0 %v9291_v41, %s8262_s20 }
 0x51c   : > { %5012 = vrot.lane.b32.xlu1 %v9293_v42, %s8262_s20 }
 0x51f   : > { %5156 = vrot.lane.b32.xlu0 %v9267_v59, %s8270_s12 }
 0x520   : > { %5158 = vrot.lane.b32.xlu1 %v9269_v61, %s8270_s12 }
 0x523   : > { %5160 = vrot.lane.b32.xlu0 %v9275_v57, %s8270_s12 }
 0x524   : > { %5162 = vrot.lane.b32.xlu1 %v9277_v17, %s8270_s12 }
 0x527   : > { %5164 = vrot.lane.b32.xlu0 %v9283_v32, %s8270_s12 }
 0x528   : > { %5166 = vrot.lane.b32.xlu1 %v9285_v51, %s8270_s12 }
 0x52b   : > { %5168 = vrot.lane.b32.xlu0 %v9291_v41, %s8270_s12 }
 0x52c   : > { %5170 = vrot.lane.b32.xlu1 %v9293_v42, %s8270_s12 }
 0x52f   : > { %5315 = vrot.lane.b32.xlu0 %v9267_v59, %s8266_s24 }
 0x530   : > { %5317 = vrot.lane.b32.xlu1 %v9269_v61, %s8266_s24 }
 0x533   : > { %5319 = vrot.lane.b32.xlu0 %v9275_v57, %s8266_s24 }
 0x534   : > { %5321 = vrot.lane.b32.xlu1 %v9277_v17, %s8266_s24 }
 0x537   : > { %5323 = vrot.lane.b32.xlu0 %v9283_v32, %s8266_s24 }
 0x538   : > { %5325 = vrot.lane.b32.xlu1 %v9285_v51, %s8266_s24 }
 0x53b   : > { %5327 = vrot.lane.b32.xlu0 %v9291_v41, %s8266_s24 }
 0x53c   : > { %5329 = vrot.lane.b32.xlu1 %v9293_v42, %s8266_s24 }
 0x53f   : > { %5473 = vrot.lane.b32.xlu0 %v9267_v59, %s8268_s11 }
 0x540   : > { %5475 = vrot.lane.b32.xlu1 %v9269_v61, %s8268_s11 }
 0x543   : > { %5477 = vrot.lane.b32.xlu0 %v9275_v57, %s8268_s11 }
 0x544   : > { %5479 = vrot.lane.b32.xlu1 %v9277_v17, %s8268_s11 }
 0x545   : > { %v4434_v43 = vpop.permute.xlu0 %4433 }
 0x546   : > { %v4436_v44 = vpop.permute.xlu1 %4435 }
 0x547   : > { %4474 = vmatprep.subr.bf16.mxu0 %v4436_v44  ;;  %5481 = vrot.lane.b32.xlu0 %v9283_v32, %s8268_s11  ;;  %v4449_v48 = vsel %vm2261_vm3, %v4434_v43, %v4436_v44 }
 0x548   : > { %4475 = vmatpush1.bf16.msra.mxu0 %v4449_v48  ;;  %5483 = vrot.lane.b32.xlu1 %v9285_v51, %s8268_s11  ;;  %v8219_v48 = vld [vmem:[%s10601_s5 + $0x68] sm:$0xff]  }
 0x54b   : > { %5485 = vrot.lane.b32.xlu0 %v9291_v41, %s8268_s11 }
 0x54c   : > { %5487 = vrot.lane.b32.xlu1 %v9293_v42, %s8268_s11 }
 0x54d   : > { %v4438_v52 = vpop.permute.xlu0 %4437 }
 0x54e   : > { %v4440_v1 = vpop.permute.xlu1 %4439 }
 0x54f   : > { %4476 = vmatprep.subr.bf16.mxu0 %v4440_v1  ;;  %5631 = vrot.lane.b32.xlu0 %v9267_v59, %s8271_s15  ;;  %v4450_v12 = vsel %vm2261_vm3, %v4438_v52, %v4440_v1 }
 0x550   : > { %4477 = vmatpush1.bf16.msra.mxu0 %v4450_v12  ;;  %5633 = vrot.lane.b32.xlu1 %v9269_v61, %s8271_s15 }
 0x553   : > { %5635 = vrot.lane.b32.xlu0 %v9275_v57, %s8271_s15 }
 0x554   : > { %5637 = vrot.lane.b32.xlu1 %v9277_v17, %s8271_s15 }
 0x555   : > { %v4442_v0 = vpop.permute.xlu0 %4441 }
 0x556   : > { %v4444_v13 = vpop.permute.xlu1 %4443 }
 0x557   : > { %4478 = vmatprep.subr.bf16.mxu0 %v4444_v13  ;;  %5639 = vrot.lane.b32.xlu0 %v9283_v32, %s8271_s15  ;;  %v4451_v53 = vsel %vm2261_vm3, %v4442_v0, %v4444_v13  ;;  %v8220_v13 = vld [vmem:[%s10601_s5 + $0x70] sm:$0xff]  }
 0x558   : > { %4479 = vmatpush1.bf16.msra.mxu0 %v4451_v53  ;;  %5641 = vrot.lane.b32.xlu1 %v9285_v51, %s8271_s15 }
 0x55b   : > { %5643 = vrot.lane.b32.xlu0 %v9291_v41, %s8271_s15 }
 0x55c   : > { %5645 = vrot.lane.b32.xlu1 %v9293_v42, %s8271_s15 }
 0x55d   : > { %v4446_v55 = vpop.permute.xlu0 %4445 }
 0x55e   : > { %v4448_v58 = vpop.permute.xlu1 %4447 }
 0x55f   : > { %5771 = vperm.xlu0 %7878, %v5761_v54   ;;  %4480 = vmatprep.subr.bf16.mxu0 %v4448_v58  ;;  %v4452_v60 = vsel %vm2261_vm3, %v4446_v55, %v4448_v58  ;;  %v8221_v54 = vld [vmem:[%s10601_s5 + $0x78] sm:$0xff]   ;;  %v8222_v58 = vld [vmem:[%s10601_s5 + $0x80] sm:$0xff]   ;;  %vm6435_vm3 = vcmask 195712  }
 0x560   : > { %5776 = vperm.xlu1 %7879, %v5762_v56   ;;  %4481 = vmatpush1.bf16.msra.mxu0 %v4452_v60 }
 0x561   : > { %4579 = vmatprep.subr.bf16.mxu0 %v9269_v61  ;;  %v5766_v61 = vld [vmem:[%s10602_s6 + $0x28] sm:$0xff]  ;;  %v4682_v15 = vpop.permute.xlu0 %4681 }
 0x562   : > { %v4684_v5 = vpop.permute.xlu1 %4683 }
 0x563   : > { %5781 = vperm.xlu0 %7878, %v5763_v62   ;;  %7282 = vmatmul.mubr.msk.bf16.vlgmr.msra.gmra.mrb[32].mxu0 %vm4461_vm14, %v8206_v30 }
 0x564   : > { %5786 = vperm.xlu1 %7879, %v5764_v45   ;;  %4580 = vmatpush1.bf16.msra.mxu0 %v9267_v59  ;;  %v5767_v59 = vld [vmem:[%s10602_s6 + $0x30] sm:$0xff] }
 0x565   : > { %4581 = vmatprep.subr.bf16.mxu0 %v9277_v17  ;;  %4516 = vmatprep.mubr.bf16.mxu0 %v8255_v38  ;;  %v4686_v8 = vpop.permute.xlu0 %4685 }
 0x566   : > { %v4688_v47 = vpop.permute.xlu1 %4687 }
 0x567   : > { %5791 = vperm.xlu0 %7878, %v5765_v3   ;;  %v4699_v46 = vsel %vm4697_vm15, %v4686_v8, %v4688_v47  ;;  %v8226_v8 = vld [vmem:[%s10601_s5 + $0xa0] sm:$0xff]  }
 0x568   : > { %5796 = vperm.xlu1 %7879, %v5766_v61   ;;  %4582 = vmatpush1.bf16.msra.mxu0 %v9275_v57  ;;  %v4698_v57 = vsel %vm4697_vm15, %v4682_v15, %v4684_v5  ;;  %v8223_v61 = vld [vmem:[%s10601_s5 + $0x88] sm:$0xff]   ;;  %v8225_v15 = vld [vmem:[%s10601_s5 + $0x98] sm:$0xff]  }
 0x569   : > { %4583 = vmatprep.subr.bf16.mxu0 %v9285_v51  ;;  %v4690_v17 = vpop.permute.xlu0 %4689 }
 0x56a   : > { %v4692_v28 = vpop.permute.xlu1 %4691 }
 0x56b   : > { %5801 = vperm.xlu0 %7878, %v5767_v59   ;;  %7283 = vmatmul.mubr.msk.bf16.gmra.mrb[36].mxu0 %vm4461_vm14, %v8207_v63  ;;  %v4700_v19 = vsel %vm4697_vm15, %v4690_v17, %v4692_v28 }
 0x56c   : > { %5806 = vperm.xlu1 %7879, %v5768_v9   ;;  %4584 = vmatpush1.bf16.msra.mxu0 %v9283_v32 }
 0x56d   : > { %4585 = vmatprep.subr.bf16.mxu0 %v9293_v42  ;;  %4526 = vmatprep.mubr.bf16.mxu0 %v8255_v38  ;;  %v4694_v20 = vpop.permute.xlu0 %4693 }
 0x56e   : > { %v4696_v49 = vpop.permute.xlu1 %4695 }
 0x56f   : > { %v4701_v22 = vsel %vm4697_vm15, %v4694_v20, %v4696_v49  ;;  %vm6755_vm15 = vcmask 1046534  }
 0x570   : > { %4586 = vmatpush1.bf16.msra.mxu0 %v9291_v41 }
 0x571   : > { %4722 = vmatprep.subr.bf16.mxu0 %v4684_v5  ;;  %v4841_v24 = vpop.permute.xlu0 %4840  ;;  %v8224_v5 = vld [vmem:[%s10601_s5 + $0x90] sm:$0xff]  }
 0x572   : > { %v4843_v2 = vpop.permute.xlu1 %4842 }
 0x573   : > { %7284 = vmatmul.mubr.msk.bf16.gmra.mrb[40].mxu0 %vm4461_vm14, %v8208_v4  ;;  %v4856_v32 = vsel %vm2714_vm6, %v4841_v24, %v4843_v2  ;;  %v8229_v24 = vld [vmem:[%s10601_s5 + $0xb8] sm:$0xff]  }
 0x574   : > { %4536 = vmatprep.mubr.bf16.mxu0 %v8255_v38 }
 0x575   : > { %v4845_v27 = vpop.permute.xlu0 %4844 }
 0x576   : > { %v4847_v25 = vpop.permute.xlu1 %4846 }
 0x577   : > { %v4857_v10 = vsel %vm2714_vm6, %v4845_v27, %v4847_v25  ;;  %v8230_v27 = vld [vmem:[%s10601_s5 + $0xc0] sm:$0xff]  }
 0x579   : > { %v4849_v51 = vpop.permute.xlu0 %4848 }
 0x57a   : > { %v4851_v14 = vpop.permute.xlu1 %4850 }
 0x57b   : > { %7285 = vmatmul.mubr.msk.bf16.gmra.mrb[44].mxu0 %vm4461_vm14, %v8209_v31  ;;  %v4858_v34 = vsel %vm2714_vm6, %v4849_v51, %v4851_v14 }
 0x57c   : > { %4611 = vmatprep.mubr.bf16.mxu0 %v8255_v38 }
 0x57d   : > { %v4853_v35 = vpop.permute.xlu0 %4852 }
 0x57e   : > { %v4855_v33 = vpop.permute.xlu1 %4854 }
 0x57f   : > { %v4859_v16 = vsel %vm2714_vm6, %v4853_v35, %v4855_v33  ;;  %vm6456_vm6 = vcmask 392512  }
 0x581   : > { %v4999_v39 = vpop.permute.xlu0 %4998 }
 0x582   : > { %v5001_v36 = vpop.permute.xlu1 %5000 }
 0x583   : > { %7290 = vmatmul.mubr.msk.bf16.vlgmr.msra.gmra.mrb[32].mxu0 %vm4461_vm14, %v8210_v50  ;;  %v5014_v41 = vsel %vm3010_vm8, %v4999_v39, %v5001_v36  ;;  %v8233_v39 = vld [vmem:[%s10601_s5 + $0xd8] sm:$0xff]  }
 0x584   : > { %4723 = vmatpush1.bf16.msra.mxu0 %v4698_v57  ;;  %4621 = vmatprep.mubr.bf16.mxu0 %v8255_v38 }
 0x585   : > { %4724 = vmatprep.subr.bf16.mxu0 %v4688_v47  ;;  %v5003_v40 = vpop.permute.xlu0 %5002 }
 0x586   : > { %v5005_v18 = vpop.permute.xlu1 %5004 }
 0x587   : > { %v5015_v44 = vsel %vm3010_vm8, %v5003_v40, %v5005_v18 }
 0x588   : > { %4725 = vmatpush1.bf16.msra.mxu0 %v4699_v46 }
 0x589   : > { %4726 = vmatprep.subr.bf16.mxu0 %v4692_v28  ;;  %v5007_v43 = vpop.permute.xlu0 %5006 }
 0x58a   : > { %v5009_v42 = vpop.permute.xlu1 %5008 }
 0x58b   : > { %7291 = vmatmul.mubr.msk.bf16.gmra.mrb[36].mxu0 %vm4461_vm14, %v8211_v6  ;;  %v5016_v1 = vsel %vm3010_vm8, %v5007_v43, %v5009_v42 }
 0x58c   : > { %4727 = vmatpush1.bf16.msra.mxu0 %v4700_v19  ;;  %4631 = vmatprep.mubr.bf16.mxu0 %v8255_v38 }
 0x58d   : > { %4728 = vmatprep.subr.bf16.mxu0 %v4696_v49  ;;  %v5011_v12 = vpop.permute.xlu0 %5010  ;;  %v8227_v49 = vld [vmem:[%s10601_s5 + $0xa8] sm:$0xff]  }
 0x58e   : > { %v5013_v52 = vpop.permute.xlu1 %5012 }
 0x58f   : > { %v5017_v0 = vsel %vm3010_vm8, %v5011_v12, %v5013_v52  ;;  %vm6470_vm8 = vcmask 523712  }
 0x590   : > { %4729 = vmatpush1.bf16.msra.mxu0 %v4701_v22 }
 0x591   : > { %4880 = vmatprep.subr.bf16.mxu0 %v4843_v2  ;;  %v5157_v55 = vpop.permute.xlu0 %5156  ;;  %v8228_v2 = vld [vmem:[%s10601_s5 + $0xb0] sm:$0xff]  }
 0x592   : > { %v5159_v53 = vpop.permute.xlu1 %5158 }
 0x593   : > { %7292 = vmatmul.mubr.msk.bf16.gmra.mrb[40].mxu0 %vm4461_vm14, %v8212_v23  ;;  %v5173_v30 = vsel %vm5172_vm0, %v5157_v55, %v5159_v53  ;;  %v8238_v55 = vld [vmem:[%s10601_s5 + $0x100] sm:$0xff]  }
 0x594   : > { %4641 = vmatprep.mubr.bf16.mxu0 %v8255_v38 }
 0x595   : > { %v5161_v60 = vpop.permute.xlu0 %5160 }
 0x596   : > { %v5163_v56 = vpop.permute.xlu1 %5162 }
 0x597   : > { %v5174_v3 = vsel %vm5172_vm0, %v5161_v60, %v5163_v56  ;;  %v8241_v60 = vld [vmem:[%s10601_s5 + $0x118] sm:$0xff]  }
 0x599   : > { %v5165_v45 = vpop.permute.xlu0 %5164 }
 0x59a   : > { %v5167_v62 = vpop.permute.xlu1 %5166 }
 0x59b   : > { %7293 = vmatmul.mubr.msk.bf16.gmra.mrb[44].mxu0 %vm4461_vm14, %v8213_v11  ;;  %v5175_v59 = vsel %vm5172_vm0, %v5165_v45, %v5167_v62 }
 0x59c   : > { %4754 = vmatprep.mubr.bf16.mxu0 %v8255_v38 }
 0x59d   : > { %v5169_v9 = vpop.permute.xlu0 %5168 }
 0x59e   : > { %v5171_v63 = vpop.permute.xlu1 %5170 }
 0x59f   : > { %v5176_v4 = vsel %vm5172_vm0, %v5169_v9, %v5171_v63  ;;  %v5873_v9 = vld [vmem:[%s10603_s7 + $0x100] sm:$0xff]  ;;  %vm6757_vm0 = vcmask 1047559  }
 0x5a1   : > { %v5316_v47 = vpop.permute.xlu0 %5315 }
 0x5a2   : > { %v5318_v31 = vpop.permute.xlu1 %5317 }
 0x5a3   : > { %7306 = vmatmul.mubr.msk.bf16.vlgmr.msra.gmra.mrb[32].mxu0 %vm4461_vm14, %v8214_v26  ;;  %v5331_v28 = vsel %vm3896_vm11, %v5316_v47, %v5318_v31  ;;  %v5842_v47 = vld [vmem:[%s10603_s7 + $0x8] sm:$0xff] }
 0x5a4   : > { %4881 = vmatpush1.bf16.msra.mxu0 %v4856_v32  ;;  %4764 = vmatprep.mubr.bf16.mxu0 %v8255_v38 }
 0x5a5   : > { %4882 = vmatprep.subr.bf16.mxu0 %v4847_v25  ;;  %v5320_v57 = vpop.permute.xlu0 %5319 }
 0x5a6   : > { %v5322_v50 = vpop.permute.xlu1 %5321 }
 0x5a7   : > { %v5332_v6 = vsel %vm3896_vm11, %v5320_v57, %v5322_v50  ;;  %v5921_v57 = vld [vmem:[%s10603_s7 + $0x280] sm:$0xff] }
 0x5a8   : > { %4883 = vmatpush1.bf16.msra.mxu0 %v4857_v10 }
 0x5a9   : > { %4884 = vmatprep.subr.bf16.mxu0 %v4851_v14  ;;  %v5324_v46 = vpop.permute.xlu0 %5323 }
 0x5aa   : > { %v5326_v17 = vpop.permute.xlu1 %5325 }
 0x5ab   : > { %7307 = vmatmul.mubr.msk.bf16.gmra.mrb[36].mxu0 %vm4461_vm14, %v8215_v29  ;;  %v5333_v20 = vsel %vm3896_vm11, %v5324_v46, %v5326_v17 }
 0x5ac   : > { %4885 = vmatpush1.bf16.msra.mxu0 %v4858_v34  ;;  %4774 = vmatprep.mubr.bf16.mxu0 %v8255_v38 }
 0x5ad   : > { %4886 = vmatprep.subr.bf16.mxu0 %v4855_v33  ;;  %v5328_v22 = vpop.permute.xlu0 %5327  ;;  %v8231_v33 = vld [vmem:[%s10601_s5 + $0xc8] sm:$0xff]  }
 0x5ae   : > { %v5330_v19 = vpop.permute.xlu1 %5329 }
 0x5af   : > { %v5334_v23 = vsel %vm3896_vm11, %v5328_v22, %v5330_v19  ;;  %vm6749_vm11 = vcmask 1043459  }
 0x5b0   : > { %4887 = vmatpush1.bf16.msra.mxu0 %v4859_v16 }
 0x5b1   : > { %5038 = vmatprep.subr.bf16.mxu0 %v5001_v36  ;;  %v5474_v25 = vpop.permute.xlu0 %5473  ;;  %v8232_v36 = vld [vmem:[%s10601_s5 + $0xd0] sm:$0xff]  }
 0x5b2   : > { %v5476_v11 = vpop.permute.xlu1 %5475 }
 0x5b3   : > { %7308 = vmatmul.mubr.msk.bf16.gmra.mrb[40].mxu0 %vm4461_vm14, %v8216_v7  ;;  %v5489_v14 = vsel %vm4192_vm13, %v5474_v25, %v5476_v11 }
 0x5b4   : > { %4784 = vmatprep.mubr.bf16.mxu0 %v8255_v38 }
 0x5b5   : > { %v5478_v32 = vpop.permute.xlu0 %5477 }
 0x5b6   : > { %v5480_v26 = vpop.permute.xlu1 %5479 }
 0x5b7   : > { %v5490_v29 = vsel %vm4192_vm13, %v5478_v32, %v5480_v26 }
 0x5b9   : > { %v5482_v10 = vpop.permute.xlu0 %5481 }
 0x5ba   : > { %v5484_v51 = vpop.permute.xlu1 %5483 }
 0x5bb   : > { %7309 = vmatmul.mubr.msk.bf16.gmra.mrb[44].mxu0 %vm4461_vm14, %v8217_v37  ;;  %v5491_v35 = vsel %vm4192_vm13, %v5482_v10, %v5484_v51 }
 0x5bc   : > { %4912 = vmatprep.mubr.bf16.mxu0 %v8255_v38 }
 0x5bd   : > { %v5486_v16 = vpop.permute.xlu0 %5485 }
 0x5be   : > { %v5488_v34 = vpop.permute.xlu1 %5487 }
 0x5bf   : > { %v5492_v7 = vsel %vm4192_vm13, %v5486_v16, %v5488_v34  ;;  %vm6753_vm13 = vcmask 1045509  }
 0x5c2   : > { %v5634_v37 = vpop.permute.xlu1 %5633 }
 0x5c3   : > { %7322 = vmatmul.mubr.msk.bf16.vlgmr.msra.gmra.mrb[32].mxu0 %vm4461_vm14, %v8218_v21  ;;  %v8234_v21 = vld [vmem:[%s10601_s5 + $0xe0] sm:$0xff]  }
 0x5c4   : > { %5039 = vmatpush1.bf16.msra.mxu0 %v5014_v41  ;;  %4922 = vmatprep.mubr.bf16.mxu0 %v8255_v38 }
 0x5c5   : > { %5040 = vmatprep.subr.bf16.mxu0 %v5005_v18  ;;  %v5632_v18 = vpop.permute.xlu0 %5631 }
 0x5c6   : > { %v5638_v41 = vpop.permute.xlu1 %5637 }
 0x5c8   : > { %5041 = vmatpush1.bf16.msra.mxu0 %v5015_v44 }
 0x5c9   : > { %5042 = vmatprep.subr.bf16.mxu0 %v5009_v42  ;;  %v5636_v40 = vpop.permute.xlu0 %5635  ;;  %v5648_v42 = vsel %vm5647_vm1, %v5632_v18, %v5634_v37 }
 0x5ca   : > { %v5642_v44 = vpop.permute.xlu1 %5641 }
 0x5cb   : > { %7323 = vmatmul.mubr.msk.bf16.gmra.mrb[36].mxu0 %vm4461_vm14, %v8219_v48  ;;  %v5649_v48 = vsel %vm5647_vm1, %v5636_v40, %v5638_v41 }
 0x5cc   : > { %5043 = vmatpush1.bf16.msra.mxu0 %v5016_v1  ;;  %4932 = vmatprep.mubr.bf16.mxu0 %v8255_v38 }
 0x5cd   : > { %5044 = vmatprep.subr.bf16.mxu0 %v5013_v52  ;;  %v5640_v43 = vpop.permute.xlu0 %5639  ;;  %v8235_v52 = vld [vmem:[%s10601_s5 + $0xe8] sm:$0xff]  }
 0x5ce   : > { %v5650_v1 = vsel %vm5647_vm1, %v5640_v43, %v5642_v44  ;;  %v5906_v43 = vld [vmem:[%s10603_s7 + $0x208] sm:$0xff] }
 0x5d0   : > { %5045 = vmatpush1.bf16.msra.mxu0 %v5017_v0  ;;  %v5646_v0 = vpop.permute.xlu1 %5645 }
 0x5d1   : > { %5197 = vmatprep.subr.bf16.mxu0 %v5159_v53  ;;  %v5644_v12 = vpop.permute.xlu0 %5643  ;;  %v8236_v53 = vld [vmem:[%s10601_s5 + $0xf0] sm:$0xff]  }
 0x5d3   : > { %7324 = vmatmul.mubr.msk.bf16.gmra.mrb[40].mxu0 %vm4461_vm14, %v8220_v13  ;;  %v5651_v13 = vsel %vm5647_vm1, %v5644_v12, %v5646_v0 }
 0x5d4   : > { %4942 = vmatprep.mubr.bf16.mxu0 %v8255_v38 }
 0x5db   : > { %7325 = vmatmul.mubr.msk.bf16.gmra.mrb[44].mxu0 %vm4461_vm14, %v8221_v54  ;;  %v8237_v54 = vld [vmem:[%s10601_s5 + $0xf8] sm:$0xff]  }
 0x5dc   : > { %5070 = vmatprep.mubr.bf16.mxu0 %v8255_v38 }
 0x5e3   : > { %7338 = vmatmul.mubr.msk.bf16.vlgmr.msra.gmra.mrb[32].mxu0 %vm4461_vm14, %v8222_v58  ;;  %v8240_v58 = vld [vmem:[%s10601_s5 + $0x110] sm:$0xff]  }
 0x5e4   : > { %5198 = vmatpush1.bf16.msra.mxu0 %v5173_v30  ;;  %5080 = vmatprep.mubr.bf16.mxu0 %v8255_v38  ;;  %v5772_v30 = vpop.permute.xlu0 %5771 }
 0x5e5   : > { %5199 = vmatprep.subr.bf16.mxu0 %v5163_v56  ;;  %v8239_v56 = vld [vmem:[%s10601_s5 + $0x108] sm:$0xff]  }
 0x5e8   : > { %5200 = vmatpush1.bf16.msra.mxu0 %v5174_v3 }
 0x5e9   : > { %5201 = vmatprep.subr.bf16.mxu0 %v5167_v62 }
 0x5eb   : > { %7339 = vmatmul.mubr.msk.bf16.gmra.mrb[36].mxu0 %vm4461_vm14, %v8223_v61  ;;  %v5777_v61 = vpop.permute.xlu1 %5776 }
 0x5ec   : > { %5202 = vmatpush1.bf16.msra.mxu0 %v5175_v59  ;;  %5090 = vmatprep.mubr.bf16.mxu0 %v8255_v38 }
 0x5ed   : > { %5203 = vmatprep.subr.bf16.mxu0 %v5171_v63 }
 0x5f0   : > { %5204 = vmatpush1.bf16.msra.mxu0 %v5176_v4 }
 0x5f1   : > { %5355 = vmatprep.subr.bf16.mxu0 %v5318_v31 }
 0x5f3   : > { %7340 = vmatmul.mubr.msk.bf16.gmra.mrb[40].mxu0 %vm4461_vm14, %v8224_v5 }
 0x5f4   : > { %5100 = vmatprep.mubr.bf16.mxu0 %v8255_v38 }
 0x5fb   : > { %7341 = vmatmul.mubr.msk.bf16.gmra.mrb[44].mxu0 %vm4461_vm14, %v8225_v15  ;;  %v5874_v15 = vld [vmem:[%s10603_s7 + $0x108] sm:$0xff] }
 0x5fc   : > { %5229 = vmatprep.mubr.bf16.mxu0 %v8255_v38 }
 0x603   : > { %7354 = vmatmul.mubr.msk.bf16.vlgmr.msra.gmra.mrb[32].mxu0 %vm4461_vm14, %v8226_v8 }
 0x604   : > { %5356 = vmatpush1.bf16.msra.mxu0 %v5331_v28  ;;  %5239 = vmatprep.mubr.bf16.mxu0 %v8255_v38  ;;  %v5858_v28 = vld [vmem:[%s10603_s7 + $0x88] sm:$0xff] }
 0x605   : > { %5357 = vmatprep.subr.bf16.mxu0 %v5322_v50  ;;  %v5922_v50 = vld [vmem:[%s10603_s7 + $0x288] sm:$0xff] }
 0x608   : > { %5358 = vmatpush1.bf16.msra.mxu0 %v5332_v6 }
 0x609   : > { %5359 = vmatprep.subr.bf16.mxu0 %v5326_v17  ;;  %v5938_v17 = vld [vmem:[%s10603_s7 + $0x308] sm:$0xff] }
 0x60b   : > { %7355 = vmatmul.mubr.msk.bf16.gmra.mrb[36].mxu0 %vm4461_vm14, %v8227_v49  ;;  %v5857_v49 = vld [vmem:[%s10603_s7 + $0x80] sm:$0xff] }
 0x60c   : > { %5360 = vmatpush1.bf16.msra.mxu0 %v5333_v20  ;;  %5249 = vmatprep.mubr.bf16.mxu0 %v8255_v38 }
 0x60d   : > { %5361 = vmatprep.subr.bf16.mxu0 %v5330_v19 }
 0x610   : > { %5362 = vmatpush1.bf16.msra.mxu0 %v5334_v23 }
 0x611   : > { %5513 = vmatprep.subr.bf16.mxu0 %v5476_v11 }
 0x613   : > { %7356 = vmatmul.mubr.msk.bf16.gmra.mrb[40].mxu0 %vm4461_vm14, %v8228_v2  ;;  %v5937_v2 = vld [vmem:[%s10603_s7 + $0x300] sm:$0xff] }
 0x614   : > { %5259 = vmatprep.mubr.bf16.mxu0 %v8255_v38 }
 0x61b   : > { %7357 = vmatmul.mubr.msk.bf16.gmra.mrb[44].mxu0 %vm4461_vm14, %v8229_v24 }
 0x61c   : > { %5387 = vmatprep.mubr.bf16.mxu0 %v8255_v38 }
 0x623   : > { %7370 = vmatmul.mubr.msk.bf16.vlgmr.msra.gmra.mrb[32].mxu0 %vm4461_vm14, %v8230_v27  ;;  %v5890_v27 = vld [vmem:[%s10603_s7 + $0x188] sm:$0xff] }
 0x624   : > { %5514 = vmatpush1.bf16.msra.mxu0 %v5489_v14  ;;  %5397 = vmatprep.mubr.bf16.mxu0 %v8255_v38 }
 0x625   : > { %5515 = vmatprep.subr.bf16.mxu0 %v5480_v26 }
 0x628   : > { %5516 = vmatpush1.bf16.msra.mxu0 %v5490_v29 }
 0x629   : > { %5517 = vmatprep.subr.bf16.mxu0 %v5484_v51 }
 0x62b   : > { %7371 = vmatmul.mubr.msk.bf16.gmra.mrb[36].mxu0 %vm4461_vm14, %v8231_v33  ;;  %v5889_v33 = vld [vmem:[%s10603_s7 + $0x180] sm:$0xff] }
 0x62c   : > { %5518 = vmatpush1.bf16.msra.mxu0 %v5491_v35  ;;  %5407 = vmatprep.mubr.bf16.mxu0 %v8255_v38 }
 0x62d   : > { %5519 = vmatprep.subr.bf16.mxu0 %v5488_v34 }
 0x630   : > { %5520 = vmatpush1.bf16.msra.mxu0 %v5492_v7 }
 0x631   : > { %5672 = vmatprep.subr.bf16.mxu0 %v5634_v37  ;;  %v5905_v37 = vld [vmem:[%s10603_s7 + $0x200] sm:$0xff] }
 0x633   : > { %7372 = vmatmul.mubr.msk.bf16.gmra.mrb[40].mxu0 %vm4461_vm14, %v8232_v36 }
 0x634   : > { %5417 = vmatprep.mubr.bf16.mxu0 %v8255_v38 }
 0x63b   : > { %7373 = vmatmul.mubr.msk.bf16.gmra.mrb[44].mxu0 %vm4461_vm14, %v8233_v39  ;;  %v5782_v39 = vpop.permute.xlu0 %5781 }
 0x63c   : > { %5545 = vmatprep.mubr.bf16.mxu0 %v8255_v38 }
 0x643   : > { %7386 = vmatmul.mubr.msk.bf16.vlgmr.msra.gmra.mrb[32].mxu0 %vm4461_vm14, %v8234_v21 }
 0x644   : > { %5673 = vmatpush1.bf16.msra.mxu0 %v5648_v42  ;;  %5555 = vmatprep.mubr.bf16.mxu0 %v8255_v38 }
 0x645   : > { %5674 = vmatprep.subr.bf16.mxu0 %v5638_v41 }
 0x648   : > { %5675 = vmatpush1.bf16.msra.mxu0 %v5649_v48  ;;  %v5787_v48 = vpop.permute.xlu1 %5786 }
 0x649   : > { %5676 = vmatprep.subr.bf16.mxu0 %v5642_v44  ;;  %v5953_v44 = vld [vmem:[%s10603_s7 + $0x380] sm:$0xff] }
 0x64b   : > { %7387 = vmatmul.mubr.msk.bf16.gmra.mrb[36].mxu0 %vm4461_vm14, %v8235_v52 }
 0x64c   : > { %5677 = vmatpush1.bf16.msra.mxu0 %v5650_v1  ;;  %5565 = vmatprep.mubr.bf16.mxu0 %v8255_v38 }
 0x64d   : > { %5678 = vmatprep.subr.bf16.mxu0 %v5646_v0 }
 0x650   : > { %5679 = vmatpush1.bf16.msra.mxu0 %v5651_v13  ;;  %v5843_v13 = vld [vmem:[%s10603_s7 + $0x10] sm:$0xff] }
 0x653   : > { %7388 = vmatmul.mubr.msk.bf16.gmra.mrb[40].mxu0 %vm4461_vm14, %v8236_v53  ;;  %v5844_v53 = vld [vmem:[%s10603_s7 + $0x18] sm:$0xff] }
 0x654   : > { %5575 = vmatprep.mubr.bf16.mxu0 %v8255_v38 }
 0x65b   : > { %7389 = vmatmul.mubr.msk.bf16.gmra.mrb[44].mxu0 %vm4461_vm14, %v8237_v54  ;;  %v5954_v54 = vld [vmem:[%s10603_s7 + $0x388] sm:$0xff] }
 0x65c   : > { %5704 = vmatprep.mubr.bf16.mxu0 %v8255_v38 }
 0x663   : > { %7402 = vmatmul.mubr.msk.bf16.vlgmr.msra.gmra.mrb[32].mxu0 %vm4461_vm14, %v8238_v55 }
 0x664   : > { %5714 = vmatprep.mubr.bf16.mxu0 %v8255_v38 }
 0x66b   : > { %7403 = vmatmul.mubr.msk.bf16.gmra.mrb[36].mxu0 %vm4461_vm14, %v8239_v56 }
 0x66c   : > { %5724 = vmatprep.mubr.bf16.mxu0 %v8255_v38 }
 0x673   : > { %7404 = vmatmul.mubr.msk.bf16.gmra.mrb[40].mxu0 %vm4461_vm14, %v8240_v58 }
 0x674   : > { %5734 = vmatprep.mubr.bf16.mxu0 %v8255_v38  ;;  %v5841_v38 = vld [vmem:[%s10603_s7] sm:$0xff] }
 0x67b   : > { %7405 = vmatmul.mubr.msk.bf16.gmra.mrb[44].mxu0 %vm4461_vm14, %v8241_v60 }
 0x736   : > { %v5706_v62 = vpop.f32.mrb[32].mxu0 }
 0x737   : > { %v5809_v45 = vadd.f32 %v5772_v30, %v5706_v62  ;;  %v5708_v3 = vpop.f32.mrb[33].mxu0  ;;  %v5892_v62 = vld [vmem:[%s10603_s7 + $0x198] sm:$0xff] }
 0x738   : > { %v5810_v63 = vadd.f32 %v5772_v30, %v5708_v3  ;;  %v5710_v59 = vpop.f32.mrb[34].mxu0  ;;  %v5891_v30 = vld [vmem:[%s10603_s7 + $0x190] sm:$0xff] }
 0x739   : > { %v9636_v4 = vmax.f32 %v5809_v45, 0.0  ;;  %v5811_v5 = vadd.f32 %v5777_v61, %v5710_v59  ;;  %v5712_v31 = vpop.f32.mrb[35].mxu0  ;;  %v5859_v45 = vld [vmem:[%s10603_s7 + $0x90] sm:$0xff] }
 0x73a   : > { %v5826_v8 = vmax.f32 %v5810_v63, 0.0  ;;  %v5812_v6 = vadd.f32 %v5777_v61, %v5712_v31 }
 0x73b   : > { %v9656_v46 = vmax.f32 %v5811_v5, 0.0  ;;  %v6001_v19 = vmul.f32 %v5873_v9, %v9636_v4  ;;  %v5969_v11 = vmul.f32 %v5841_v38, %v9636_v4  ;;  %v6049_v24 = vmul.f32 %v5921_v57, %v9636_v4  ;;  %v5860_v9 = vld [vmem:[%s10603_s7 + $0x98] sm:$0xff] }
 0x73c   : > { %v6002_v20 = vmul.f32 %v5874_v15, %v5826_v8  ;;  %v5970_v22 = vmul.f32 %v5842_v47, %v5826_v8  ;;  %v6050_v23 = vmul.f32 %v5922_v50, %v5826_v8  ;;  %v5986_v25 = vmul.f32 %v5858_v28, %v5826_v8 }
 0x73d   : > { %v6066_v26 = vmul.f32 %v5938_v17, %v5826_v8  ;;  %v5985_v29 = vmul.f32 %v5857_v49, %v9636_v4  ;;  %v6065_v36 = vmul.f32 %v5937_v2, %v9636_v4  ;;  %v9681_v18 = vmax.f32 %v5812_v6, 0.0  ;;  %v5792_v17 = vpop.permute.xlu0 %5791 }
 0x73e   : > { %v5716_v32 = vpop.f32.mrb[36].mxu0  ;;  %v6161_v14 = vsel %vm2031_vm2, %v6002_v20, 0.0  ;;  %v6097_v51 = vsel %vm2031_vm2, %v5970_v22, 0.0  ;;  %v6257_v10 = vsel %vm2031_vm2, %v6050_v23, 0.0  ;;  %v6129_v40 = vsel %vm2031_vm2, %v5986_v25, 0.0  ;;  %v5907_v25 = vld [vmem:[%s10603_s7 + $0x210] sm:$0xff] }
 0x73f   : > { %v5718_v34 = vpop.f32.mrb[37].mxu0  ;;  %v6162_v35 = vadd.f32 %v6161_v14, %v6001_v19  ;;  %v6098_v16 = vadd.f32 %v6097_v51, %v5969_v11  ;;  %v6258_v7 = vadd.f32 %v6257_v10, %v6049_v24  ;;  %v6289_v41 = vsel %vm2031_vm2, %v6066_v26, 0.0  ;;  %v5876_v26 = vld [vmem:[%s10603_s7 + $0x118] sm:$0xff] }
 0x740   : > { %v5720_v21 = vpop.f32.mrb[38].mxu0  ;;  %v6018_v42 = vmul.f32 %v5890_v27, %v5826_v8  ;;  %v6130_v1 = vadd.f32 %v6129_v40, %v5985_v29  ;;  %v6290_v12 = vadd.f32 %v6289_v41, %v6065_v36  ;;  %v6017_v0 = vmul.f32 %v5889_v33, %v9636_v4  ;;  %v5875_v29 = vld [vmem:[%s10603_s7 + $0x110] sm:$0xff]  ;;  %v5956_v33 = vld [vmem:[%s10603_s7 + $0x398] sm:$0xff] }
 0x741   : > { %6163 = vadd.xlane.f32.xlu1 %v6162_v35  ;;  %6099 = vadd.xlane.f32.xlu0 %v6098_v16  ;;  %v5722_v52 = vpop.f32.mrb[39].mxu0  ;;  %v5813_v55 = vadd.f32 %v5782_v39, %v5716_v32  ;;  %v5814_v56 = vadd.f32 %v5782_v39, %v5718_v34  ;;  %v5815_v58 = vadd.f32 %v5787_v48, %v5720_v21  ;;  %v5797_v39 = vpop.permute.xlu1 %5796 }
 0x742   : > { %v6193_v60 = vsel %vm2031_vm2, %v6018_v42, 0.0  ;;  %v5816_v3 = vadd.f32 %v5787_v48, %v5722_v52  ;;  %v6033_v63 = vmul.f32 %v5905_v37, %v9636_v4  ;;  %v6034_v59 = vmul.f32 %v5906_v43, %v5826_v8  ;;  %v5955_v37 = vld [vmem:[%s10603_s7 + $0x390] sm:$0xff] }
 0x743   : > { %v6194_v61 = vadd.f32 %v6193_v60, %v6017_v0  ;;  %v5971_v38 = vmul.f32 %v5843_v13, %v9656_v46  ;;  %v5972_v5 = vmul.f32 %v5844_v53, %v9681_v18  ;;  %v6081_v31 = vmul.f32 %v5953_v44, %v9636_v4  ;;  %v5923_v43 = vld [vmem:[%s10603_s7 + $0x290] sm:$0xff]  ;;  %v5924_v44 = vld [vmem:[%s10603_s7 + $0x298] sm:$0xff]  ;;  %v5845_v0 = vld [vmem:[%s10603_s7 + $0x20] sm:$0xff] }
 0x744   : > { %v6082_v15 = vmul.f32 %v5954_v54, %v5826_v8  ;;  %v6225_v47 = vsel %vm2031_vm2, %v6034_v59, 0.0  ;;  %v6019_v50 = vmul.f32 %v5891_v30, %v9656_v46  ;;  %v6020_v57 = vmul.f32 %v5892_v62, %v9681_v18  ;;  %v5908_v8 = vld [vmem:[%s10603_s7 + $0x218] sm:$0xff]  ;;  %v5846_v13 = vld [vmem:[%s10603_s7 + $0x28] sm:$0xff]  ;;  %v5939_v60 = vld [vmem:[%s10603_s7 + $0x310] sm:$0xff] }
 0x745   : > { %6259 = vadd.xlane.f32.xlu1 %v6258_v7  ;;  %6131 = vadd.xlane.f32.xlu0 %v6130_v1  ;;  %v5987_v28 = vmul.f32 %v5859_v45, %v9656_v46  ;;  %v6226_v49 = vadd.f32 %v6225_v47, %v6033_v63  ;;  %v6101_v19 = vsel %vm2031_vm2, %v5972_v5, 0.0  ;;  %v5988_v4 = vmul.f32 %v5860_v9, %v9681_v18  ;;  %v5940_v53 = vld [vmem:[%s10603_s7 + $0x318] sm:$0xff]  ;;  %v5878_v30 = vld [vmem:[%s10603_s7 + $0x128] sm:$0xff]  ;;  %v5802_v63 = vpop.permute.xlu0 %5801 }
 0x746   : > { %v5726_v6 = vpop.f32.mrb[40].mxu0  ;;  %v6321_v20 = vsel %vm2031_vm2, %v6082_v15, 0.0  ;;  %v6102_v2 = vadd.f32 %v6101_v19, %v5971_v38  ;;  %v6197_v24 = vsel %vm2031_vm2, %v6020_v57, 0.0  ;;  %v9737_v27 = vmax.f32 %v5813_v55, 0.0  ;;  %v5877_v15 = vld [vmem:[%s10603_s7 + $0x120] sm:$0xff] }
 0x747   : > { %v5817_v22 = vadd.f32 %v5792_v17, %v5726_v6  ;;  %v5728_v23 = vpop.f32.mrb[41].mxu0  ;;  %v9728_v11 = vadd.f32 %v6321_v20, %v6081_v31  ;;  %v9739_v32 = vmax.f32 %v5814_v56, 0.0  ;;  %v6198_v51 = vadd.f32 %v6197_v24, %v6019_v50 }
 0x748   : > { %v5730_v14 = vpop.f32.mrb[42].mxu0  ;;  %v6133_v10 = vsel %vm2031_vm2, %v5988_v4, 0.0  ;;  %v9748_v34 = vmax.f32 %v5815_v58, 0.0  ;;  %v9750_v35 = vmax.f32 %v5816_v3, 0.0  ;;  %v6036_v36 = vmul.f32 %v5908_v8, %v9681_v18  ;;  %v5861_v4 = vld [vmem:[%s10603_s7 + $0xa0] sm:$0xff]  ;;  %v5862_v8 = vld [vmem:[%s10603_s7 + $0xa8] sm:$0xff] }
 0x749   : > { %6291 = vadd.xlane.f32.xlu1 %v6290_v12  ;;  %6195 = vadd.xlane.f32.xlu0 %v6194_v61  ;;  %v5732_v16 = vpop.f32.mrb[43].mxu0  ;;  %v9752_v7 = vadd.f32 %v6133_v10, %v5987_v28  ;;  %v9758_v21 = vmax.f32 %v5817_v22, 0.0  ;;  %v5818_v40 = vadd.f32 %v5792_v17, %v5728_v23  ;;  %v6035_v41 = vmul.f32 %v5907_v25, %v9656_v46  ;;  %v5893_v25 = vld [vmem:[%s10603_s7 + $0x1a0] sm:$0xff] }
 0x74a   : > { %v6004_v42 = vmul.f32 %v5876_v26, %v9681_v18  ;;  %v5819_v48 = vadd.f32 %v5797_v39, %v5730_v14  ;;  %v6229_v52 = vsel %vm2031_vm2, %v6036_v36, 0.0  ;;  %v6003_v1 = vmul.f32 %v5875_v29, %v9656_v46  ;;  %v5894_v26 = vld [vmem:[%s10603_s7 + $0x1a8] sm:$0xff]  ;;  %v5807_v14 = vpop.permute.xlu1 %5806  ;;  %v5941_v36 = vld [vmem:[%s10603_s7 + $0x320] sm:$0xff] }
 0x74b   : > { %v6084_v12 = vmul.f32 %v5956_v33, %v9681_v18  ;;  %v5820_v54 = vadd.f32 %v5797_v39, %v5732_v16  ;;  %v6230_v55 = vadd.f32 %v6229_v52, %v6035_v41  ;;  %v6083_v58 = vmul.f32 %v5955_v37, %v9656_v46  ;;  %v5909_v16 = vld [vmem:[%s10603_s7 + $0x220] sm:$0xff]  ;;  %v5942_v37 = vld [vmem:[%s10603_s7 + $0x328] sm:$0xff] }
 0x74c   : > { %v6165_v56 = vsel %vm2031_vm2, %v6004_v42, 0.0  ;;  %v6051_v3 = vmul.f32 %v5923_v43, %v9656_v46  ;;  %v6052_v61 = vmul.f32 %v5924_v44, %v9681_v18  ;;  %v5973_v38 = vmul.f32 %v5845_v0, %v9737_v27  ;;  %v5926_v43 = vld [vmem:[%s10603_s7 + $0x2a8] sm:$0xff] }
 0x74d   : > { %6227 = vadd.xlane.f32.xlu0 %v6226_v49  ;;  %6103 = vadd.xlane.f32.xlu1 %v6102_v2  ;;  %v9788_v62 = vadd.f32 %v6165_v56, %v6003_v1  ;;  %v6325_v45 = vsel %vm2031_vm2, %v6084_v12, 0.0  ;;  %v5974_v5 = vmul.f32 %v5846_v13, %v9739_v32  ;;  %v6068_v31 = vmul.f32 %v5940_v53, %v9681_v18  ;;  %v5925_v12 = vld [vmem:[%s10603_s7 + $0x2a0] sm:$0xff] }
 0x74e   : > { %v5736_v59 = vpop.f32.mrb[44].mxu0  ;;  %v9793_v9 = vadd.f32 %v6325_v45, %v6083_v58  ;;  %v6261_v57 = vsel %vm2031_vm2, %v6052_v61, 0.0  ;;  %v6067_v28 = vmul.f32 %v5939_v60, %v9656_v46  ;;  %v6006_v17 = vmul.f32 %v5878_v30, %v9739_v32  ;;  %v5957_v56 = vld [vmem:[%s10603_s7 + $0x3a0] sm:$0xff]  ;;  %v5958_v58 = vld [vmem:[%s10603_s7 + $0x3a8] sm:$0xff]  ;;  %v5863_v45 = vld [vmem:[%s10603_s7 + $0xb0] sm:$0xff] }
 0x74f   : > { %v5821_v47 = vadd.f32 %v5802_v63, %v5736_v59  ;;  %v5738_v50 = vpop.f32.mrb[45].mxu0  ;;  %v9804_v6 = vmax.f32 %v5818_v40, 0.0  ;;  %v9806_v19 = vadd.f32 %v6261_v57, %v6051_v3  ;;  %v6105_v20 = vsel %vm2031_vm2, %v5974_v5, 0.0  ;;  %v5864_v3 = vld [vmem:[%s10603_s7 + $0xb8] sm:$0xff]  ;;  %v5847_v5 = vld [vmem:[%s10603_s7 + $0x30] sm:$0xff] }
 0x750   : > { %v5740_v49 = vpop.f32.mrb[46].mxu0  ;;  %v6293_v18 = vsel %vm2031_vm2, %v6068_v31, 0.0  ;;  %v9816_v46 = vmax.f32 %v5819_v48, 0.0  ;;  %v9819_v23 = vadd.f32 %v6105_v20, %v5973_v38  ;;  %v6005_v24 = vmul.f32 %v5877_v15, %v9737_v27  ;;  %v5848_v31 = vld [vmem:[%s10603_s7 + $0x38] sm:$0xff] }
 0x751   : > { %6323 = vadd.xlane.f32.xlu0 %v9728_v11  ;;  %v5742_v22 = vpop.f32.mrb[47].mxu0  ;;  %6199 = vadd.xlane.f32.xlu1 %v6198_v51  ;;  %v9821_v2 = vadd.f32 %v6293_v18, %v6067_v28  ;;  %v5910_v11 = vld [vmem:[%s10603_s7 + $0x228] sm:$0xff]  ;;  %v9833_v51 = vmax.f32 %v5820_v54, 0.0  ;;  %v9835_v10 = vmax.f32 %v5821_v47, 0.0  ;;  %v5822_v29 = vadd.f32 %v5802_v63, %v5738_v50  ;;  %v5880_v15 = vld [vmem:[%s10603_s7 + $0x138] sm:$0xff] }
 0x752   : > { %v6169_v33 = vsel %vm2031_vm2, %v6006_v17, 0.0  ;;  %v9847_v39 = vadd.f32 %v5807_v14, %v5740_v49  ;;  %v9849_v40 = vadd.f32 %v5807_v14, %v5742_v22  ;;  %v5990_v42 = vmul.f32 %v5862_v8, %v9739_v32  ;;  %v5879_v17 = vld [vmem:[%s10603_s7 + $0x130] sm:$0xff]  ;;  %v5896_v49 = vld [vmem:[%s10603_s7 + $0x1b8] sm:$0xff] }
 0x753   : > { %v9851_v41 = vadd.f32 %v6169_v33, %v6005_v24  ;;  %v5989_v44 = vmul.f32 %v5861_v4, %v9737_v27  ;;  %v6021_v48 = vmul.f32 %v5893_v25, %v9737_v27  ;;  %v6022_v52 = vmul.f32 %v5894_v26, %v9739_v32  ;;  %v5895_v4 = vld [vmem:[%s10603_s7 + $0x1b0] sm:$0xff] }
 0x754   : > { %v6038_v1 = vmul.f32 %v5910_v11, %v9739_v32  ;;  %v6137_v0 = vsel %vm2031_vm2, %v5990_v42, 0.0  ;;  %v6037_v13 = vmul.f32 %v5909_v16, %v9737_v27  ;;  %v6069_v53 = vmul.f32 %v5941_v36, %v9737_v27  ;;  %v5911_v33 = vld [vmem:[%s10603_s7 + $0x230] sm:$0xff]  ;;  %v5912_v16 = vld [vmem:[%s10603_s7 + $0x238] sm:$0xff] }
 0x755   : > { %6135 = vadd.xlane.f32.xlu0 %v9752_v7  ;;  %6231 = vadd.xlane.f32.xlu1 %v6230_v55  ;;  %v6070_v54 = vmul.f32 %v5942_v37, %v9739_v32  ;;  %v9875_v60 = vadd.f32 %v6137_v0, %v5989_v44  ;;  %v6201_v7 = vsel %vm2031_vm2, %v6022_v52, 0.0  ;;  %v6054_v30 = vmul.f32 %v5926_v43, %v9739_v32  ;;  %v5943_v44 = vld [vmem:[%s10603_s7 + $0x330] sm:$0xff]  ;;  %v5866_v52 = vld [vmem:[%s10603_s7 + $0xc8] sm:$0xff] }
 0x756   : > { %v6233_v55 = vsel %vm2031_vm2, %v6038_v1, 0.0  ;;  %v9886_v61 = vadd.f32 %v6201_v7, %v6021_v48  ;;  %v6053_v38 = vmul.f32 %v5925_v12, %v9737_v27  ;;  %v6085_v57 = vmul.f32 %v5957_v56, %v9737_v27  ;;  %v5944_v48 = vld [vmem:[%s10603_s7 + $0x338] sm:$0xff]  ;;  %v5959_v7 = vld [vmem:[%s10603_s7 + $0x3b0] sm:$0xff] }
 0x757   : > { %v9888_v63 = vadd.f32 %v6233_v55, %v6037_v13  ;;  %v6297_v59 = vsel %vm2031_vm2, %v6070_v54, 0.0  ;;  %v6265_v50 = vsel %vm2031_vm2, %v6054_v30, 0.0  ;;  %v6086_v28 = vmul.f32 %v5958_v58, %v9739_v32  ;;  %v5960_v54 = vld [vmem:[%s10603_s7 + $0x3b8] sm:$0xff] }
 0x758   : > { %v9901_v47 = vadd.f32 %v6297_v59, %v6069_v53  ;;  %v9912_v20 = vmax.f32 %v5822_v29, 0.0  ;;  %v9916_v18 = vadd.f32 %v6265_v50, %v6053_v38  ;;  %v5991_v27 = vmul.f32 %v5863_v45, %v9748_v34  ;;  %v5927_v29 = vld [vmem:[%s10603_s7 + $0x2b0] sm:$0xff]  ;;  %v5865_v53 = vld [vmem:[%s10603_s7 + $0xc0] sm:$0xff]  ;;  %v5914_v59 = vld [vmem:[%s10603_s7 + $0x248] sm:$0xff] }
 0x759   : > { %6167 = vadd.xlane.f32.xlu0 %v9788_v62  ;;  %6327 = vadd.xlane.f32.xlu1 %v9793_v9  ;;  %v5992_v32 = vmul.f32 %v5864_v3, %v9750_v35  ;;  %v6329_v8 = vsel %vm2031_vm2, %v6086_v28, 0.0  ;;  %v5975_v22 = vmul.f32 %v5847_v5, %v9748_v34  ;;  %v5976_v24 = vmul.f32 %v5848_v31, %v9750_v35  ;;  %v5928_v9 = vld [vmem:[%s10603_s7 + $0x2b8] sm:$0xff]  ;;  %v5913_v50 = vld [vmem:[%s10603_s7 + $0x240] sm:$0xff]  ;;  %v5850_v28 = vld [vmem:[%s10603_s7 + $0x48] sm:$0xff] }
 0x75a   : > { %v6008_v62 = vmul.f32 %v5880_v15, %v9750_v35  ;;  %v9930_v25 = vadd.f32 %v6329_v8, %v6085_v57  ;;  %v6007_v11 = vmul.f32 %v5879_v17, %v9748_v34  ;;  %v6024_v14 = vmul.f32 %v5896_v49, %v9750_v35  ;;  %v5849_v57 = vld [vmem:[%s10603_s7 + $0x40] sm:$0xff] }
 0x75b   : > { %v6141_v26 = vsel %vm2031_vm2, %v5992_v32, 0.0  ;;  %v6109_v37 = vsel %vm2031_vm2, %v5976_v24, 0.0  ;;  %v6023_v43 = vmul.f32 %v5895_v4, %v9748_v34  ;;  %v6056_v13 = vmul.f32 %v5928_v9, %v9750_v35  ;;  %v5929_v32 = vld [vmem:[%s10603_s7 + $0x2c0] sm:$0xff]  ;;  %v5930_v4 = vld [vmem:[%s10603_s7 + $0x2c8] sm:$0xff] }
 0x75c   : > { %v9944_v36 = vadd.f32 %v6141_v26, %v5991_v27  ;;  %v6173_v42 = vsel %vm2031_vm2, %v6008_v62, 0.0  ;;  %v9960_v1 = vadd.f32 %v6109_v37, %v5975_v22  ;;  %v6205_v0 = vsel %vm2031_vm2, %v6024_v14, 0.0  ;;  %v5881_v24 = vld [vmem:[%s10603_s7 + $0x140] sm:$0xff]  ;;  %v5946_v62 = vld [vmem:[%s10603_s7 + $0x348] sm:$0xff] }
 0x75d   : > { %6263 = vadd.xlane.f32.xlu0 %v9806_v19  ;;  %6107 = vadd.xlane.f32.xlu1 %v9819_v23  ;;  %v9962_v12 = vadd.f32 %v6173_v42, %v6007_v11  ;;  %v9972_v56 = vadd.f32 %v6205_v0, %v6023_v43  ;;  %v6055_v19 = vmul.f32 %v5927_v29, %v9748_v34  ;;  %v6269_v55 = vsel %vm2031_vm2, %v6056_v13, 0.0  ;;  %v5945_v29 = vld [vmem:[%s10603_s7 + $0x340] sm:$0xff]  ;;  %v5898_v43 = vld [vmem:[%s10603_s7 + $0x1c8] sm:$0xff] }
 0x75e   : > { %v6039_v23 = vmul.f32 %v5911_v33, %v9748_v34  ;;  %v6040_v58 = vmul.f32 %v5912_v16, %v9750_v35  ;;  %v6071_v30 = vmul.f32 %v5943_v44, %v9748_v34  ;;  %v6072_v45 = vmul.f32 %v5944_v48, %v9750_v35  ;;  %v5897_v13 = vld [vmem:[%s10603_s7 + $0x1c0] sm:$0xff] }
 0x75f   : > { %v5994_v3 = vmul.f32 %v5866_v52, %v9804_v6  ;;  %v9987_v38 = vadd.f32 %v6269_v55, %v6055_v19  ;;  %v5993_v31 = vmul.f32 %v5865_v53, %v9758_v21  ;;  %v6088_v15 = vmul.f32 %v5960_v54, %v9750_v35  ;;  %v5867_v53 = vld [vmem:[%s10603_s7 + $0xd0] sm:$0xff]  ;;  %v5884_v55 = vld [vmem:[%s10603_s7 + $0x158] sm:$0xff] }
 0x760   : > { %v6237_v5 = vsel %vm2031_vm2, %v6040_v58, 0.0  ;;  %v6301_v35 = vsel %vm2031_vm2, %v6072_v45, 0.0  ;;  %v6087_v27 = vmul.f32 %v5959_v7, %v9748_v34  ;;  %v6042_v34 = vmul.f32 %v5914_v59, %v9804_v6  ;;  %v5961_v58 = vld [vmem:[%s10603_s7 + $0x3c0] sm:$0xff]  ;;  %v5962_v7 = vld [vmem:[%s10603_s7 + $0x3c8] sm:$0xff] }
 0x761   : > { %6295 = vadd.xlane.f32.xlu0 %v9821_v2  ;;  %6171 = vadd.xlane.f32.xlu1 %v9851_v41  ;;  %v10003_v17 = vadd.f32 %v6237_v5, %v6039_v23  ;;  %v6145_v49 = vsel %vm2031_vm2, %v5994_v3, 0.0  ;;  %v5882_v2 = vld [vmem:[%s10603_s7 + $0x148] sm:$0xff]  ;;  %v10017_v41 = vadd.f32 %v6301_v35, %v6071_v30  ;;  %v6333_v22 = vsel %vm2031_vm2, %v6088_v15, 0.0  ;;  %v5883_v5 = vld [vmem:[%s10603_s7 + $0x150] sm:$0xff] }
 0x762   : > { %v10019_v8 = vadd.f32 %v6145_v49, %v5993_v31  ;;  %v10029_v9 = vadd.f32 %v6333_v22, %v6087_v27  ;;  %v6041_v26 = vmul.f32 %v5913_v50, %v9758_v21  ;;  %v5977_v11 = vmul.f32 %v5849_v57, %v9758_v21  ;;  %v5948_v31 = vld [vmem:[%s10603_s7 + $0x358] sm:$0xff]  ;;  %v5947_v35 = vld [vmem:[%s10603_s7 + $0x350] sm:$0xff] }
 0x763   : > { %v5978_v14 = vmul.f32 %v5850_v28, %v9804_v6  ;;  %v6241_v33 = vsel %vm2031_vm2, %v6042_v34, 0.0  ;;  %v6057_v16 = vmul.f32 %v5929_v32, %v9758_v21  ;;  %v6058_v37 = vmul.f32 %v5930_v4, %v9804_v6 }
 0x764   : > { %v6010_v42 = vmul.f32 %v5882_v2, %v9804_v6  ;;  %v10046_v44 = vadd.f32 %v6241_v33, %v6041_v26  ;;  %v6009_v52 = vmul.f32 %v5881_v24, %v9758_v21  ;;  %v6074_v0 = vmul.f32 %v5946_v62, %v9804_v6  ;;  %v5852_v2 = vld [vmem:[%s10603_s7 + $0x58] sm:$0xff] }
 0x765   : > { %6139 = vadd.xlane.f32.xlu0 %v9875_v60  ;;  %6203 = vadd.xlane.f32.xlu1 %v9886_v61  ;;  %v6113_v48 = vsel %vm2031_vm2, %v5978_v14, 0.0  ;;  %v5868_v60 = vld [vmem:[%s10603_s7 + $0xd8] sm:$0xff]  ;;  %v6273_v54 = vsel %vm2031_vm2, %v6058_v37, 0.0  ;;  %v6073_v23 = vmul.f32 %v5945_v29, %v9758_v21  ;;  %v6026_v59 = vmul.f32 %v5898_v43, %v9804_v6  ;;  %v5963_v14 = vld [vmem:[%s10603_s7 + $0x3d0] sm:$0xff] }
 0x766   : > { %v10060_v61 = vadd.f32 %v6113_v48, %v5977_v11  ;;  %v6177_v19 = vsel %vm2031_vm2, %v6010_v42, 0.0  ;;  %v10074_v30 = vadd.f32 %v6273_v54, %v6057_v16  ;;  %v6305_v3 = vsel %vm2031_vm2, %v6074_v0, 0.0  ;;  %v5900_v29 = vld [vmem:[%s10603_s7 + $0x1d8] sm:$0xff]  ;;  %v5899_v43 = vld [vmem:[%s10603_s7 + $0x1d0] sm:$0xff]  ;;  %v5854_v48 = vld [vmem:[%s10603_s7 + $0x68] sm:$0xff] }
 0x767   : > { %v10076_v45 = vadd.f32 %v6177_v19, %v6009_v52  ;;  %v10086_v15 = vadd.f32 %v6305_v3, %v6073_v23  ;;  %v6025_v50 = vmul.f32 %v5897_v13, %v9758_v21  ;;  %v5995_v57 = vmul.f32 %v5867_v53, %v9816_v46  ;;  %v5916_v54 = vld [vmem:[%s10603_s7 + $0x258] sm:$0xff]  ;;  %v5915_v23 = vld [vmem:[%s10603_s7 + $0x250] sm:$0xff] }
 0x768   : > { %v5996_v28 = vmul.f32 %v5868_v60, %v9833_v51  ;;  %v6209_v49 = vsel %vm2031_vm2, %v6026_v59, 0.0  ;;  %v6089_v27 = vmul.f32 %v5961_v58, %v9758_v21  ;;  %v6090_v32 = vmul.f32 %v5962_v7, %v9804_v6  ;;  %v5851_v21 = vld [vmem:[%s10603_s7 + $0x50] sm:$0xff]  ;;  %v5964_v6 = vld [vmem:[%s10603_s7 + $0x3d8] sm:$0xff]  ;;  %v5853_v60 = vld [vmem:[%s10603_s7 + $0x60] sm:$0xff] }
 0x769   : > { %6235 = vadd.xlane.f32.xlu0 %v9888_v63  ;;  %6299 = vadd.xlane.f32.xlu1 %v9901_v47  ;;  %v6012_v4 = vmul.f32 %v5884_v55, %v9833_v51  ;;  %v10103_v22 = vadd.f32 %v6209_v49, %v6025_v50  ;;  %v6011_v63 = vmul.f32 %v5883_v5, %v9816_v46  ;;  %v10138_v52 = vmax.f32 %v9847_v39, 0.0  ;;  %v5886_v58 = vld [vmem:[%s10603_s7 + $0x168] sm:$0xff]  ;;  %v5885_v59 = vld [vmem:[%s10603_s7 + $0x160] sm:$0xff]  ;;  %v5932_v5 = vld [vmem:[%s10603_s7 + $0x2d8] sm:$0xff] }
 0x76a   : > { %v6149_v34 = vsel %vm2031_vm2, %v5996_v28, 0.0  ;;  %v6076_v47 = vmul.f32 %v5948_v31, %v9833_v51  ;;  %v6337_v62 = vsel %vm2031_vm2, %v6090_v32, 0.0  ;;  %v6075_v11 = vmul.f32 %v5947_v35, %v9816_v46  ;;  %v5931_v35 = vld [vmem:[%s10603_s7 + $0x2d0] sm:$0xff]  ;;  %v5902_v49 = vld [vmem:[%s10603_s7 + $0x1e8] sm:$0xff] }
 0x76b   : > { %v10114_v24 = vadd.f32 %v6149_v34, %v5995_v57  ;;  %v6181_v26 = vsel %vm2031_vm2, %v6012_v4, 0.0  ;;  %v10125_v33 = vadd.f32 %v6337_v62, %v6089_v27  ;;  %v5980_v42 = vmul.f32 %v5852_v2, %v9833_v51  ;;  %v5901_v34 = vld [vmem:[%s10603_s7 + $0x1e0] sm:$0xff]  ;;  %v5918_v62 = vld [vmem:[%s10603_s7 + $0x268] sm:$0xff] }
 0x76c   : > { %v10127_v16 = vadd.f32 %v6181_v26, %v6011_v63  ;;  %v6309_v37 = vsel %vm2031_vm2, %v6076_v47, 0.0  ;;  %v5979_v13 = vmul.f32 %v5851_v21, %v9816_v46  ;;  %v6092_v53 = vmul.f32 %v5964_v6, %v9833_v51  ;;  %v5870_v63 = vld [vmem:[%s10603_s7 + $0xe8] sm:$0xff]  ;;  %v5869_v6 = vld [vmem:[%s10603_s7 + $0xe0] sm:$0xff] }
 0x76d   : > { %6267 = vadd.xlane.f32.xlu0 %v9916_v18  ;;  %6331 = vadd.xlane.f32.xlu1 %v9930_v25  ;;  %v10142_v0 = vadd.f32 %v6309_v37, %v6075_v11  ;;  %v10153_v39 = vmax.f32 %v9849_v40, 0.0  ;;  %v6117_v18 = vsel %vm2031_vm2, %v5980_v42, 0.0  ;;  %v6091_v25 = vmul.f32 %v5963_v14, %v9816_v46  ;;  %v5934_v37 = vld [vmem:[%s10603_s7 + $0x2e8] sm:$0xff] }
 0x76e   : > { %v6028_v19 = vmul.f32 %v5900_v29, %v9833_v51  ;;  %v10164_v7 = vadd.f32 %v6117_v18, %v5979_v13  ;;  %v6341_v55 = vsel %vm2031_vm2, %v6092_v53, 0.0  ;;  %v6027_v40 = vmul.f32 %v5899_v43, %v9816_v46  ;;  %v5950_v53 = vld [vmem:[%s10603_s7 + $0x368] sm:$0xff] }
 0x76f   : > { %v5982_v3 = vmul.f32 %v5854_v48, %v9912_v20  ;;  %v10175_v31 = vadd.f32 %v6341_v55, %v6091_v25  ;;  %v5981_v57 = vmul.f32 %v5853_v60, %v9835_v10  ;;  %v6044_v28 = vmul.f32 %v5916_v54, %v9833_v51 }
 0x770   : > { %v6213_v50 = vsel %vm2031_vm2, %v6028_v19, 0.0  ;;  %v6043_v4 = vmul.f32 %v5915_v23, %v9816_v46  ;;  %v6014_v2 = vmul.f32 %v5886_v58, %v9912_v20  ;;  %v6060_v21 = vmul.f32 %v5932_v5, %v9833_v51  ;;  %v5917_v51 = vld [vmem:[%s10603_s7 + $0x260] sm:$0xff]  ;;  %v5856_v23 = vld [vmem:[%s10603_s7 + $0x78] sm:$0xff] }
 0x771   : > { %6143 = vadd.xlane.f32.xlu0 %v9944_v36  ;;  %6111 = vadd.xlane.f32.xlu1 %v9960_v1  ;;  %v10188_v27 = vadd.f32 %v6213_v50, %v6027_v40  ;;  %v6121_v32 = vsel %vm2031_vm2, %v5982_v3, 0.0  ;;  %v6245_v36 = vsel %vm2031_vm2, %v6044_v28, 0.0  ;;  %v6013_v1 = vmul.f32 %v5885_v59, %v9835_v10  ;;  %v5949_v19 = vld [vmem:[%s10603_s7 + $0x360] sm:$0xff]  ;;  %v5855_v40 = vld [vmem:[%s10603_s7 + $0x70] sm:$0xff]  ;;  %v5872_v3 = vld [vmem:[%s10603_s7 + $0xf8] sm:$0xff] }
 0x772   : > { %v10199_v47 = vadd.f32 %v6121_v32, %v5981_v57  ;;  %v10210_v26 = vadd.f32 %v6245_v36, %v6043_v4  ;;  %v6185_v11 = vsel %vm2031_vm2, %v6014_v2, 0.0  ;;  %v6059_v14 = vmul.f32 %v5931_v35, %v9816_v46  ;;  %v5933_v46 = vld [vmem:[%s10603_s7 + $0x2e0] sm:$0xff]  ;;  %v5871_v28 = vld [vmem:[%s10603_s7 + $0xf0] sm:$0xff]  ;;  %v5920_v35 = vld [vmem:[%s10603_s7 + $0x278] sm:$0xff] }
 0x773   : > { %v6030_v29 = vmul.f32 %v5902_v49, %v9912_v20  ;;  %v10221_v42 = vadd.f32 %v6185_v11, %v6013_v1  ;;  %v6277_v43 = vsel %vm2031_vm2, %v6060_v21, 0.0  ;;  %v6029_v48 = vmul.f32 %v5901_v34, %v9835_v10  ;;  %v5919_v34 = vld [vmem:[%s10603_s7 + $0x270] sm:$0xff]  ;;  %v5936_v11 = vld [vmem:[%s10603_s7 + $0x2f8] sm:$0xff] }
 0x774   : > { %v5998_v13 = vmul.f32 %v5870_v63, %v9912_v20  ;;  %v10234_v60 = vadd.f32 %v6277_v43, %v6059_v14  ;;  %v5997_v18 = vmul.f32 %v5869_v6, %v9835_v10  ;;  %v6046_v25 = vmul.f32 %v5918_v62, %v9912_v20  ;;  %v5888_v63 = vld [vmem:[%s10603_s7 + $0x178] sm:$0xff]  ;;  %v5887_v62 = vld [vmem:[%s10603_s7 + $0x170] sm:$0xff] }
 0x775   : > { %6175 = vadd.xlane.f32.xlu0 %v9962_v12  ;;  %6207 = vadd.xlane.f32.xlu1 %v9972_v56  ;;  %v6217_v54 = vsel %vm2031_vm2, %v6030_v29, 0.0  ;;  %v6045_v56 = vmul.f32 %v5917_v51, %v9835_v10  ;;  %v6062_v55 = vmul.f32 %v5934_v37, %v9912_v20  ;;  %v6061_v50 = vmul.f32 %v5933_v46, %v9835_v10  ;;  %v5935_v51 = vld [vmem:[%s10603_s7 + $0x2f0] sm:$0xff]  ;;  %v5904_v37 = vld [vmem:[%s10603_s7 + $0x1f8] sm:$0xff] }
 0x776   : > { %v10245_v58 = vadd.f32 %v6217_v54, %v6029_v48  ;;  %v6153_v12 = vsel %vm2031_vm2, %v5998_v13, 0.0  ;;  %v6249_v5 = vsel %vm2031_vm2, %v6046_v25, 0.0  ;;  %v6078_v57 = vmul.f32 %v5950_v53, %v9912_v20  ;;  %v5903_v53 = vld [vmem:[%s10603_s7 + $0x1f0] sm:$0xff]  ;;  %v5966_v54 = vld [vmem:[%s10603_s7 + $0x3e8] sm:$0xff] }
 0x777   : > { %v10256_v59 = vadd.f32 %v6153_v12, %v5997_v18  ;;  %v10267_v49 = vadd.f32 %v6249_v5, %v6045_v56  ;;  %v6281_v32 = vsel %vm2031_vm2, %v6062_v55, 0.0  ;;  %v6077_v4 = vmul.f32 %v5949_v19, %v9835_v10  ;;  %v5965_v12 = vld [vmem:[%s10603_s7 + $0x3e0] sm:$0xff]  ;;  %v5952_v56 = vld [vmem:[%s10603_s7 + $0x378] sm:$0xff] }
 0x778   : > { %v5984_v2 = vmul.f32 %v5856_v23, %v10153_v39  ;;  %v10280_v36 = vadd.f32 %v6281_v32, %v6061_v50  ;;  %v6313_v1 = vsel %vm2031_vm2, %v6078_v57, 0.0  ;;  %v5983_v21 = vmul.f32 %v5855_v40, %v10138_v52  ;;  %v5951_v50 = vld [vmem:[%s10603_s7 + $0x370] sm:$0xff]  ;;  %v5968_v57 = vld [vmem:[%s10603_s7 + $0x3f8] sm:$0xff] }
 0x779   : > { %6271 = vadd.xlane.f32.xlu0 %v9987_v38  ;;  %6239 = vadd.xlane.f32.xlu1 %v10003_v17  ;;  %v6000_v6 = vmul.f32 %v5872_v3, %v10153_v39  ;;  %v10291_v14 = vadd.f32 %v6313_v1, %v6077_v4  ;;  %v5999_v17 = vmul.f32 %v5871_v28, %v10138_v52  ;;  %v5967_v32 = vld [vmem:[%s10603_s7 + $0x3f0] sm:$0xff] }
 0x77a   : > { %v6125_v38 = vsel %vm2031_vm2, %v5984_v2, 0.0  ;;  %v6048_v29 = vmul.f32 %v5920_v35, %v10153_v39  ;;  %v6047_v13 = vmul.f32 %v5919_v34, %v10138_v52  ;;  %v6016_v46 = vmul.f32 %v5888_v63, %v10153_v39 }
 0x77b   : > { %v6126_v43 = vadd.f32 %v6125_v38, %v5983_v21  ;;  %v6157_v48 = vsel %vm2031_vm2, %v6000_v6, 0.0  ;;  %v6015_v19 = vmul.f32 %v5887_v62, %v10138_v52  ;;  %v6064_v23 = vmul.f32 %v5936_v11, %v10153_v39 }
 0x77c   : > { %v6158_v18 = vadd.f32 %v6157_v48, %v5999_v17  ;;  %v6253_v25 = vsel %vm2031_vm2, %v6048_v29, 0.0  ;;  %v6189_v40 = vsel %vm2031_vm2, %v6016_v46, 0.0  ;;  %v6063_v3 = vmul.f32 %v5935_v51, %v10138_v52 }
 0x77d   : > { %6303 = vadd.xlane.f32.xlu0 %v10017_v41  ;;  %6147 = vadd.xlane.f32.xlu1 %v10019_v8  ;;  %v6254_v55 = vadd.f32 %v6253_v25, %v6047_v13  ;;  %v6032_v5 = vmul.f32 %v5904_v37, %v10153_v39  ;;  %v6190_v28 = vadd.f32 %v6189_v40, %v6015_v19  ;;  %v6285_v41 = vsel %vm2031_vm2, %v6064_v23, 0.0 }
 0x77e   : > { %v6031_v8 = vmul.f32 %v5903_v53, %v10138_v52  ;;  %v6094_v35 = vmul.f32 %v5966_v54, %v9912_v20  ;;  %v6286_v4 = vadd.f32 %v6285_v41, %v6063_v3  ;;  %v6093_v34 = vmul.f32 %v5965_v12, %v9835_v10 }
 0x77f   : > { %v6221_v2 = vsel %vm2031_vm2, %v6032_v5, 0.0  ;;  %v6080_v63 = vmul.f32 %v5952_v56, %v10153_v39  ;;  %v6079_v6 = vmul.f32 %v5951_v50, %v10138_v52  ;;  %v6096_v62 = vmul.f32 %v5968_v57, %v10153_v39 }
 0x780   : > { %v6222_v1 = vadd.f32 %v6221_v2, %v6031_v8  ;;  %v6345_v21 = vsel %vm2031_vm2, %v6094_v35, 0.0  ;;  %v6095_v38 = vmul.f32 %v5967_v32, %v10138_v52 }
 0x781   : > { %6335 = vadd.xlane.f32.xlu0 %v10029_v9  ;;  %6243 = vadd.xlane.f32.xlu1 %v10046_v44  ;;  %v6346_v20 = vadd.f32 %v6345_v21, %v6093_v34  ;;  %v6317_v11 = vsel %vm2031_vm2, %v6080_v63, 0.0  ;;  %v6349_v10 = vsel %vm2031_vm2, %v6096_v62, 0.0  ;;  %v6417_v9 = vlaneseq }
 0x782   : > { %v6318_v17 = vadd.f32 %v6317_v11, %v6079_v6  ;;  %v6350_v29 = vadd.f32 %v6349_v10, %v6095_v38  ;;  %vm6428_vm2 = vcmask 130112  }
 0x785   : > { %6115 = vadd.xlane.f32.xlu0 %v10060_v61  ;;  %6275 = vadd.xlane.f32.xlu1 %v10074_v30  ;;  %v10369_v30 = vand.u32 127, %v6417_v9 }
 0x789   : > { %6179 = vadd.xlane.f32.xlu0 %v10076_v45  ;;  %6307 = vadd.xlane.f32.xlu1 %v10086_v15 }
 0x78d   : > { %6211 = vadd.xlane.f32.xlu0 %v10103_v22  ;;  %6151 = vadd.xlane.f32.xlu1 %v10114_v24  ;;  %v10371_v22 = vshrl.u32 %v6417_v9, 7  ;;  %v6423_v24 = vadd.s32 4294967288, %v10369_v30  ;;  %v6437_v9 = vadd.s32 4294967272, %v10369_v30 }
 0x78f   : > { %v6421_v52 = vsub.s32 %v10369_v30, %v10371_v22 }
 0x791   : > { %6339 = vadd.xlane.f32.xlu0 %v10125_v33  ;;  %6183 = vadd.xlane.f32.xlu1 %v10127_v16 }
 0x795   : > { %6311 = vadd.xlane.f32.xlu1 %v10142_v0  ;;  %6119 = vadd.xlane.f32.xlu0 %v10164_v7  ;;  %v6426_v0 = vsub.s32 %v6423_v24, %v10371_v22 }
 0x799   : > { %6343 = vadd.xlane.f32.xlu1 %v10175_v31  ;;  %6215 = vadd.xlane.f32.xlu0 %v10188_v27 }
 0x79d   : > { %6123 = vadd.xlane.f32.xlu1 %v10199_v47  ;;  %6247 = vadd.xlane.f32.xlu0 %v10210_v26 }
 0x7a1   : > { %6187 = vadd.xlane.f32.xlu1 %v10221_v42  ;;  %6279 = vadd.xlane.f32.xlu0 %v10234_v60 }
 0x7a5   : > { %6219 = vadd.xlane.f32.xlu1 %v10245_v58  ;;  %6155 = vadd.xlane.f32.xlu0 %v10256_v59 }
 0x7a9   : > { %6251 = vadd.xlane.f32.xlu1 %v10267_v49  ;;  %6283 = vadd.xlane.f32.xlu0 %v10280_v36 }
 0x7ad   : > { %6315 = vadd.xlane.f32.xlu0 %v10291_v14  ;;  %6127 = vadd.xlane.f32.xlu1 %v6126_v43  ;;  %v6430_v14 = vadd.s32 4294967280, %v10369_v30 }
 0x7b1   : > { %6159 = vadd.xlane.f32.xlu0 %v6158_v18  ;;  %6255 = vadd.xlane.f32.xlu1 %v6254_v55  ;;  %v6433_v18 = vsub.s32 %v6430_v14, %v10371_v22 }
 0x7b5   : > { %6191 = vadd.xlane.f32.xlu0 %v6190_v28  ;;  %6287 = vadd.xlane.f32.xlu1 %v6286_v4 }
 0x7b9   : > { %6223 = vadd.xlane.f32.xlu0 %v6222_v1  ;;  %6347 = vadd.xlane.f32.xlu1 %v6346_v20 }
 0x7bd   : > { %6319 = vadd.xlane.f32.xlu0 %v6318_v17 }
 0x7c1   : > { %6351 = vadd.xlane.f32.xlu0 %v6350_v29 }
 0x7ce   : > { %v6100_v44 = vpop.xlane.xlu0 %6099  ;;  %v6164_v61 = vpop.xlane.xlu1 %6163 }
 0x7cf   : > { %v6422_v31 = vrot.slane %v6100_v44, %v6421_v52  ;;  %v6514_v25 = vrot.slane %v6164_v61, %v6421_v52 }
 0x7d2   : > { %v6132_v45 = vpop.xlane.xlu0 %6131  ;;  %v6260_v15 = vpop.xlane.xlu1 %6259 }
 0x7d3   : > { %v6475_v51 = vrot.slane %v6132_v45, %v6421_v52  ;;  %v6631_v5 = vrot.slane %v6260_v15, %v6421_v52 }
 0x7d6   : > { %v6196_v33 = vpop.xlane.xlu0 %6195  ;;  %v6292_v16 = vpop.xlane.xlu1 %6291 }
 0x7d7   : > { %v6553_v60 = vrot.slane %v6196_v33, %v6421_v52  ;;  %v6670_v32 = vrot.slane %v6292_v16, %v6421_v52  ;;  %v10403_v16 = vsub.s32 %v6437_v9, %v10371_v22 }
 0x7da   : > { %v6228_v39 = vpop.xlane.xlu0 %6227  ;;  %v6104_v7 = vpop.xlane.xlu1 %6103 }
 0x7db   : > { %v6427_v27 = vrot.slane %v6104_v7, %v6426_v0  ;;  %v6592_v37 = vrot.slane %v6228_v39, %v6421_v52 }
 0x7dd   : > { %v6429_v47 = vsel %vm6428_vm2, %v6427_v27, %v6422_v31 }
 0x7de   : > { %v6324_v26 = vpop.xlane.xlu0 %6323  ;;  %v6200_v42 = vpop.xlane.xlu1 %6199 }
 0x7df   : > { %v6557_v58 = vrot.slane %v6200_v42, %v6426_v0  ;;  %v6709_v19 = vrot.slane %v6324_v26, %v6421_v52 }
 0x7e1   : > { %v6558_v59 = vsel %vm6428_vm2, %v6557_v58, %v6553_v60 }
 0x7e2   : > { %v6136_v49 = vpop.xlane.xlu0 %6135  ;;  %v6232_v36 = vpop.xlane.xlu1 %6231 }
 0x7e3   : > { %v6479_v43 = vrot.slane %v6136_v49, %v6426_v0  ;;  %v6596_v48 = vrot.slane %v6232_v36, %v6426_v0 }
 0x7e5   : > { %v6480_v13 = vsel %vm6428_vm2, %v6479_v43, %v6475_v51  ;;  %v6597_v46 = vsel %vm6428_vm2, %v6596_v48, %v6592_v37 }
 0x7e6   : > { %v6168_v53 = vpop.xlane.xlu0 %6167  ;;  %v6328_v54 = vpop.xlane.xlu1 %6327 }
 0x7e7   : > { %v6518_v23 = vrot.slane %v6168_v53, %v6426_v0  ;;  %v6713_v12 = vrot.slane %v6328_v54, %v6426_v0 }
 0x7e9   : > { %v6519_v56 = vsel %vm6428_vm2, %v6518_v23, %v6514_v25  ;;  %v6714_v55 = vsel %vm6428_vm2, %v6713_v12, %v6709_v19 }
 0x7ea   : > { %v6264_v40 = vpop.xlane.xlu0 %6263  ;;  %v6108_v3 = vpop.xlane.xlu1 %6107 }
 0x7eb   : > { %v6635_v50 = vrot.slane %v6264_v40, %v6426_v0  ;;  %v6434_v57 = vrot.slane %v6108_v3, %v6433_v18 }
 0x7ed   : > { %v6636_v28 = vsel %vm6428_vm2, %v6635_v50, %v6631_v5  ;;  %v10387_v41 = vsel %vm6435_vm3, %v6434_v57, %v6429_v47  ;;  %v6444_v57 = vadd.s32 4294967264, %v10369_v30 }
 0x7ee   : > { %v6296_v8 = vpop.xlane.xlu0 %6295  ;;  %v6172_v35 = vpop.xlane.xlu1 %6171 }
 0x7ef   : > { %v6674_v4 = vrot.slane %v6296_v8, %v6426_v0  ;;  %v6523_v2 = vrot.slane %v6172_v35, %v6433_v18  ;;  %v6451_v35 = vadd.s32 4294967256, %v10369_v30 }
 0x7f1   : > { %v6675_v34 = vsel %vm6428_vm2, %v6674_v4, %v6670_v32  ;;  %v6524_v63 = vsel %vm6435_vm3, %v6523_v2, %v6519_v56  ;;  %v6458_v32 = vadd.s32 4294967248, %v10369_v30  ;;  %v6465_v4 = vadd.s32 4294967240, %v10369_v30 }
 0x7f2   : > { %v6140_v1 = vpop.xlane.xlu0 %6139  ;;  %v6204_v21 = vpop.xlane.xlu1 %6203  ;;  %v10460_v2 = vsub.s32 %v6444_v57, %v10371_v22 }
 0x7f3   : > { %v6484_v6 = vrot.slane %v6140_v1, %v6433_v18  ;;  %v6562_v62 = vrot.slane %v6204_v21, %v6433_v18  ;;  %v10467_v1 = vsub.s32 %v6451_v35, %v10371_v22  ;;  %v10470_v21 = vsub.s32 %v6458_v32, %v10371_v22 }
 0x7f4   : > { %v10475_v30 = vsub.s32 %v6465_v4, %v10371_v22 }
 0x7f5   : > { %v6485_v20 = vsel %vm6435_vm3, %v6484_v6, %v6480_v13  ;;  %v10393_v11 = vsel %vm6435_vm3, %v6562_v62, %v6558_v59 }
 0x7f6   : > { %v6236_v38 = vpop.xlane.xlu0 %6235  ;;  %v6300_v17 = vpop.xlane.xlu1 %6299 }
 0x7f7   : > { %v6601_v10 = vrot.slane %v6236_v38, %v6433_v18  ;;  %v6679_v29 = vrot.slane %v6300_v17, %v6433_v18 }
 0x7f9   : > { %v10397_v44 = vsel %vm6435_vm3, %v6601_v10, %v6597_v46  ;;  %v10400_v61 = vsel %vm6435_vm3, %v6679_v29, %v6675_v34 }
 0x7fa   : > { %v6268_v45 = vpop.xlane.xlu0 %6267  ;;  %v6332_v15 = vpop.xlane.xlu1 %6331 }
 0x7fb   : > { %v6640_v24 = vrot.slane %v6268_v45, %v6433_v18  ;;  %v6718_v33 = vrot.slane %v6332_v15, %v6433_v18 }
 0x7fd   : > { %v6641_v52 = vsel %vm6435_vm3, %v6640_v24, %v6636_v28  ;;  %v10407_v0 = vsel %vm6435_vm3, %v6718_v33, %v6714_v55 }
 0x7fe   : > { %v6144_v39 = vpop.xlane.xlu0 %6143  ;;  %v6112_v7 = vpop.xlane.xlu1 %6111 }
 0x7ff   : > { %v6489_v31 = vrot.slane %v6144_v39, %v10403_v16  ;;  %v6441_v6 = vrot.slane %v6112_v7, %v10403_v16 }
 0x801   : > { %v10411_v27 = vsel %vm6442_vm4, %v6489_v31, %v6485_v20  ;;  %v6443_v24 = vsel %vm6442_vm4, %v6441_v6, %v10387_v41 }
 0x802   : > { %v6176_v47 = vpop.xlane.xlu0 %6175  ;;  %v6208_v26 = vpop.xlane.xlu1 %6207 }
 0x803   : > { %v6528_v42 = vrot.slane %v6176_v47, %v10403_v16  ;;  %v6567_v62 = vrot.slane %v6208_v26, %v10403_v16 }
 0x805   : > { %v10415_v60 = vsel %vm6442_vm4, %v6528_v42, %v6524_v63  ;;  %v6568_v33 = vsel %vm6442_vm4, %v6567_v62, %v10393_v11 }
 0x806   : > { %v6272_v58 = vpop.xlane.xlu0 %6271  ;;  %v10417_v59 = vpop.xlane.xlu1 %6239 }
 0x807   : > { %v6645_v49 = vrot.slane %v6272_v58, %v10403_v16  ;;  %v6606_v45 = vrot.slane %v10417_v59, %v10403_v16 }
 0x809   : > { %v10421_v36 = vsel %vm6442_vm4, %v6645_v49, %v6641_v52 }
 0x80a   : > { %v10423_v14 = vpop.xlane.xlu0 %6303  ;;  %v6148_v51 = vpop.xlane.xlu1 %6147 }
 0x80b   : > { %v6494_v20 = vrot.slane %v6148_v51, %v10460_v2  ;;  %v6684_v52 = vrot.slane %v10423_v14, %v10403_v16 }
 0x80d   : > { %v6495_v7 = vsel %vm6449_vm5, %v6494_v20, %v10411_v27  ;;  %v6607_v27 = vsel %vm6442_vm4, %v6606_v45, %v10397_v44 }
 0x80e   : > { %v10425_v37 = vpop.xlane.xlu0 %6335  ;;  %v10427_v43 = vpop.xlane.xlu1 %6243 }
 0x80f   : > { %v6611_v31 = vrot.slane %v10427_v43, %v10460_v2  ;;  %v6723_v44 = vrot.slane %v10425_v37, %v10403_v16 }
 0x812   : > { %v6116_v48 = vpop.xlane.xlu0 %6115  ;;  %v10429_v13 = vpop.xlane.xlu1 %6275 }
 0x813   : > { %v6448_v38 = vrot.slane %v6116_v48, %v10460_v2  ;;  %v6685_v48 = vsel %vm6442_vm4, %v6684_v52, %v10400_v61  ;;  %v6650_v61 = vrot.slane %v10429_v13, %v10460_v2 }
 0x815   : > { %v6450_v47 = vsel %vm6449_vm5, %v6448_v38, %v6443_v24 }
 0x816   : > { %v10431_v46 = vpop.xlane.xlu0 %6179  ;;  %v10433_v53 = vpop.xlane.xlu1 %6307 }
 0x817   : > { %v6533_v26 = vrot.slane %v10431_v46, %v10460_v2  ;;  %v6689_v16 = vrot.slane %v10433_v53, %v10460_v2 }
 0x81a   : > { %v10435_v54 = vpop.xlane.xlu0 %6211  ;;  %v6152_v18 = vpop.xlane.xlu1 %6151 }
 0x81b   : > { %v6499_v29 = vrot.slane %v6152_v18, %v10467_v1  ;;  %v6572_v46 = vrot.slane %v10435_v54, %v10460_v2 }
 0x81d   : > { %v6500_v11 = vsel %vm6456_vm6, %v6499_v29, %v6495_v7  ;;  %v6573_v4 = vsel %vm6449_vm5, %v6572_v46, %v6568_v33 }
 0x81e   : > { %v10437_v25 = vpop.xlane.xlu0 %6339  ;;  %v10439_v19 = vpop.xlane.xlu1 %6183 }
 0x81f   : > { %v6538_v58 = vrot.slane %v10439_v19, %v10467_v1 }
 0x822   : > { %v6120_v23 = vpop.xlane.xlu0 %6119  ;;  %v10441_v12 = vpop.xlane.xlu1 %6311 }
 0x823   : > { %v6455_v9 = vrot.slane %v6120_v23, %v10467_v1  ;;  %v6612_v23 = vsel %vm6449_vm5, %v6611_v31, %v6607_v27  ;;  %v6694_v53 = vrot.slane %v10441_v12, %v10467_v1 }
 0x825   : > { %v6457_v59 = vsel %vm6456_vm6, %v6455_v9, %v6450_v47  ;;  %v6690_v9 = vsel %vm6449_vm5, %v6689_v16, %v6685_v48  ;;  %v6763_v48 = vld [vmem:[%s10604_s8] sm:$0xff] }
 0x826   : > { %v10443_v56 = vpop.xlane.xlu0 %6215  ;;  %v10445_v55 = vpop.xlane.xlu1 %6343  ;;  %v6695_v52 = vsel %vm6456_vm6, %v6694_v53, %v6690_v9 }
 0x82a   : > { %v10447_v40 = vpop.xlane.xlu0 %6247  ;;  %v6124_v3 = vpop.xlane.xlu1 %6123 }
 0x82b   : > { %v6462_v22 = vrot.slane %v6124_v3, %v10470_v21  ;;  %v6534_v3 = vsel %vm6449_vm5, %v6533_v26, %v10415_v60  ;;  %v6616_v60 = vrot.slane %v10447_v40, %v10467_v1 }
 0x82c   : > { %v6539_v54 = vsel %vm6456_vm6, %v6538_v58, %v6534_v3  ;;  %v6724_v58 = vsel %vm6442_vm4, %v6723_v44, %v10407_v0 }
 0x82d   : > { %v6464_v14 = vsel %vm6463_vm7, %v6462_v22, %v6457_v59  ;;  %v6617_v12 = vsel %vm6456_vm6, %v6616_v60, %v6612_v23  ;;  %v6728_v22 = vrot.slane %v10437_v25, %v10460_v2 }
 0x82e   : > { %v10449_v5 = vpop.xlane.xlu0 %6279  ;;  %v10451_v50 = vpop.xlane.xlu1 %6187 }
 0x82f   : > { %v6543_v51 = vrot.slane %v10451_v50, %v10470_v21 }
 0x831   : > { %v6544_v37 = vsel %vm6463_vm7, %v6543_v51, %v6539_v54 }
 0x832   : > { %v6156_v28 = vpop.xlane.xlu0 %6155  ;;  %v10454_v8 = vpop.xlane.xlu1 %6219 }
 0x833   : > { %v6504_v15 = vrot.slane %v6156_v28, %v10470_v21  ;;  %v6577_v28 = vrot.slane %v10443_v56, %v10467_v1  ;;  %v6582_v13 = vrot.slane %v10454_v8, %v10470_v21  ;;  %v6655_v56 = vrot.slane %v10449_v5, %v10467_v1 }
 0x835   : > { %v6505_v43 = vsel %vm6463_vm7, %v6504_v15, %v6500_v11  ;;  %v6578_v5 = vsel %vm6456_vm6, %v6577_v28, %v6573_v4 }
 0x836   : > { %v10462_v34 = vpop.xlane.xlu0 %6283  ;;  %v10464_v63 = vpop.xlane.xlu1 %6251 }
 0x837   : > { %v6621_v6 = vrot.slane %v10464_v63, %v10470_v21  ;;  %v6660_v40 = vrot.slane %v10462_v34, %v10470_v21  ;;  %v6583_v34 = vsel %vm6463_vm7, %v6582_v13, %v6578_v5 }
 0x839   : > { %v6622_v15 = vsel %vm6463_vm7, %v6621_v6, %v6617_v12 }
 0x83a   : > { %v10479_v17 = vpop.xlane.xlu0 %6315  ;;  %v6128_v10 = vpop.xlane.xlu1 %6127 }
 0x83b   : > { %v6469_v39 = vrot.slane %v6128_v10, %v10475_v30  ;;  %v6651_v10 = vsel %vm6449_vm5, %v6650_v61, %v10421_v36  ;;  %v6699_v45 = vrot.slane %v10479_v17, %v10470_v21  ;;  %v6733_v17 = vrot.slane %v10445_v55, %v10467_v1 }
 0x83c   : > { %v6656_v36 = vsel %vm6456_vm6, %v6655_v56, %v6651_v10  ;;  %v6729_v55 = vsel %vm6449_vm5, %v6728_v22, %v6724_v58 }
 0x83d   : > { %v6471_v18 = vsel %vm6470_vm8, %v6469_v39, %v6464_v14  ;;  %v6661_v39 = vsel %vm6463_vm7, %v6660_v40, %v6656_v36  ;;  %v6734_v27 = vsel %vm6456_vm6, %v6733_v17, %v6729_v55 }
 0x83e   : > { %v6160_v41 = vpop.xlane.xlu0 %6159  ;;  %v6256_v42 = vpop.xlane.xlu1 %6255 }
 0x83f   : > { %v6509_v49 = vrot.slane %v6160_v41, %v10475_v30  ;;  %v6626_v20 = vrot.slane %v6256_v42, %v10475_v30  ;;  %v6700_v41 = vsel %vm6463_vm7, %v6699_v45, %v6695_v52 }
 0x841   : > { %v6510_v19 = vsel %vm6470_vm8, %v6509_v49, %v6505_v43  ;;  %v6627_v7 = vsel %vm6470_vm8, %v6626_v20, %v6622_v15 }
 0x842   : > { %v6746_v50 = vsel %vm6745_vm9, %v6510_v19, %v6471_v18  ;;  %v6192_v57 = vpop.xlane.xlu0 %6191  ;;  %v6288_v32 = vpop.xlane.xlu1 %6287 }
 0x843   : > { %v6548_v35 = vrot.slane %v6192_v57, %v10475_v30  ;;  %v6665_v63 = vrot.slane %v6288_v32, %v10475_v30 }
 0x845   : > { %v6549_v62 = vsel %vm6470_vm8, %v6548_v35, %v6544_v37  ;;  %v6666_v25 = vsel %vm6470_vm8, %v6665_v63, %v6661_v39 }
 0x846   : > { %v6748_v8 = vsel %vm6747_vm10, %v6549_v62, %v6746_v50  ;;  %v6224_v38 = vpop.xlane.xlu0 %6223  ;;  %v6348_v33 = vpop.xlane.xlu1 %6347 }
 0x847   : > { %v6587_v29 = vrot.slane %v6224_v38, %v10475_v30  ;;  %v6738_v42 = vrot.slane %v6348_v33, %v10470_v21 }
 0x849   : > { %v6588_v24 = vsel %vm6470_vm8, %v6587_v29, %v6583_v34  ;;  %v6739_v21 = vsel %vm6463_vm7, %v6738_v42, %v6734_v27 }
 0x84a   : > { %v6750_v31 = vsel %vm6749_vm11, %v6588_v24, %v6748_v8  ;;  %v6320_v47 = vpop.xlane.xlu0 %6319 }
 0x84b   : > { %v6704_v2 = vrot.slane %v6320_v47, %v10475_v30  ;;  %v6752_v26 = vsel %vm6751_vm12, %v6627_v7, %v6750_v31 }
 0x84c   : > { %v6754_v11 = vsel %vm6753_vm13, %v6666_v25, %v6752_v26 }
 0x84d   : > { %v6705_v59 = vsel %vm6470_vm8, %v6704_v2, %v6700_v41 }
 0x84e   : > { %v6352_v1 = vpop.xlane.xlu0 %6351  ;;  %v6756_v49 = vsel %vm6755_vm15, %v6705_v59, %v6754_v11 }
 0x84f   : > { %v6743_v14 = vrot.slane %v6352_v1, %v10475_v30 }
 0x851   : > { %v6744_v51 = vsel %vm6470_vm8, %v6743_v14, %v6739_v21 }
 0x852   : > { %v6758_v43 = vsel %vm6757_vm0, %v6744_v51, %v6756_v49 }
 0x853   : > { %v6760_v0 = vsel %vm4461_vm14, %v6758_v43, 0.0 }
 0x854   : > { %6761 = vadd.xlane.f32.xlu1 %v6760_v0 }
 0x8e1   : > { %v6762_v46 = vpop.xlane.xlu1 %6761 }
 0x8e2   : > { %v6764_v18 = vadd.f32 %v6763_v48, %v6762_v46 }
 0x8e4   : > { %6767 = vperm.xlu0 %7878, %v6764_v18  }
 0x963   : > { %v6768_v30 = vpop.permute.xlu0 %6767 }
 0x964   : > { %6770 = vst [vmem:[%s330_s14] sm:$0xff] %v6768_v30 }
 0x965 PF: > { %s19_s30 = sadd.s32 1, %s8253_s30  }
 0x966   : > { %p16_p4 = scmp.ge.s32.totalorder %s19_s30, 4  }
 0x968   :  { %18 = sbr.rel (!%p16_p4) target bundleno = 1 (0x1), region = 109 }

</bundles_post_ra>
